<compile_context>
chip_gen: v6e
topology: v6e:2x2x1
jax: 0.10.0
libtpu: 0.0.40
codegen_flags: <defaults>
</compile_context>

<pallas_src>
import functools

import jax
import jax.numpy as jnp
from jax import lax
from jax.experimental import pallas as pl
from jax.experimental.pallas import tpu as pltpu


def _round_up(x, m):
    return ((x + m - 1) // m) * m


# ---------------------------------------------------------------------------
# Pallas transposed matmul:  (Cout, K) @ (K, M) -> (Cout, M) f32, with fused
# ReLU6 and (optionally) fused per-(channel, sample) spatial-mean subtraction.
# M (thousands) is the lane dimension -> unmasked, lane-dense stores.
# ---------------------------------------------------------------------------
def _matmul_t_kernel(w_ref, p_ref, o_ref, *, relu6, hw):
    acc = jnp.dot(w_ref[...], p_ref[...], preferred_element_type=jnp.float32)
    if relu6:
        acc = jnp.clip(acc, 0.0, 6.0)                      # nn.ReLU6
    if hw is None:
        o_ref[...] = acc
    else:
        # Fused per-sample spatial-mean subtraction: the tile holds an integer
        # number of whole samples (tm % hw == 0) and hw % 128 == 0, so every
        # chunk below is a lane-aligned static slice (no relayout).
        tm = acc.shape[1]
        for j in range(tm // hw):
            chunk = acc[:, j * hw:(j + 1) * hw]
            o_ref[:, j * hw:(j + 1) * hw] = (
                chunk - jnp.mean(chunk, axis=1, keepdims=True))


def pallas_matmul_t(wt, pt, *, relu6=False, hw_per_sample=None):
    """wt: (N, K) bf16, pt: (K, M) bf16 -> (N, M) float32."""
    N, K = wt.shape
    K2, M = pt.shape
    assert K == K2
    if hw_per_sample is not None:
        assert hw_per_sample % 128 == 0 and M % hw_per_sample == 0
        samples = M // hw_per_sample
        tm = max(1, samples // 2) * hw_per_sample          # ~half of M
    else:
        tm = max(128, _round_up((M + 1) // 2, 128))
    grid_m = -(-M // tm)                                   # normally 2
    Mp = grid_m * tm
    if Mp != M:
        pt = jnp.pad(pt, ((0, 0), (0, Mp - M)))            # whole fake samples
    out = pl.pallas_call(
        functools.partial(_matmul_t_kernel, relu6=relu6, hw=hw_per_sample),
        out_shape=jax.ShapeDtypeStruct((N, Mp), jnp.float32),
        grid=(grid_m,),
        in_specs=[
            pl.BlockSpec((N, K), lambda i: (0, 0)),        # weights, resident
            pl.BlockSpec((K, tm), lambda i: (0, i)),       # patch columns
        ],
        out_specs=pl.BlockSpec((N, tm), lambda i: (0, i)),
        compiler_params=pltpu.CompilerParams(
            dimension_semantics=("parallel",)),            # one tile per TC on v7x
    )(wt, pt)
    return out if Mp == M else out[:, :M]


# ---------------------------------------------------------------------------
# Conv / pooling glue (channel-major im2col, padding, reshapes) — plain JAX.
# ---------------------------------------------------------------------------
_PALLAS_MIN_M = 1024   # below ~one MXU pass of work, jnp.dot + XLA fusion wins

# TODO(synk): fully fuse im2col into the matmul kernel (space-to-depth phase
# planes + in-kernel tap accumulation) to remove the remaining ~4x patch
# inflation; the 65-wide phase planes require strided/relayouting tap slices
# that Mosaic handles poorly at these tiny channel counts, so the patches are
# built by XLA (in bf16, halving that round trip) for now.


def _im2col_cm(x, kh, kw, stride, pad):
    """Channel-major im2col: x (C, B, H, W) -> patches (kh*kw*C, B*Ho*Wo)."""
    C, B, H, W = x.shape
    xp = jnp.pad(x, ((0, 0), (0, 0), (pad, pad), (pad, pad)))
    Ho = (H + 2 * pad - kh) // stride + 1
    Wo = (W + 2 * pad - kw) // stride + 1
    taps = []
    for i in range(kh):
        for j in range(kw):
            patch = lax.slice(
                xp, (0, 0, i, j),
                (C, B, i + (Ho - 1) * stride + 1, j + (Wo - 1) * stride + 1),
                (1, 1, stride, stride))                    # (C, B, Ho, Wo)
            taps.append(patch.reshape(C, B * Ho * Wo))
    patches = jnp.concatenate(taps, axis=0)                # rows: (tap, cin)
    return patches, (B, Ho, Wo)


def conv2d_cm(x, w, *, stride, pad, relu6, subtract_mean):
    """x: (Cin, B, H, W); w: (KH, KW, Cin, Cout) -> (Cout, B, Ho, Wo) f32."""
    kh, kw, cin, cout = w.shape
    _, B, H, W = x.shape
    Ho = (H + 2 * pad - kh) // stride + 1
    Wo = (W + 2 * pad - kw) // stride + 1
    hw = Ho * Wo
    M = B * hw
    if M >= _PALLAS_MIN_M:
        # bf16 patches halve the HBM round trip of the dominant im2col stream;
        # the MXU still accumulates in f32.
        pt, _ = _im2col_cm(x.astype(jnp.bfloat16), kh, kw, stride, pad)
        wt = w.reshape(kh * kw * cin, cout).T.astype(jnp.bfloat16)  # (Cout, K)
        fuse_mean = subtract_mean and (hw % 128 == 0)
        out = pallas_matmul_t(wt, pt, relu6=relu6,
                              hw_per_sample=hw if fuse_mean else None)
        out = out.reshape(cout, B, Ho, Wo)
        if subtract_mean and not fuse_mean:
            out = out - jnp.mean(out, axis=(2, 3), keepdims=True)
        return out
    # Tiny matmul (conv4/5/6 at this config): a pallas_call launch costs more
    # than the op; let XLA fuse it with the ReLU6 / mean epilogue (f32).
    pt, _ = _im2col_cm(x, kh, kw, stride, pad)
    wt = w.reshape(kh * kw * cin, cout).T
    out = jnp.dot(wt, pt, preferred_element_type=jnp.float32)
    if relu6:
        out = jnp.clip(out, 0.0, 6.0)
    out = out.reshape(cout, B, Ho, Wo)
    if subtract_mean:
        out = out - jnp.mean(out, axis=(2, 3), keepdims=True)
    return out


def avg_pool_cm(x, k=4, stride=2, pad=1):
    # nn.AvgPool2d(count_include_pad=True): always divide by k*k.
    s = lax.reduce_window(x, 0.0, lax.add,
                          (1, 1, k, k), (1, 1, stride, stride),
                          [(0, 0), (0, 0), (pad, pad), (pad, pad)])
    return s / float(k * k)


# ---------------------------------------------------------------------------
# Fused compute_loss for all 5 stages in one row-tiled Pallas launch.
#
# Per stage s (PyTorch compute_loss, x-batch only):
#   r      = clamp((x+1e-10)/(y+1e-10), 0.7, 1.0)
#   mask   = (r < 1) & (r > 0.7)
#   bce    = BCELoss((r-0.7)/0.3, (a-0.7)/0.3)   mean over the WHOLE stage x
#   out_b  = (bce * sum_n mask_b + 1e-10) / (sum_n mask_b + 1e-10)
#   sumabs = sum |x * mask|                      (stage 5 only is returned)
#
# Kernel input: all stages' x (and matching y) repacked to (rows, 128); the
# kernel emits per-row lane sums; tiny per-(stage,batch) scalars go to XLA.
# ---------------------------------------------------------------------------
def _loss_rows_kernel(x_ref, y_ref, a_ref, bce_ref, mask_ref, axm_ref):
    x = x_ref[...]
    y = y_ref[...]
    a = a_ref[0, 0]                                        # scalar from SMEM

    r = jnp.clip((x + 1e-10) / (y + 1e-10), 0.7, 1.0)
    mask = jnp.logical_and(r < 1.0, r > 0.7).astype(jnp.float32)

    p = (r - 0.7) / 0.3                                    # in [0, 1] after clip
    t = (a - 0.7) / 0.3                                    # BCE target (scalar)
    # PyTorch BCELoss clamps the log terms at -100.
    log_p = jnp.maximum(jnp.log(p), -100.0)
    log_1mp = jnp.maximum(jnp.log(1.0 - p), -100.0)
    bce = -(t * log_p + (1.0 - t) * log_1mp)

    bce_ref[...] = jnp.sum(bce, axis=1, keepdims=True)
    mask_ref[...] = jnp.sum(mask, axis=1, keepdims=True)
    axm_ref[...] = jnp.sum(jnp.abs(x) * mask, axis=1, keepdims=True)


_STAGE_WEIGHTS = (0.02, 0.08, 0.2, 0.3, 0.4)


def fused_loss(feats, a, batch):
    """feats: list of 5 channel-major (C, 2*batch, H, W); x = [:, :batch]."""
    x_blocks, y_blocks, meta = [], [], []
    for f in feats:
        C, _, H, W = f.shape
        hw = H * W
        n = C * hw
        fx, fy = f[:, :batch], f[:, batch:]
        if hw % 128 == 0:
            # Zero-transpose repack: rows ordered (c, b, hw_block).
            rpg = hw // 128
            x_blocks.append(fx.reshape(C * batch * rpg, 128))
            y_blocks.append(fy.reshape(C * batch * rpg, 128))
            meta.append(("cb", C, rpg, C * batch * rpg))
        else:
            # Small late stages: per-sample flatten, rows ordered (b, chw_block).
            assert n % 128 == 0, "stage feature size must be a multiple of 128"
            rpg = n // 128
            x_blocks.append(jnp.moveaxis(fx, 1, 0).reshape(batch * rpg, 128))
            y_blocks.append(jnp.moveaxis(fy, 1, 0).reshape(batch * rpg, 128))
            meta.append(("bc", C, rpg, batch * rpg))
    X = jnp.concatenate(x_blocks, axis=0)                  # (Rtot, 128)
    Y = jnp.concatenate(y_blocks, axis=0)
    Rtot = X.shape[0]

    # Row tiling: bounded VMEM at any batch size, and a "parallel" grid so both
    # v7x TensorCores split the EUP-heavy work.  Padded rows are never read by
    # the finalization, so zero-padding is safe.
    tile_rows = min(512, _round_up(max(8, (Rtot + 1) // 2), 8))
    Rpad = _round_up(Rtot, tile_rows)
    if Rpad != Rtot:
        X = jnp.pad(X, ((0, Rpad - Rtot), (0, 0)))
        Y = jnp.pad(Y, ((0, Rpad - Rtot), (0, 0)))
    a_arr = jnp.full((1, 1), a, dtype=jnp.float32)

    bce_rows, mask_rows, axm_rows = pl.pallas_call(
        _loss_rows_kernel,
        out_shape=(jax.ShapeDtypeStruct((Rpad, 1), jnp.float32),
                   jax.ShapeDtypeStruct((Rpad, 1), jnp.float32),
                   jax.ShapeDtypeStruct((Rpad, 1), jnp.float32)),
        grid=(Rpad // tile_rows,),
        in_specs=[
            pl.BlockSpec((tile_rows, 128), lambda i: (i, 0)),
            pl.BlockSpec((tile_rows, 128), lambda i: (i, 0)),
            pl.BlockSpec(memory_space=pltpu.MemorySpace.SMEM),
        ],
        out_specs=(pl.BlockSpec((tile_rows, 1), lambda i: (i, 0)),
                   pl.BlockSpec((tile_rows, 1), lambda i: (i, 0)),
                   pl.BlockSpec((tile_rows, 1), lambda i: (i, 0))),
        compiler_params=pltpu.CompilerParams(
            dimension_semantics=("parallel",)),
    )(X, Y, a_arr)

    # TODO(synk): move this tiny per-(stage, batch) finalization in-kernel via
    # PrefetchScalarGridSpec stage offsets; it is a handful of small XLA ops.
    loss = jnp.zeros((batch, 1), jnp.float32)
    off = 0
    for s, (layout, C, rpg, n_rows) in enumerate(meta):
        if layout == "cb":
            msum = jnp.sum(mask_rows[off:off + n_rows].reshape(C, batch, rpg),
                           axis=(0, 2)).reshape(batch, 1)
        else:
            msum = jnp.sum(mask_rows[off:off + n_rows].reshape(batch, rpg),
                           axis=1, keepdims=True)
        bce_mean = jnp.sum(bce_rows[off:off + n_rows]) / float(n_rows * 128)
        loss = loss + _STAGE_WEIGHTS[s] * (bce_mean * msum + 1e-10) / (msum + 1e-10)
        off += n_rows
    n5 = meta[-1][3]
    loss5_out = jnp.sum(axm_rows[off - n5:off])
    return loss, loss5_out


# ---------------------------------------------------------------------------
# GNet forward
# ---------------------------------------------------------------------------
def gnet_forward(x, y, a, params):
    """x, y: NCHW (B, 3, S, S); a: scalar in [0.7, 1.0]."""
    B = x.shape[0]
    xy = jnp.concatenate([x, y], axis=0)                      # (2B, 3, S, S)
    h = jnp.transpose(xy, (1, 0, 2, 3)).astype(jnp.float32)   # channel-major

    feats = []
    for w in params["convs"][:5]:                             # main1..main5
        h = conv2d_cm(h, w, stride=2, pad=1, relu6=True, subtract_mean=True)
        feats.append(h)
    h6 = conv2d_cm(h, params["convs"][5], stride=1, pad=1,
                   relu6=False, subtract_mean=False)          # main6 conv
    h6 = avg_pool_cm(h6, 4, 2, 1)
    h6 = jax.nn.sigmoid(h6)

    # Fused per-stage losses (one row-tiled Pallas launch for all 5 stages).
    loss, loss5_out = fused_loss(feats, a, B)

    # Final Linear (M=2B, K=256, N=1): plain jnp, XLA fuses with the sigmoid.
    flat = jnp.moveaxis(h6, 1, 0).reshape(2 * B, -1)          # NCHW flatten
    z = jax.nn.sigmoid(jnp.dot(flat, params["linear"])) * 0.3 + 0.7
    x8, y8 = z[:B], z[B:]
    return x8, y8, loss, loss5_out


def init_params(key, conv_dim=2):
    dims = [3, conv_dim, conv_dim * 2, conv_dim * 4,
            conv_dim * 8, conv_dim * 16, conv_dim * 32]
    ksizes = [4, 4, 4, 4, 4, 3]
    keys = jax.random.split(key, 7)
    convs = []
    for i in range(6):
        k = ksizes[i]
        w = jax.random.normal(keys[i], (k, k, dims[i], dims[i + 1]),
                              jnp.float32) * 0.1
        convs.append(w)
    # nn.Linear(curr_dim * 8, 1, bias=False) with curr_dim = 16*conv_dim; equals
    # the flat size of x6 = (B, 32*conv_dim, 2, 2) for image_size=128.
    lin_in = conv_dim * 16 * 8
    linear = jax.random.normal(keys[6], (lin_in, 1), jnp.float32) * 0.1
    return {"convs": convs, "linear": linear}


if __name__ == "__main__":
    key = jax.random.PRNGKey(0)
    kx, ky, kp = jax.random.split(key, 3)
    B, image_size, conv_dim = 2, 128, 2
    # NCHW inputs, matching the PyTorch module's expected layout.
    x = jax.random.uniform(kx, (B, 3, image_size, image_size), jnp.float32)
    y = jax.random.uniform(ky, (B, 3, image_size, image_size), jnp.float32)
    params = init_params(kp, conv_dim)
    a = 0.9

    fwd = jax.jit(functools.partial(gnet_forward, params=params))
    x8, y8, loss, loss5_out = fwd(x, y, a)
    jax.block_until_ready((x8, y8, loss, loss5_out))
    assert x8.shape == (B, 1) and y8.shape == (B, 1)
    assert loss.shape == (B, 1) and loss5_out.shape == ()
    print("KERNEL_OK")
</pallas_src>

<mosaic_0001>
module attributes {stable_mosaic.version = 11 : i64} {
  func.func @_matmul_t_kernel(%arg0: i32, %arg1: memref<2x48xbf16, #tpu.memory_space<vmem>>, %arg2: memref<48x8192xbf16, #tpu.memory_space<vmem>>, %arg3: memref<2x8192xf32, #tpu.memory_space<vmem>>) attributes {dimension_semantics = [#tpu.dimension_semantics<parallel>], iteration_bounds = array<i64: 2>, scalar_prefetch = 0 : i64, scratch_operands = 0 : i64, tpu.core_type = #tpu.core_type<tc>, window_params = [{pipeline_mode = #tpu.pipeline_mode<synchronous>, transform_indices = @transform_0, window_bounds = array<i64: 2, 48>}, {transform_indices = @transform_1, window_bounds = array<i64: 48, 8192>}, {transform_indices = @transform_2, window_bounds = array<i64: 2, 8192>}]} {
    %c0 = arith.constant 0 : index
    %c0_0 = arith.constant 0 : index
    %0 = vector.load %arg1[%c0, %c0_0] : memref<2x48xbf16, #tpu.memory_space<vmem>>, vector<2x48xbf16>
    %c0_1 = arith.constant 0 : index
    %c0_2 = arith.constant 0 : index
    %1 = vector.load %arg2[%c0_1, %c0_2] : memref<48x8192xbf16, #tpu.memory_space<vmem>>, vector<48x8192xbf16>
    %cst = arith.constant dense<0.000000e+00> : vector<2x8192xf32>
    %2 = tpu.matmul %0, %1, %cst {dimension_numbers = #tpu.dot_dimension_numbers<[1], [0], [0], [1], [0, 0, 1, 1], [], []>} : vector<2x48xbf16>, vector<48x8192xbf16>, vector<2x8192xf32> -> vector<2x8192xf32>
    %cst_3 = arith.constant 0.000000e+00 : f32
    %cst_4 = arith.constant 6.000000e+00 : f32
    %3 = vector.broadcast %cst_3 : f32 to vector<2x8192xf32>
    %4 = arith.maximumf %3, %2 : vector<2x8192xf32>
    %5 = vector.broadcast %cst_4 : f32 to vector<2x8192xf32>
    %6 = arith.minimumf %5, %4 : vector<2x8192xf32>
    %7 = vector.extract_strided_slice %6 {offsets = [0, 0], sizes = [2, 4096], strides = [1, 1]} : vector<2x8192xf32> to vector<2x4096xf32>
    %cst_5 = arith.constant dense<0.000000e+00> : vector<2xf32>
    %8 = vector.multi_reduction <add>, %7, %cst_5 [1] : vector<2x4096xf32> to vector<2xf32>
    %9 = vector.shape_cast %8 : vector<2xf32> to vector<2x1xf32>
    %cst_6 = arith.constant 4.096000e+03 : f32
    %10 = vector.broadcast %cst_6 : f32 to vector<2x1xf32>
    %11 = arith.divf %9, %10 : vector<2x1xf32>
    %12 = vector.broadcast %11 : vector<2x1xf32> to vector<2x4096xf32>
    %13 = arith.subf %7, %12 : vector<2x4096xf32>
    %c0_7 = arith.constant 0 : index
    %c0_8 = arith.constant 0 : index
    %14 = vector.load %arg3[%c0_7, %c0_8] : memref<2x8192xf32, #tpu.memory_space<vmem>>, vector<2x4096xf32>
    tpu.vector_store %arg3[%c0_7, %c0_8], %13 {strides = array<i32>} : memref<2x8192xf32, #tpu.memory_space<vmem>>, vector<2x4096xf32>,
    %15 = vector.extract_strided_slice %6 {offsets = [0, 4096], sizes = [2, 4096], strides = [1, 1]} : vector<2x8192xf32> to vector<2x4096xf32>
    %cst_9 = arith.constant dense<0.000000e+00> : vector<2xf32>
    %16 = vector.multi_reduction <add>, %15, %cst_9 [1] : vector<2x4096xf32> to vector<2xf32>
    %17 = vector.shape_cast %16 : vector<2xf32> to vector<2x1xf32>
    %cst_10 = arith.constant 4.096000e+03 : f32
    %18 = vector.broadcast %cst_10 : f32 to vector<2x1xf32>
    %19 = arith.divf %17, %18 : vector<2x1xf32>
    %20 = vector.broadcast %19 : vector<2x1xf32> to vector<2x4096xf32>
    %21 = arith.subf %15, %20 : vector<2x4096xf32>
    %c0_11 = arith.constant 0 : index
    %c4096 = arith.constant 4096 : index
    %22 = vector.load %arg3[%c0_11, %c4096] : memref<2x8192xf32, #tpu.memory_space<vmem>>, vector<2x4096xf32>
    tpu.vector_store %arg3[%c0_11, %c4096], %21 {strides = array<i32>} : memref<2x8192xf32, #tpu.memory_space<vmem>>, vector<2x4096xf32>,
    return
  }
  func.func @transform_0(%arg0: i32) -> (i32, i32) {
    %c0_i32 = arith.constant 0 : i32
    %c0_i32_0 = arith.constant 0 : i32
    %c0_i32_1 = arith.constant 0 : i32
    return %c0_i32, %c0_i32_0 : i32, i32
  }
  func.func @transform_1(%arg0: i32) -> (i32, i32) {
    %c0_i32 = arith.constant 0 : i32
    %c0_i32_0 = arith.constant 0 : i32
    return %c0_i32, %arg0 : i32, i32
  }
  func.func @transform_2(%arg0: i32) -> (i32, i32) {
    %c0_i32 = arith.constant 0 : i32
    %c0_i32_0 = arith.constant 0 : i32
    return %c0_i32, %arg0 : i32, i32
  }
}

module attributes {stable_mosaic.version = 11 : i64} {
  func.func @_matmul_t_kernel(%arg0: i32, %arg1: memref<4x32xbf16, #tpu.memory_space<vmem>>, %arg2: memref<32x2048xbf16, #tpu.memory_space<vmem>>, %arg3: memref<4x2048xf32, #tpu.memory_space<vmem>>) attributes {dimension_semantics = [#tpu.dimension_semantics<parallel>], iteration_bounds = array<i64: 2>, scalar_prefetch = 0 : i64, scratch_operands = 0 : i64, tpu.core_type = #tpu.core_type<tc>, window_params = [{pipeline_mode = #tpu.pipeline_mode<synchronous>, transform_indices = @transform_0, window_bounds = array<i64: 4, 32>}, {transform_indices = @transform_1, window_bounds = array<i64: 32, 2048>}, {transform_indices = @transform_2, window_bounds = array<i64: 4, 2048>}]} {
    %c0 = arith.constant 0 : index
    %c0_0 = arith.constant 0 : index
    %0 = vector.load %arg1[%c0, %c0_0] : memref<4x32xbf16, #tpu.memory_space<vmem>>, vector<4x32xbf16>
    %c0_1 = arith.constant 0 : index
    %c0_2 = arith.constant 0 : index
    %1 = vector.load %arg2[%c0_1, %c0_2] : memref<32x2048xbf16, #tpu.memory_space<vmem>>, vector<32x2048xbf16>
    %cst = arith.constant dense<0.000000e+00> : vector<4x2048xf32>
    %2 = tpu.matmul %0, %1, %cst {dimension_numbers = #tpu.dot_dimension_numbers<[1], [0], [0], [1], [0, 0, 1, 1], [], []>} : vector<4x32xbf16>, vector<32x2048xbf16>, vector<4x2048xf32> -> vector<4x2048xf32>
    %cst_3 = arith.constant 0.000000e+00 : f32
    %cst_4 = arith.constant 6.000000e+00 : f32
    %3 = vector.broadcast %cst_3 : f32 to vector<4x2048xf32>
    %4 = arith.maximumf %3, %2 : vector<4x2048xf32>
    %5 = vector.broadcast %cst_4 : f32 to vector<4x2048xf32>
    %6 = arith.minimumf %5, %4 : vector<4x2048xf32>
    %7 = vector.extract_strided_slice %6 {offsets = [0, 0], sizes = [4, 1024], strides = [1, 1]} : vector<4x2048xf32> to vector<4x1024xf32>
    %cst_5 = arith.constant dense<0.000000e+00> : vector<4xf32>
    %8 = vector.multi_reduction <add>, %7, %cst_5 [1] : vector<4x1024xf32> to vector<4xf32>
    %9 = vector.shape_cast %8 : vector<4xf32> to vector<4x1xf32>
    %cst_6 = arith.constant 1.024000e+03 : f32
    %10 = vector.broadcast %cst_6 : f32 to vector<4x1xf32>
    %11 = arith.divf %9, %10 : vector<4x1xf32>
    %12 = vector.broadcast %11 : vector<4x1xf32> to vector<4x1024xf32>
    %13 = arith.subf %7, %12 : vector<4x1024xf32>
    %c0_7 = arith.constant 0 : index
    %c0_8 = arith.constant 0 : index
    %14 = vector.load %arg3[%c0_7, %c0_8] : memref<4x2048xf32, #tpu.memory_space<vmem>>, vector<4x1024xf32>
    tpu.vector_store %arg3[%c0_7, %c0_8], %13 {strides = array<i32>} : memref<4x2048xf32, #tpu.memory_space<vmem>>, vector<4x1024xf32>,
    %15 = vector.extract_strided_slice %6 {offsets = [0, 1024], sizes = [4, 1024], strides = [1, 1]} : vector<4x2048xf32> to vector<4x1024xf32>
    %cst_9 = arith.constant dense<0.000000e+00> : vector<4xf32>
    %16 = vector.multi_reduction <add>, %15, %cst_9 [1] : vector<4x1024xf32> to vector<4xf32>
    %17 = vector.shape_cast %16 : vector<4xf32> to vector<4x1xf32>
    %cst_10 = arith.constant 1.024000e+03 : f32
    %18 = vector.broadcast %cst_10 : f32 to vector<4x1xf32>
    %19 = arith.divf %17, %18 : vector<4x1xf32>
    %20 = vector.broadcast %19 : vector<4x1xf32> to vector<4x1024xf32>
    %21 = arith.subf %15, %20 : vector<4x1024xf32>
    %c0_11 = arith.constant 0 : index
    %c1024 = arith.constant 1024 : index
    %22 = vector.load %arg3[%c0_11, %c1024] : memref<4x2048xf32, #tpu.memory_space<vmem>>, vector<4x1024xf32>
    tpu.vector_store %arg3[%c0_11, %c1024], %21 {strides = array<i32>} : memref<4x2048xf32, #tpu.memory_space<vmem>>, vector<4x1024xf32>,
    return
  }
  func.func @transform_0(%arg0: i32) -> (i32, i32) {
    %c0_i32 = arith.constant 0 : i32
    %c0_i32_0 = arith.constant 0 : i32
    %c0_i32_1 = arith.constant 0 : i32
    return %c0_i32, %c0_i32_0 : i32, i32
  }
  func.func @transform_1(%arg0: i32) -> (i32, i32) {
    %c0_i32 = arith.constant 0 : i32
    %c0_i32_0 = arith.constant 0 : i32
    return %c0_i32, %arg0 : i32, i32
  }
  func.func @transform_2(%arg0: i32) -> (i32, i32) {
    %c0_i32 = arith.constant 0 : i32
    %c0_i32_0 = arith.constant 0 : i32
    return %c0_i32, %arg0 : i32, i32
  }
}

module attributes {stable_mosaic.version = 11 : i64} {
  func.func @_matmul_t_kernel(%arg0: i32, %arg1: memref<8x64xbf16, #tpu.memory_space<vmem>>, %arg2: memref<64x512xbf16, #tpu.memory_space<vmem>>, %arg3: memref<8x512xf32, #tpu.memory_space<vmem>>) attributes {dimension_semantics = [#tpu.dimension_semantics<parallel>], iteration_bounds = array<i64: 2>, scalar_prefetch = 0 : i64, scratch_operands = 0 : i64, tpu.core_type = #tpu.core_type<tc>, window_params = [{pipeline_mode = #tpu.pipeline_mode<synchronous>, transform_indices = @transform_0, window_bounds = array<i64: 8, 64>}, {transform_indices = @transform_1, window_bounds = array<i64: 64, 512>}, {transform_indices = @transform_2, window_bounds = array<i64: 8, 512>}]} {
    %c0 = arith.constant 0 : index
    %c0_0 = arith.constant 0 : index
    %0 = vector.load %arg1[%c0, %c0_0] : memref<8x64xbf16, #tpu.memory_space<vmem>>, vector<8x64xbf16>
    %c0_1 = arith.constant 0 : index
    %c0_2 = arith.constant 0 : index
    %1 = vector.load %arg2[%c0_1, %c0_2] : memref<64x512xbf16, #tpu.memory_space<vmem>>, vector<64x512xbf16>
    %cst = arith.constant dense<0.000000e+00> : vector<8x512xf32>
    %2 = tpu.matmul %0, %1, %cst {dimension_numbers = #tpu.dot_dimension_numbers<[1], [0], [0], [1], [0, 0, 1, 1], [], []>} : vector<8x64xbf16>, vector<64x512xbf16>, vector<8x512xf32> -> vector<8x512xf32>
    %cst_3 = arith.constant 0.000000e+00 : f32
    %cst_4 = arith.constant 6.000000e+00 : f32
    %3 = vector.broadcast %cst_3 : f32 to vector<8x512xf32>
    %4 = arith.maximumf %3, %2 : vector<8x512xf32>
    %5 = vector.broadcast %cst_4 : f32 to vector<8x512xf32>
    %6 = arith.minimumf %5, %4 : vector<8x512xf32>
    %7 = vector.extract_strided_slice %6 {offsets = [0, 0], sizes = [8, 256], strides = [1, 1]} : vector<8x512xf32> to vector<8x256xf32>
    %cst_5 = arith.constant dense<0.000000e+00> : vector<8xf32>
    %8 = vector.multi_reduction <add>, %7, %cst_5 [1] : vector<8x256xf32> to vector<8xf32>
    %9 = vector.shape_cast %8 : vector<8xf32> to vector<8x1xf32>
    %cst_6 = arith.constant 2.560000e+02 : f32
    %10 = vector.broadcast %cst_6 : f32 to vector<8x1xf32>
    %11 = arith.divf %9, %10 : vector<8x1xf32>
    %12 = vector.broadcast %11 : vector<8x1xf32> to vector<8x256xf32>
    %13 = arith.subf %7, %12 : vector<8x256xf32>
    %c0_7 = arith.constant 0 : index
    %c0_8 = arith.constant 0 : index
    %14 = vector.load %arg3[%c0_7, %c0_8] : memref<8x512xf32, #tpu.memory_space<vmem>>, vector<8x256xf32>
    tpu.vector_store %arg3[%c0_7, %c0_8], %13 {strides = array<i32>} : memref<8x512xf32, #tpu.memory_space<vmem>>, vector<8x256xf32>,
    %15 = vector.extract_strided_slice %6 {offsets = [0, 256], sizes = [8, 256], strides = [1, 1]} : vector<8x512xf32> to vector<8x256xf32>
    %cst_9 = arith.constant dense<0.000000e+00> : vector<8xf32>
    %16 = vector.multi_reduction <add>, %15, %cst_9 [1] : vector<8x256xf32> to vector<8xf32>
    %17 = vector.shape_cast %16 : vector<8xf32> to vector<8x1xf32>
    %cst_10 = arith.constant 2.560000e+02 : f32
    %18 = vector.broadcast %cst_10 : f32 to vector<8x1xf32>
    %19 = arith.divf %17, %18 : vector<8x1xf32>
    %20 = vector.broadcast %19 : vector<8x1xf32> to vector<8x256xf32>
    %21 = arith.subf %15, %20 : vector<8x256xf32>
    %c0_11 = arith.constant 0 : index
    %c256 = arith.constant 256 : index
    %22 = vector.load %arg3[%c0_11, %c256] : memref<8x512xf32, #tpu.memory_space<vmem>>, vector<8x256xf32>
    tpu.vector_store %arg3[%c0_11, %c256], %21 {strides = array<i32>} : memref<8x512xf32, #tpu.memory_space<vmem>>, vector<8x256xf32>,
    return
  }
  func.func @transform_0(%arg0: i32) -> (i32, i32) {
    %c0_i32 = arith.constant 0 : i32
    %c0_i32_0 = arith.constant 0 : i32
    %c0_i32_1 = arith.constant 0 : i32
    return %c0_i32, %c0_i32_0 : i32, i32
  }
  func.func @transform_1(%arg0: i32) -> (i32, i32) {
    %c0_i32 = arith.constant 0 : i32
    %c0_i32_0 = arith.constant 0 : i32
    return %c0_i32, %arg0 : i32, i32
  }
  func.func @transform_2(%arg0: i32) -> (i32, i32) {
    %c0_i32 = arith.constant 0 : i32
    %c0_i32_0 = arith.constant 0 : i32
    return %c0_i32, %arg0 : i32, i32
  }
}

module attributes {stable_mosaic.version = 11 : i64} {
  func.func @_loss_rows_kernel(%arg0: i32, %arg1: memref<128x128xf32, #tpu.memory_space<vmem>>, %arg2: memref<128x128xf32, #tpu.memory_space<vmem>>, %arg3: memref<1x1xf32, #tpu.memory_space<smem>>, %arg4: memref<128x1xf32, #tpu.memory_space<vmem>>, %arg5: memref<128x1xf32, #tpu.memory_space<vmem>>, %arg6: memref<128x1xf32, #tpu.memory_space<vmem>>) attributes {dimension_semantics = [#tpu.dimension_semantics<parallel>], iteration_bounds = array<i64: 2>, scalar_prefetch = 0 : i64, scratch_operands = 0 : i64, tpu.core_type = #tpu.core_type<tc>, window_params = [{transform_indices = @transform_0, window_bounds = array<i64: 128, 128>}, {transform_indices = @transform_1, window_bounds = array<i64: 128, 128>}, {transform_indices = @transform_2, window_bounds = array<i64: 1, 1>}, {transform_indices = @transform_3, window_bounds = array<i64: 128, 1>}, {transform_indices = @transform_4, window_bounds = array<i64: 128, 1>}, {transform_indices = @transform_5, window_bounds = array<i64: 128, 1>}]} {
    %c0 = arith.constant 0 : index
    %c0_0 = arith.constant 0 : index
    %0 = vector.load %arg1[%c0, %c0_0] : memref<128x128xf32, #tpu.memory_space<vmem>>, vector<128x128xf32>
    %c0_1 = arith.constant 0 : index
    %c0_2 = arith.constant 0 : index
    %1 = vector.load %arg2[%c0_1, %c0_2] : memref<128x128xf32, #tpu.memory_space<vmem>>, vector<128x128xf32>
    %c0_3 = arith.constant 0 : index
    %c0_4 = arith.constant 0 : index
    %2 = memref.load %arg3[%c0_3, %c0_4] : memref<1x1xf32, #tpu.memory_space<smem>>
    %cst = arith.constant 1.000000e-10 : f32
    %3 = vector.broadcast %cst : f32 to vector<128x128xf32>
    %4 = arith.addf %0, %3 : vector<128x128xf32>
    %cst_5 = arith.constant 1.000000e-10 : f32
    %5 = vector.broadcast %cst_5 : f32 to vector<128x128xf32>
    %6 = arith.addf %1, %5 : vector<128x128xf32>
    %7 = arith.divf %4, %6 : vector<128x128xf32>
    %cst_6 = arith.constant 0.699999988 : f32
    %cst_7 = arith.constant 1.000000e+00 : f32
    %8 = vector.broadcast %cst_6 : f32 to vector<128x128xf32>
    %9 = arith.maximumf %8, %7 : vector<128x128xf32>
    %10 = vector.broadcast %cst_7 : f32 to vector<128x128xf32>
    %11 = arith.minimumf %10, %9 : vector<128x128xf32>
    %cst_8 = arith.constant 1.000000e+00 : f32
    %12 = vector.broadcast %cst_8 : f32 to vector<128x128xf32>
    %13 = arith.cmpf olt, %11, %12 : vector<128x128xf32>
    %cst_9 = arith.constant 0.699999988 : f32
    %14 = vector.broadcast %cst_9 : f32 to vector<128x128xf32>
    %15 = arith.cmpf ogt, %11, %14 : vector<128x128xf32>
    %16 = arith.andi %13, %15 : vector<128x128xi1>
    %17 = arith.extui %16 : vector<128x128xi1> to vector<128x128xi32>
    %18 = arith.sitofp %17 : vector<128x128xi32> to vector<128x128xf32>
    %cst_10 = arith.constant 0.699999988 : f32
    %19 = vector.broadcast %cst_10 : f32 to vector<128x128xf32>
    %20 = arith.subf %11, %19 : vector<128x128xf32>
    %cst_11 = arith.constant 3.000000e-01 : f32
    %21 = vector.broadcast %cst_11 : f32 to vector<128x128xf32>
    %22 = arith.divf %20, %21 : vector<128x128xf32>
    %cst_12 = arith.constant 0.699999988 : f32
    %23 = arith.subf %2, %cst_12 : f32
    %cst_13 = arith.constant 3.000000e-01 : f32
    %24 = arith.divf %23, %cst_13 : f32
    %25 = math.log %22 : vector<128x128xf32>
    %cst_14 = arith.constant -1.000000e+02 : f32
    %26 = vector.broadcast %cst_14 : f32 to vector<128x128xf32>
    %27 = arith.maximumf %25, %26 : vector<128x128xf32>
    %cst_15 = arith.constant 1.000000e+00 : f32
    %28 = vector.broadcast %cst_15 : f32 to vector<128x128xf32>
    %29 = arith.subf %28, %22 : vector<128x128xf32>
    %30 = math.log %29 : vector<128x128xf32>
    %cst_16 = arith.constant -1.000000e+02 : f32
    %31 = vector.broadcast %cst_16 : f32 to vector<128x128xf32>
    %32 = arith.maximumf %30, %31 : vector<128x128xf32>
    %33 = vector.broadcast %24 : f32 to vector<128x128xf32>
    %34 = arith.mulf %33, %27 : vector<128x128xf32>
    %cst_17 = arith.constant 1.000000e+00 : f32
    %35 = arith.subf %cst_17, %24 : f32
    %36 = vector.broadcast %35 : f32 to vector<128x128xf32>
    %37 = arith.mulf %36, %32 : vector<128x128xf32>
    %38 = arith.addf %34, %37 : vector<128x128xf32>
    %cst_18 = arith.constant 0.000000e+00 : f32
    %39 = vector.broadcast %cst_18 : f32 to vector<128x128xf32>
    %40 = arith.subf %39, %38 : vector<128x128xf32>
    %cst_19 = arith.constant dense<0.000000e+00> : vector<128xf32>
    %41 = vector.multi_reduction <add>, %40, %cst_19 [1] : vector<128x128xf32> to vector<128xf32>
    %42 = vector.shape_cast %41 : vector<128xf32> to vector<128x1xf32>
    %c0_20 = arith.constant 0 : index
    %c0_21 = arith.constant 0 : index
    %43 = vector.load %arg4[%c0_20, %c0_21] : memref<128x1xf32, #tpu.memory_space<vmem>>, vector<128x1xf32>
    tpu.vector_store %arg4[%c0_20, %c0_21], %42 {strides = array<i32>} : memref<128x1xf32, #tpu.memory_space<vmem>>, vector<128x1xf32>,
    %cst_22 = arith.constant dense<0.000000e+00> : vector<128xf32>
    %44 = vector.multi_reduction <add>, %18, %cst_22 [1] : vector<128x128xf32> to vector<128xf32>
    %45 = vector.shape_cast %44 : vector<128xf32> to vector<128x1xf32>
    %c0_23 = arith.constant 0 : index
    %c0_24 = arith.constant 0 : index
    %46 = vector.load %arg5[%c0_23, %c0_24] : memref<128x1xf32, #tpu.memory_space<vmem>>, vector<128x1xf32>
    tpu.vector_store %arg5[%c0_23, %c0_24], %45 {strides = array<i32>} : memref<128x1xf32, #tpu.memory_space<vmem>>, vector<128x1xf32>,
    %47 = math.absf %0 : vector<128x128xf32>
    %48 = arith.mulf %47, %18 : vector<128x128xf32>
    %cst_25 = arith.constant dense<0.000000e+00> : vector<128xf32>
    %49 = vector.multi_reduction <add>, %48, %cst_25 [1] : vector<128x128xf32> to vector<128xf32>
    %50 = vector.shape_cast %49 : vector<128xf32> to vector<128x1xf32>
    %c0_26 = arith.constant 0 : index
    %c0_27 = arith.constant 0 : index
    %51 = vector.load %arg6[%c0_26, %c0_27] : memref<128x1xf32, #tpu.memory_space<vmem>>, vector<128x1xf32>
    tpu.vector_store %arg6[%c0_26, %c0_27], %50 {strides = array<i32>} : memref<128x1xf32, #tpu.memory_space<vmem>>, vector<128x1xf32>,
    return
  }
  func.func @transform_0(%arg0: i32) -> (i32, i32) {
    %c0_i32 = arith.constant 0 : i32
    %c0_i32_0 = arith.constant 0 : i32
    return %arg0, %c0_i32 : i32, i32
  }
  func.func @transform_1(%arg0: i32) -> (i32, i32) {
    %c0_i32 = arith.constant 0 : i32
    %c0_i32_0 = arith.constant 0 : i32
    return %arg0, %c0_i32 : i32, i32
  }
  func.func @transform_2(%arg0: i32) -> (i32, i32) {
    %c0_i32 = arith.constant 0 : i32
    %c0_i32_0 = arith.constant 0 : i32
    %c0_i32_1 = arith.constant 0 : i32
    return %c0_i32, %c0_i32_0 : i32, i32
  }
  func.func @transform_3(%arg0: i32) -> (i32, i32) {
    %c0_i32 = arith.constant 0 : i32
    %c0_i32_0 = arith.constant 0 : i32
    return %arg0, %c0_i32 : i32, i32
  }
  func.func @transform_4(%arg0: i32) -> (i32, i32) {
    %c0_i32 = arith.constant 0 : i32
    %c0_i32_0 = arith.constant 0 : i32
    return %arg0, %c0_i32 : i32, i32
  }
  func.func @transform_5(%arg0: i32) -> (i32, i32) {
    %c0_i32 = arith.constant 0 : i32
    %c0_i32_0 = arith.constant 0 : i32
    return %arg0, %c0_i32 : i32, i32
  }
}

</mosaic_0001>

<bundles_post_ra>
// kernel: gnet_forward.4
= control target key start
LH: loop header
LB: loop body
LE: loop exit
PB: predicated region body
PF: predicated region fallthrough
CT: control target
= control target key end

     0   :  { %s4080_s9 = smov 0   ;;  %s4082_s10 = smov 0   ;;  %s5264_s0 = inlined_call_operand.vmem [shape: bf16[2,48], index: 0, kind: input, shape index: {}]   ;;  %s5265_s1 = inlined_call_operand.vmem [shape: bf16[48,16384], index: 1, kind: input, shape index: {}]   ;;  %s5266_s2 = inlined_call_operand.vmem [shape: f32[2,16384], index: 2, kind: output, shape index: {}]  }
   0x1   :  { %s4084_s11 = smov 0  }
   0x2 LB: > { %s3774_s12 = sadd.s32 4294967295, %s4061_s11   ;;  %s4097_s13 = sadd.s32 1, %s4061_s11   ;;  %s4061_s11 = sphi %s4084_s11, %s5317_s11   ;;  %s4057_s10 = sphi %s4082_s10, %s5316_s10   ;;  %s4053_s9 = sphi %s4080_s9, %s5315_s9  }
   0x3   : > { %s37_s14 = ssub.s32 %s4061_s11, %s4097_s13  ;;  %s40_s15 = sadd.s32 1, %s4057_s10 }
   0x4   : > { %p38_p0 = scmp.eq.s32.totalorder %s37_s14, 0  ;;  %p47_p1 = scmp.ne.s32.totalorder %s4057_s10, %s4053_s9 }
   0x5   : > { %p48_p2 = scmp.eq.s32.totalorder %s4061_s11, 0  ;;  %p3777_p4 = scmp.ge.s32.totalorder %s4061_s11, 2 }
   0x6   : > { %s4106_s16 = scalar_select %p38_p0, %s4057_s10, %s40_s15  }
   0x7   : > { %p49_p3 = por %p48_p2, %p47_p1  ;;  %102 = sbr.rel (%p3777_p4) target bundleno = 113 (0x71), region = 20 }
   0xc   : > { %105 = sbr.rel (!%p49_p3) target bundleno = 113 (0x71), region = 24  ;;  %s107_s17 = sand.u32 (%p49_p3), 1, %s4057_s10  }
   0xd   : > { %s4009_s18 = sshll.u32 (%p49_p3), %s4061_s11, 8  ;;  %s4010_s19 = smul.u32 (%p49_p3), 1536, %s107_s17 }
   0xe   : > { %s4114_s22 = scalar_lea.vmem (%p49_p3), %s5265_s1, %s4009_s18 }
   0xf   : > { %v125_v0 = vld [vmem:[%s4114_s22] sm:$0xff] (%p49_p3)  ;;  %v127_v1 = vld [vmem:[%s4114_s22 + $0x8] sm:$0xff] (%p49_p3)  ;;  %v129_v2 = vld [vmem:[%s4114_s22 + $0x10] sm:$0xff] (%p49_p3)  ;;  %s4122_s23 = scalar_lea.vmem (%p49_p3), [#allocation2], %s4010_s19 }
  0x10   : > { %v131_v3 = vld [vmem:[%s4114_s22 + $0x18] sm:$0xff] (%p49_p3)  ;;  %v133_v4 = vld [vmem:[%s4114_s22 + $0x20] sm:$0xff] (%p49_p3)  ;;  %v135_v5 = vld [vmem:[%s4114_s22 + $0x28] sm:$0xff] (%p49_p3)  ;;  %126 = vst [vmem:[%s4122_s23] sm:$0xff] (%p49_p3), %v125_v0 }
  0x11   : > { %128 = vst [vmem:[%s4122_s23 + $0x8] sm:$0xff] %v127_v1  ;;  %130 = vst [vmem:[%s4122_s23 + $0x10] sm:$0xff] %v129_v2  ;;  %v137_v6 = vld [vmem:[%s4114_s22 + $0x30] sm:$0xff]  ;;  %v139_v7 = vld [vmem:[%s4114_s22 + $0x38] sm:$0xff] }
  0x12   : > { %132 = vst [vmem:[%s4122_s23 + $0x18] sm:$0xff] %v131_v3  ;;  %134 = vst [vmem:[%s4122_s23 + $0x20] sm:$0xff] %v133_v4  ;;  %v141_v8 = vld [vmem:[%s4114_s22 + $0x40] sm:$0xff]  ;;  %v143_v9 = vld [vmem:[%s4114_s22 + $0x48] sm:$0xff] }
  0x13   : > { %136 = vst [vmem:[%s4122_s23 + $0x28] sm:$0xff] %v135_v5  ;;  %138 = vst [vmem:[%s4122_s23 + $0x30] sm:$0xff] %v137_v6  ;;  %v145_v10 = vld [vmem:[%s4114_s22 + $0x50] sm:$0xff]  ;;  %v147_v11 = vld [vmem:[%s4114_s22 + $0x58] sm:$0xff] }
  0x14   : > { %140 = vst [vmem:[%s4122_s23 + $0x38] sm:$0xff] %v139_v7  ;;  %142 = vst [vmem:[%s4122_s23 + $0x40] sm:$0xff] %v141_v8  ;;  %v149_v12 = vld [vmem:[%s4114_s22 + $0x60] sm:$0xff]  ;;  %v151_v13 = vld [vmem:[%s4114_s22 + $0x68] sm:$0xff] }
  0x15   : > { %144 = vst [vmem:[%s4122_s23 + $0x48] sm:$0xff] %v143_v9  ;;  %146 = vst [vmem:[%s4122_s23 + $0x50] sm:$0xff] %v145_v10  ;;  %v153_v14 = vld [vmem:[%s4114_s22 + $0x70] sm:$0xff]  ;;  %v155_v15 = vld [vmem:[%s4114_s22 + $0x78] sm:$0xff] }
  0x16   : > { %148 = vst [vmem:[%s4122_s23 + $0x58] sm:$0xff] %v147_v11  ;;  %150 = vst [vmem:[%s4122_s23 + $0x60] sm:$0xff] %v149_v12  ;;  %v157_v16 = vld [vmem:[%s4114_s22 + $0x80] sm:$0xff]  ;;  %v159_v17 = vld [vmem:[%s4114_s22 + $0x88] sm:$0xff] }
  0x17   : > { %152 = vst [vmem:[%s4122_s23 + $0x68] sm:$0xff] %v151_v13  ;;  %154 = vst [vmem:[%s4122_s23 + $0x70] sm:$0xff] %v153_v14  ;;  %v161_v18 = vld [vmem:[%s4114_s22 + $0x90] sm:$0xff]  ;;  %v163_v19 = vld [vmem:[%s4114_s22 + $0x98] sm:$0xff] }
  0x18   : > { %156 = vst [vmem:[%s4122_s23 + $0x78] sm:$0xff] %v155_v15  ;;  %158 = vst [vmem:[%s4122_s23 + $0x80] sm:$0xff] %v157_v16  ;;  %v165_v20 = vld [vmem:[%s4114_s22 + $0xa0] sm:$0xff]  ;;  %v167_v21 = vld [vmem:[%s4114_s22 + $0xa8] sm:$0xff] }
  0x19   : > { %160 = vst [vmem:[%s4122_s23 + $0x88] sm:$0xff] %v159_v17  ;;  %162 = vst [vmem:[%s4122_s23 + $0x90] sm:$0xff] %v161_v18  ;;  %v169_v22 = vld [vmem:[%s4114_s22 + $0xb0] sm:$0xff]  ;;  %v171_v23 = vld [vmem:[%s4114_s22 + $0xb8] sm:$0xff] }
  0x1a   : > { %164 = vst [vmem:[%s4122_s23 + $0x98] sm:$0xff] %v163_v19  ;;  %166 = vst [vmem:[%s4122_s23 + $0xa0] sm:$0xff] %v165_v20  ;;  %v173_v24 = vld [vmem:[%s4114_s22 + $0xc0] sm:$0xff]  ;;  %v175_v25 = vld [vmem:[%s4114_s22 + $0xc8] sm:$0xff] }
  0x1b   : > { %168 = vst [vmem:[%s4122_s23 + $0xa8] sm:$0xff] %v167_v21  ;;  %170 = vst [vmem:[%s4122_s23 + $0xb0] sm:$0xff] %v169_v22  ;;  %v177_v26 = vld [vmem:[%s4114_s22 + $0xd0] sm:$0xff]  ;;  %v179_v27 = vld [vmem:[%s4114_s22 + $0xd8] sm:$0xff] }
  0x1c   : > { %172 = vst [vmem:[%s4122_s23 + $0xb8] sm:$0xff] %v171_v23  ;;  %174 = vst [vmem:[%s4122_s23 + $0xc0] sm:$0xff] %v173_v24  ;;  %v181_v28 = vld [vmem:[%s4114_s22 + $0xe0] sm:$0xff]  ;;  %v183_v29 = vld [vmem:[%s4114_s22 + $0xe8] sm:$0xff] }
  0x1d   : > { %176 = vst [vmem:[%s4122_s23 + $0xc8] sm:$0xff] %v175_v25  ;;  %178 = vst [vmem:[%s4122_s23 + $0xd0] sm:$0xff] %v177_v26  ;;  %v185_v30 = vld [vmem:[%s4114_s22 + $0xf0] sm:$0xff]  ;;  %v187_v31 = vld [vmem:[%s4114_s22 + $0xf8] sm:$0xff] }
  0x1e   : > { %180 = vst [vmem:[%s4122_s23 + $0xd8] sm:$0xff] %v179_v27  ;;  %182 = vst [vmem:[%s4122_s23 + $0xe0] sm:$0xff] %v181_v28  ;;  %v189_v32 = vld [vmem:[%s4114_s22 + $0x200] sm:$0xff]  ;;  %v191_v33 = vld [vmem:[%s4114_s22 + $0x208] sm:$0xff] }
  0x1f   : > { %184 = vst [vmem:[%s4122_s23 + $0xe8] sm:$0xff] %v183_v29  ;;  %186 = vst [vmem:[%s4122_s23 + $0xf0] sm:$0xff] %v185_v30  ;;  %v193_v34 = vld [vmem:[%s4114_s22 + $0x210] sm:$0xff]  ;;  %v195_v35 = vld [vmem:[%s4114_s22 + $0x218] sm:$0xff] }
  0x20   : > { %188 = vst [vmem:[%s4122_s23 + $0xf8] sm:$0xff] %v187_v31  ;;  %190 = vst [vmem:[%s4122_s23 + $0x100] sm:$0xff] %v189_v32  ;;  %v197_v36 = vld [vmem:[%s4114_s22 + $0x220] sm:$0xff]  ;;  %v199_v37 = vld [vmem:[%s4114_s22 + $0x228] sm:$0xff] }
  0x21   : > { %192 = vst [vmem:[%s4122_s23 + $0x108] sm:$0xff] %v191_v33  ;;  %194 = vst [vmem:[%s4122_s23 + $0x110] sm:$0xff] %v193_v34  ;;  %v201_v38 = vld [vmem:[%s4114_s22 + $0x230] sm:$0xff]  ;;  %v203_v39 = vld [vmem:[%s4114_s22 + $0x238] sm:$0xff] }
  0x22   : > { %196 = vst [vmem:[%s4122_s23 + $0x118] sm:$0xff] %v195_v35  ;;  %198 = vst [vmem:[%s4122_s23 + $0x120] sm:$0xff] %v197_v36  ;;  %v205_v40 = vld [vmem:[%s4114_s22 + $0x240] sm:$0xff]  ;;  %v207_v41 = vld [vmem:[%s4114_s22 + $0x248] sm:$0xff] }
  0x23   : > { %200 = vst [vmem:[%s4122_s23 + $0x128] sm:$0xff] %v199_v37  ;;  %202 = vst [vmem:[%s4122_s23 + $0x130] sm:$0xff] %v201_v38  ;;  %v209_v42 = vld [vmem:[%s4114_s22 + $0x250] sm:$0xff]  ;;  %v211_v43 = vld [vmem:[%s4114_s22 + $0x258] sm:$0xff] }
  0x24   : > { %204 = vst [vmem:[%s4122_s23 + $0x138] sm:$0xff] %v203_v39  ;;  %206 = vst [vmem:[%s4122_s23 + $0x140] sm:$0xff] %v205_v40  ;;  %v213_v44 = vld [vmem:[%s4114_s22 + $0x260] sm:$0xff]  ;;  %v215_v45 = vld [vmem:[%s4114_s22 + $0x268] sm:$0xff] }
  0x25   : > { %208 = vst [vmem:[%s4122_s23 + $0x148] sm:$0xff] %v207_v41  ;;  %210 = vst [vmem:[%s4122_s23 + $0x150] sm:$0xff] %v209_v42  ;;  %v217_v46 = vld [vmem:[%s4114_s22 + $0x270] sm:$0xff]  ;;  %v219_v47 = vld [vmem:[%s4114_s22 + $0x278] sm:$0xff] }
  0x26   : > { %212 = vst [vmem:[%s4122_s23 + $0x158] sm:$0xff] %v211_v43  ;;  %214 = vst [vmem:[%s4122_s23 + $0x160] sm:$0xff] %v213_v44  ;;  %v221_v48 = vld [vmem:[%s4114_s22 + $0x280] sm:$0xff]  ;;  %v223_v49 = vld [vmem:[%s4114_s22 + $0x288] sm:$0xff] }
  0x27   : > { %216 = vst [vmem:[%s4122_s23 + $0x168] sm:$0xff] %v215_v45  ;;  %218 = vst [vmem:[%s4122_s23 + $0x170] sm:$0xff] %v217_v46  ;;  %v225_v50 = vld [vmem:[%s4114_s22 + $0x290] sm:$0xff]  ;;  %v227_v51 = vld [vmem:[%s4114_s22 + $0x298] sm:$0xff] }
  0x28   : > { %220 = vst [vmem:[%s4122_s23 + $0x178] sm:$0xff] %v219_v47  ;;  %222 = vst [vmem:[%s4122_s23 + $0x180] sm:$0xff] %v221_v48  ;;  %v229_v52 = vld [vmem:[%s4114_s22 + $0x2a0] sm:$0xff]  ;;  %v231_v53 = vld [vmem:[%s4114_s22 + $0x2a8] sm:$0xff] }
  0x29   : > { %224 = vst [vmem:[%s4122_s23 + $0x188] sm:$0xff] %v223_v49  ;;  %226 = vst [vmem:[%s4122_s23 + $0x190] sm:$0xff] %v225_v50  ;;  %v233_v54 = vld [vmem:[%s4114_s22 + $0x2b0] sm:$0xff]  ;;  %v235_v55 = vld [vmem:[%s4114_s22 + $0x2b8] sm:$0xff] }
  0x2a   : > { %228 = vst [vmem:[%s4122_s23 + $0x198] sm:$0xff] %v227_v51  ;;  %230 = vst [vmem:[%s4122_s23 + $0x1a0] sm:$0xff] %v229_v52  ;;  %v237_v56 = vld [vmem:[%s4114_s22 + $0x2c0] sm:$0xff]  ;;  %v239_v57 = vld [vmem:[%s4114_s22 + $0x2c8] sm:$0xff] }
  0x2b   : > { %232 = vst [vmem:[%s4122_s23 + $0x1a8] sm:$0xff] %v231_v53  ;;  %234 = vst [vmem:[%s4122_s23 + $0x1b0] sm:$0xff] %v233_v54  ;;  %v241_v58 = vld [vmem:[%s4114_s22 + $0x2d0] sm:$0xff]  ;;  %v243_v59 = vld [vmem:[%s4114_s22 + $0x2d8] sm:$0xff] }
  0x2c   : > { %236 = vst [vmem:[%s4122_s23 + $0x1b8] sm:$0xff] %v235_v55  ;;  %238 = vst [vmem:[%s4122_s23 + $0x1c0] sm:$0xff] %v237_v56  ;;  %v245_v60 = vld [vmem:[%s4114_s22 + $0x2e0] sm:$0xff]  ;;  %v247_v61 = vld [vmem:[%s4114_s22 + $0x2e8] sm:$0xff] }
  0x2d   : > { %240 = vst [vmem:[%s4122_s23 + $0x1c8] sm:$0xff] %v239_v57  ;;  %242 = vst [vmem:[%s4122_s23 + $0x1d0] sm:$0xff] %v241_v58  ;;  %v249_v62 = vld [vmem:[%s4114_s22 + $0x2f0] sm:$0xff]  ;;  %v251_v63 = vld [vmem:[%s4114_s22 + $0x2f8] sm:$0xff] }
  0x2e   : > { %244 = vst [vmem:[%s4122_s23 + $0x1d8] sm:$0xff] %v243_v59  ;;  %246 = vst [vmem:[%s4122_s23 + $0x1e0] sm:$0xff] %v245_v60  ;;  %v253_v0 = vld [vmem:[%s4114_s22 + $0x400] sm:$0xff]  ;;  %v255_v1 = vld [vmem:[%s4114_s22 + $0x408] sm:$0xff] }
  0x2f   : > { %248 = vst [vmem:[%s4122_s23 + $0x1e8] sm:$0xff] %v247_v61  ;;  %250 = vst [vmem:[%s4122_s23 + $0x1f0] sm:$0xff] %v249_v62  ;;  %v257_v2 = vld [vmem:[%s4114_s22 + $0x410] sm:$0xff]  ;;  %v259_v3 = vld [vmem:[%s4114_s22 + $0x418] sm:$0xff] }
  0x30   : > { %252 = vst [vmem:[%s4122_s23 + $0x1f8] sm:$0xff] %v251_v63  ;;  %254 = vst [vmem:[%s4122_s23 + $0x200] sm:$0xff] %v253_v0  ;;  %v261_v4 = vld [vmem:[%s4114_s22 + $0x420] sm:$0xff]  ;;  %v263_v5 = vld [vmem:[%s4114_s22 + $0x428] sm:$0xff] }
  0x31   : > { %256 = vst [vmem:[%s4122_s23 + $0x208] sm:$0xff] %v255_v1  ;;  %258 = vst [vmem:[%s4122_s23 + $0x210] sm:$0xff] %v257_v2  ;;  %v265_v6 = vld [vmem:[%s4114_s22 + $0x430] sm:$0xff]  ;;  %v267_v7 = vld [vmem:[%s4114_s22 + $0x438] sm:$0xff] }
  0x32   : > { %260 = vst [vmem:[%s4122_s23 + $0x218] sm:$0xff] %v259_v3  ;;  %262 = vst [vmem:[%s4122_s23 + $0x220] sm:$0xff] %v261_v4  ;;  %v269_v8 = vld [vmem:[%s4114_s22 + $0x440] sm:$0xff]  ;;  %v271_v9 = vld [vmem:[%s4114_s22 + $0x448] sm:$0xff] }
  0x33   : > { %264 = vst [vmem:[%s4122_s23 + $0x228] sm:$0xff] %v263_v5  ;;  %266 = vst [vmem:[%s4122_s23 + $0x230] sm:$0xff] %v265_v6  ;;  %v273_v10 = vld [vmem:[%s4114_s22 + $0x450] sm:$0xff]  ;;  %v275_v11 = vld [vmem:[%s4114_s22 + $0x458] sm:$0xff] }
  0x34   : > { %268 = vst [vmem:[%s4122_s23 + $0x238] sm:$0xff] %v267_v7  ;;  %270 = vst [vmem:[%s4122_s23 + $0x240] sm:$0xff] %v269_v8  ;;  %v277_v12 = vld [vmem:[%s4114_s22 + $0x460] sm:$0xff]  ;;  %v279_v13 = vld [vmem:[%s4114_s22 + $0x468] sm:$0xff] }
  0x35   : > { %272 = vst [vmem:[%s4122_s23 + $0x248] sm:$0xff] %v271_v9  ;;  %274 = vst [vmem:[%s4122_s23 + $0x250] sm:$0xff] %v273_v10  ;;  %v281_v14 = vld [vmem:[%s4114_s22 + $0x470] sm:$0xff]  ;;  %v283_v15 = vld [vmem:[%s4114_s22 + $0x478] sm:$0xff] }
  0x36   : > { %276 = vst [vmem:[%s4122_s23 + $0x258] sm:$0xff] %v275_v11  ;;  %278 = vst [vmem:[%s4122_s23 + $0x260] sm:$0xff] %v277_v12  ;;  %v285_v16 = vld [vmem:[%s4114_s22 + $0x480] sm:$0xff]  ;;  %v287_v17 = vld [vmem:[%s4114_s22 + $0x488] sm:$0xff] }
  0x37   : > { %280 = vst [vmem:[%s4122_s23 + $0x268] sm:$0xff] %v279_v13  ;;  %282 = vst [vmem:[%s4122_s23 + $0x270] sm:$0xff] %v281_v14  ;;  %v289_v18 = vld [vmem:[%s4114_s22 + $0x490] sm:$0xff]  ;;  %v291_v19 = vld [vmem:[%s4114_s22 + $0x498] sm:$0xff] }
  0x38   : > { %284 = vst [vmem:[%s4122_s23 + $0x278] sm:$0xff] %v283_v15  ;;  %286 = vst [vmem:[%s4122_s23 + $0x280] sm:$0xff] %v285_v16  ;;  %v293_v20 = vld [vmem:[%s4114_s22 + $0x4a0] sm:$0xff]  ;;  %v295_v21 = vld [vmem:[%s4114_s22 + $0x4a8] sm:$0xff] }
  0x39   : > { %288 = vst [vmem:[%s4122_s23 + $0x288] sm:$0xff] %v287_v17  ;;  %290 = vst [vmem:[%s4122_s23 + $0x290] sm:$0xff] %v289_v18  ;;  %v297_v22 = vld [vmem:[%s4114_s22 + $0x4b0] sm:$0xff]  ;;  %v299_v23 = vld [vmem:[%s4114_s22 + $0x4b8] sm:$0xff] }
  0x3a   : > { %292 = vst [vmem:[%s4122_s23 + $0x298] sm:$0xff] %v291_v19  ;;  %294 = vst [vmem:[%s4122_s23 + $0x2a0] sm:$0xff] %v293_v20  ;;  %v301_v24 = vld [vmem:[%s4114_s22 + $0x4c0] sm:$0xff]  ;;  %v303_v25 = vld [vmem:[%s4114_s22 + $0x4c8] sm:$0xff] }
  0x3b   : > { %296 = vst [vmem:[%s4122_s23 + $0x2a8] sm:$0xff] %v295_v21  ;;  %298 = vst [vmem:[%s4122_s23 + $0x2b0] sm:$0xff] %v297_v22  ;;  %v305_v26 = vld [vmem:[%s4114_s22 + $0x4d0] sm:$0xff]  ;;  %v307_v27 = vld [vmem:[%s4114_s22 + $0x4d8] sm:$0xff] }
  0x3c   : > { %300 = vst [vmem:[%s4122_s23 + $0x2b8] sm:$0xff] %v299_v23  ;;  %302 = vst [vmem:[%s4122_s23 + $0x2c0] sm:$0xff] %v301_v24  ;;  %v309_v28 = vld [vmem:[%s4114_s22 + $0x4e0] sm:$0xff]  ;;  %v311_v29 = vld [vmem:[%s4114_s22 + $0x4e8] sm:$0xff] }
  0x3d   : > { %304 = vst [vmem:[%s4122_s23 + $0x2c8] sm:$0xff] %v303_v25  ;;  %306 = vst [vmem:[%s4122_s23 + $0x2d0] sm:$0xff] %v305_v26  ;;  %v313_v30 = vld [vmem:[%s4114_s22 + $0x4f0] sm:$0xff]  ;;  %v315_v31 = vld [vmem:[%s4114_s22 + $0x4f8] sm:$0xff] }
  0x3e   : > { %308 = vst [vmem:[%s4122_s23 + $0x2d8] sm:$0xff] %v307_v27  ;;  %310 = vst [vmem:[%s4122_s23 + $0x2e0] sm:$0xff] %v309_v28  ;;  %v317_v32 = vld [vmem:[%s4114_s22 + $0x600] sm:$0xff]  ;;  %v319_v33 = vld [vmem:[%s4114_s22 + $0x608] sm:$0xff] }
  0x3f   : > { %312 = vst [vmem:[%s4122_s23 + $0x2e8] sm:$0xff] %v311_v29  ;;  %314 = vst [vmem:[%s4122_s23 + $0x2f0] sm:$0xff] %v313_v30  ;;  %v321_v34 = vld [vmem:[%s4114_s22 + $0x610] sm:$0xff]  ;;  %v323_v35 = vld [vmem:[%s4114_s22 + $0x618] sm:$0xff] }
  0x40   : > { %316 = vst [vmem:[%s4122_s23 + $0x2f8] sm:$0xff] %v315_v31  ;;  %318 = vst [vmem:[%s4122_s23 + $0x300] sm:$0xff] %v317_v32  ;;  %v325_v36 = vld [vmem:[%s4114_s22 + $0x620] sm:$0xff]  ;;  %v327_v37 = vld [vmem:[%s4114_s22 + $0x628] sm:$0xff] }
  0x41   : > { %320 = vst [vmem:[%s4122_s23 + $0x308] sm:$0xff] %v319_v33  ;;  %322 = vst [vmem:[%s4122_s23 + $0x310] sm:$0xff] %v321_v34  ;;  %v329_v38 = vld [vmem:[%s4114_s22 + $0x630] sm:$0xff]  ;;  %v331_v39 = vld [vmem:[%s4114_s22 + $0x638] sm:$0xff] }
  0x42   : > { %324 = vst [vmem:[%s4122_s23 + $0x318] sm:$0xff] %v323_v35  ;;  %326 = vst [vmem:[%s4122_s23 + $0x320] sm:$0xff] %v325_v36  ;;  %v333_v40 = vld [vmem:[%s4114_s22 + $0x640] sm:$0xff]  ;;  %v335_v41 = vld [vmem:[%s4114_s22 + $0x648] sm:$0xff] }
  0x43   : > { %328 = vst [vmem:[%s4122_s23 + $0x328] sm:$0xff] %v327_v37  ;;  %330 = vst [vmem:[%s4122_s23 + $0x330] sm:$0xff] %v329_v38  ;;  %v337_v42 = vld [vmem:[%s4114_s22 + $0x650] sm:$0xff]  ;;  %v339_v43 = vld [vmem:[%s4114_s22 + $0x658] sm:$0xff] }
  0x44   : > { %332 = vst [vmem:[%s4122_s23 + $0x338] sm:$0xff] %v331_v39  ;;  %334 = vst [vmem:[%s4122_s23 + $0x340] sm:$0xff] %v333_v40  ;;  %v341_v44 = vld [vmem:[%s4114_s22 + $0x660] sm:$0xff]  ;;  %v343_v45 = vld [vmem:[%s4114_s22 + $0x668] sm:$0xff] }
  0x45   : > { %336 = vst [vmem:[%s4122_s23 + $0x348] sm:$0xff] %v335_v41  ;;  %338 = vst [vmem:[%s4122_s23 + $0x350] sm:$0xff] %v337_v42  ;;  %v345_v46 = vld [vmem:[%s4114_s22 + $0x670] sm:$0xff]  ;;  %v347_v47 = vld [vmem:[%s4114_s22 + $0x678] sm:$0xff] }
  0x46   : > { %340 = vst [vmem:[%s4122_s23 + $0x358] sm:$0xff] %v339_v43  ;;  %342 = vst [vmem:[%s4122_s23 + $0x360] sm:$0xff] %v341_v44  ;;  %v349_v48 = vld [vmem:[%s4114_s22 + $0x680] sm:$0xff]  ;;  %v351_v49 = vld [vmem:[%s4114_s22 + $0x688] sm:$0xff] }
  0x47   : > { %344 = vst [vmem:[%s4122_s23 + $0x368] sm:$0xff] %v343_v45  ;;  %346 = vst [vmem:[%s4122_s23 + $0x370] sm:$0xff] %v345_v46  ;;  %v353_v50 = vld [vmem:[%s4114_s22 + $0x690] sm:$0xff]  ;;  %v355_v51 = vld [vmem:[%s4114_s22 + $0x698] sm:$0xff] }
  0x48   : > { %348 = vst [vmem:[%s4122_s23 + $0x378] sm:$0xff] %v347_v47  ;;  %350 = vst [vmem:[%s4122_s23 + $0x380] sm:$0xff] %v349_v48  ;;  %v357_v52 = vld [vmem:[%s4114_s22 + $0x6a0] sm:$0xff]  ;;  %v359_v53 = vld [vmem:[%s4114_s22 + $0x6a8] sm:$0xff] }
  0x49   : > { %352 = vst [vmem:[%s4122_s23 + $0x388] sm:$0xff] %v351_v49  ;;  %354 = vst [vmem:[%s4122_s23 + $0x390] sm:$0xff] %v353_v50  ;;  %v361_v54 = vld [vmem:[%s4114_s22 + $0x6b0] sm:$0xff]  ;;  %v363_v55 = vld [vmem:[%s4114_s22 + $0x6b8] sm:$0xff] }
  0x4a   : > { %356 = vst [vmem:[%s4122_s23 + $0x398] sm:$0xff] %v355_v51  ;;  %358 = vst [vmem:[%s4122_s23 + $0x3a0] sm:$0xff] %v357_v52  ;;  %v365_v56 = vld [vmem:[%s4114_s22 + $0x6c0] sm:$0xff]  ;;  %v367_v57 = vld [vmem:[%s4114_s22 + $0x6c8] sm:$0xff] }
  0x4b   : > { %360 = vst [vmem:[%s4122_s23 + $0x3a8] sm:$0xff] %v359_v53  ;;  %362 = vst [vmem:[%s4122_s23 + $0x3b0] sm:$0xff] %v361_v54  ;;  %v369_v58 = vld [vmem:[%s4114_s22 + $0x6d0] sm:$0xff]  ;;  %v371_v59 = vld [vmem:[%s4114_s22 + $0x6d8] sm:$0xff] }
  0x4c   : > { %364 = vst [vmem:[%s4122_s23 + $0x3b8] sm:$0xff] %v363_v55  ;;  %366 = vst [vmem:[%s4122_s23 + $0x3c0] sm:$0xff] %v365_v56  ;;  %v373_v60 = vld [vmem:[%s4114_s22 + $0x6e0] sm:$0xff]  ;;  %v375_v61 = vld [vmem:[%s4114_s22 + $0x6e8] sm:$0xff] }
  0x4d   : > { %368 = vst [vmem:[%s4122_s23 + $0x3c8] sm:$0xff] %v367_v57  ;;  %370 = vst [vmem:[%s4122_s23 + $0x3d0] sm:$0xff] %v369_v58  ;;  %v377_v62 = vld [vmem:[%s4114_s22 + $0x6f0] sm:$0xff]  ;;  %v379_v63 = vld [vmem:[%s4114_s22 + $0x6f8] sm:$0xff] }
  0x4e   : > { %372 = vst [vmem:[%s4122_s23 + $0x3d8] sm:$0xff] %v371_v59  ;;  %374 = vst [vmem:[%s4122_s23 + $0x3e0] sm:$0xff] %v373_v60  ;;  %v381_v0 = vld [vmem:[%s4114_s22 + $0x800] sm:$0xff]  ;;  %v383_v1 = vld [vmem:[%s4114_s22 + $0x808] sm:$0xff] }
  0x4f   : > { %376 = vst [vmem:[%s4122_s23 + $0x3e8] sm:$0xff] %v375_v61  ;;  %378 = vst [vmem:[%s4122_s23 + $0x3f0] sm:$0xff] %v377_v62  ;;  %v385_v2 = vld [vmem:[%s4114_s22 + $0x810] sm:$0xff]  ;;  %v387_v3 = vld [vmem:[%s4114_s22 + $0x818] sm:$0xff] }
  0x50   : > { %380 = vst [vmem:[%s4122_s23 + $0x3f8] sm:$0xff] %v379_v63  ;;  %382 = vst [vmem:[%s4122_s23 + $0x400] sm:$0xff] %v381_v0  ;;  %v389_v4 = vld [vmem:[%s4114_s22 + $0x820] sm:$0xff]  ;;  %v391_v5 = vld [vmem:[%s4114_s22 + $0x828] sm:$0xff] }
  0x51   : > { %384 = vst [vmem:[%s4122_s23 + $0x408] sm:$0xff] %v383_v1  ;;  %386 = vst [vmem:[%s4122_s23 + $0x410] sm:$0xff] %v385_v2  ;;  %v393_v6 = vld [vmem:[%s4114_s22 + $0x830] sm:$0xff]  ;;  %v395_v7 = vld [vmem:[%s4114_s22 + $0x838] sm:$0xff] }
  0x52   : > { %388 = vst [vmem:[%s4122_s23 + $0x418] sm:$0xff] %v387_v3  ;;  %390 = vst [vmem:[%s4122_s23 + $0x420] sm:$0xff] %v389_v4  ;;  %v397_v8 = vld [vmem:[%s4114_s22 + $0x840] sm:$0xff]  ;;  %v399_v9 = vld [vmem:[%s4114_s22 + $0x848] sm:$0xff] }
  0x53   : > { %392 = vst [vmem:[%s4122_s23 + $0x428] sm:$0xff] %v391_v5  ;;  %394 = vst [vmem:[%s4122_s23 + $0x430] sm:$0xff] %v393_v6  ;;  %v401_v10 = vld [vmem:[%s4114_s22 + $0x850] sm:$0xff]  ;;  %v403_v11 = vld [vmem:[%s4114_s22 + $0x858] sm:$0xff] }
  0x54   : > { %396 = vst [vmem:[%s4122_s23 + $0x438] sm:$0xff] %v395_v7  ;;  %398 = vst [vmem:[%s4122_s23 + $0x440] sm:$0xff] %v397_v8  ;;  %v405_v12 = vld [vmem:[%s4114_s22 + $0x860] sm:$0xff]  ;;  %v407_v13 = vld [vmem:[%s4114_s22 + $0x868] sm:$0xff] }
  0x55   : > { %400 = vst [vmem:[%s4122_s23 + $0x448] sm:$0xff] %v399_v9  ;;  %402 = vst [vmem:[%s4122_s23 + $0x450] sm:$0xff] %v401_v10  ;;  %v409_v14 = vld [vmem:[%s4114_s22 + $0x870] sm:$0xff]  ;;  %v411_v15 = vld [vmem:[%s4114_s22 + $0x878] sm:$0xff] }
  0x56   : > { %404 = vst [vmem:[%s4122_s23 + $0x458] sm:$0xff] %v403_v11  ;;  %406 = vst [vmem:[%s4122_s23 + $0x460] sm:$0xff] %v405_v12  ;;  %v413_v16 = vld [vmem:[%s4114_s22 + $0x880] sm:$0xff]  ;;  %v415_v17 = vld [vmem:[%s4114_s22 + $0x888] sm:$0xff] }
  0x57   : > { %408 = vst [vmem:[%s4122_s23 + $0x468] sm:$0xff] %v407_v13  ;;  %410 = vst [vmem:[%s4122_s23 + $0x470] sm:$0xff] %v409_v14  ;;  %v417_v18 = vld [vmem:[%s4114_s22 + $0x890] sm:$0xff]  ;;  %v419_v19 = vld [vmem:[%s4114_s22 + $0x898] sm:$0xff] }
  0x58   : > { %412 = vst [vmem:[%s4122_s23 + $0x478] sm:$0xff] %v411_v15  ;;  %414 = vst [vmem:[%s4122_s23 + $0x480] sm:$0xff] %v413_v16  ;;  %v421_v20 = vld [vmem:[%s4114_s22 + $0x8a0] sm:$0xff]  ;;  %v423_v21 = vld [vmem:[%s4114_s22 + $0x8a8] sm:$0xff] }
  0x59   : > { %416 = vst [vmem:[%s4122_s23 + $0x488] sm:$0xff] %v415_v17  ;;  %418 = vst [vmem:[%s4122_s23 + $0x490] sm:$0xff] %v417_v18  ;;  %v425_v22 = vld [vmem:[%s4114_s22 + $0x8b0] sm:$0xff]  ;;  %v427_v23 = vld [vmem:[%s4114_s22 + $0x8b8] sm:$0xff] }
  0x5a   : > { %420 = vst [vmem:[%s4122_s23 + $0x498] sm:$0xff] %v419_v19  ;;  %422 = vst [vmem:[%s4122_s23 + $0x4a0] sm:$0xff] %v421_v20  ;;  %v429_v24 = vld [vmem:[%s4114_s22 + $0x8c0] sm:$0xff]  ;;  %v431_v25 = vld [vmem:[%s4114_s22 + $0x8c8] sm:$0xff] }
  0x5b   : > { %424 = vst [vmem:[%s4122_s23 + $0x4a8] sm:$0xff] %v423_v21  ;;  %426 = vst [vmem:[%s4122_s23 + $0x4b0] sm:$0xff] %v425_v22  ;;  %v433_v26 = vld [vmem:[%s4114_s22 + $0x8d0] sm:$0xff]  ;;  %v435_v27 = vld [vmem:[%s4114_s22 + $0x8d8] sm:$0xff] }
  0x5c   : > { %428 = vst [vmem:[%s4122_s23 + $0x4b8] sm:$0xff] %v427_v23  ;;  %430 = vst [vmem:[%s4122_s23 + $0x4c0] sm:$0xff] %v429_v24  ;;  %v437_v28 = vld [vmem:[%s4114_s22 + $0x8e0] sm:$0xff]  ;;  %v439_v29 = vld [vmem:[%s4114_s22 + $0x8e8] sm:$0xff] }
  0x5d   : > { %432 = vst [vmem:[%s4122_s23 + $0x4c8] sm:$0xff] %v431_v25  ;;  %434 = vst [vmem:[%s4122_s23 + $0x4d0] sm:$0xff] %v433_v26  ;;  %v441_v30 = vld [vmem:[%s4114_s22 + $0x8f0] sm:$0xff]  ;;  %v443_v31 = vld [vmem:[%s4114_s22 + $0x8f8] sm:$0xff] }
  0x5e   : > { %436 = vst [vmem:[%s4122_s23 + $0x4d8] sm:$0xff] %v435_v27  ;;  %438 = vst [vmem:[%s4122_s23 + $0x4e0] sm:$0xff] %v437_v28  ;;  %v445_v32 = vld [vmem:[%s4114_s22 + $0xa00] sm:$0xff]  ;;  %v447_v33 = vld [vmem:[%s4114_s22 + $0xa08] sm:$0xff] }
  0x5f   : > { %440 = vst [vmem:[%s4122_s23 + $0x4e8] sm:$0xff] %v439_v29  ;;  %442 = vst [vmem:[%s4122_s23 + $0x4f0] sm:$0xff] %v441_v30  ;;  %v449_v34 = vld [vmem:[%s4114_s22 + $0xa10] sm:$0xff]  ;;  %v451_v35 = vld [vmem:[%s4114_s22 + $0xa18] sm:$0xff] }
  0x60   : > { %444 = vst [vmem:[%s4122_s23 + $0x4f8] sm:$0xff] %v443_v31  ;;  %446 = vst [vmem:[%s4122_s23 + $0x500] sm:$0xff] %v445_v32  ;;  %v453_v36 = vld [vmem:[%s4114_s22 + $0xa20] sm:$0xff]  ;;  %v455_v37 = vld [vmem:[%s4114_s22 + $0xa28] sm:$0xff] }
  0x61   : > { %448 = vst [vmem:[%s4122_s23 + $0x508] sm:$0xff] %v447_v33  ;;  %450 = vst [vmem:[%s4122_s23 + $0x510] sm:$0xff] %v449_v34  ;;  %v457_v38 = vld [vmem:[%s4114_s22 + $0xa30] sm:$0xff]  ;;  %v459_v39 = vld [vmem:[%s4114_s22 + $0xa38] sm:$0xff] }
  0x62   : > { %452 = vst [vmem:[%s4122_s23 + $0x518] sm:$0xff] %v451_v35  ;;  %454 = vst [vmem:[%s4122_s23 + $0x520] sm:$0xff] %v453_v36  ;;  %v461_v40 = vld [vmem:[%s4114_s22 + $0xa40] sm:$0xff]  ;;  %v463_v41 = vld [vmem:[%s4114_s22 + $0xa48] sm:$0xff] }
  0x63   : > { %456 = vst [vmem:[%s4122_s23 + $0x528] sm:$0xff] %v455_v37  ;;  %458 = vst [vmem:[%s4122_s23 + $0x530] sm:$0xff] %v457_v38  ;;  %v465_v42 = vld [vmem:[%s4114_s22 + $0xa50] sm:$0xff]  ;;  %v467_v43 = vld [vmem:[%s4114_s22 + $0xa58] sm:$0xff] }
  0x64   : > { %460 = vst [vmem:[%s4122_s23 + $0x538] sm:$0xff] %v459_v39  ;;  %462 = vst [vmem:[%s4122_s23 + $0x540] sm:$0xff] %v461_v40  ;;  %v469_v44 = vld [vmem:[%s4114_s22 + $0xa60] sm:$0xff]  ;;  %v471_v45 = vld [vmem:[%s4114_s22 + $0xa68] sm:$0xff] }
  0x65   : > { %464 = vst [vmem:[%s4122_s23 + $0x548] sm:$0xff] %v463_v41  ;;  %466 = vst [vmem:[%s4122_s23 + $0x550] sm:$0xff] %v465_v42  ;;  %v473_v46 = vld [vmem:[%s4114_s22 + $0xa70] sm:$0xff]  ;;  %v475_v47 = vld [vmem:[%s4114_s22 + $0xa78] sm:$0xff] }
  0x66   : > { %468 = vst [vmem:[%s4122_s23 + $0x558] sm:$0xff] %v467_v43  ;;  %470 = vst [vmem:[%s4122_s23 + $0x560] sm:$0xff] %v469_v44  ;;  %v477_v48 = vld [vmem:[%s4114_s22 + $0xa80] sm:$0xff]  ;;  %v479_v49 = vld [vmem:[%s4114_s22 + $0xa88] sm:$0xff] }
  0x67   : > { %472 = vst [vmem:[%s4122_s23 + $0x568] sm:$0xff] %v471_v45  ;;  %474 = vst [vmem:[%s4122_s23 + $0x570] sm:$0xff] %v473_v46  ;;  %v481_v50 = vld [vmem:[%s4114_s22 + $0xa90] sm:$0xff]  ;;  %v483_v51 = vld [vmem:[%s4114_s22 + $0xa98] sm:$0xff] }
  0x68   : > { %476 = vst [vmem:[%s4122_s23 + $0x578] sm:$0xff] %v475_v47  ;;  %478 = vst [vmem:[%s4122_s23 + $0x580] sm:$0xff] %v477_v48  ;;  %v485_v52 = vld [vmem:[%s4114_s22 + $0xaa0] sm:$0xff]  ;;  %v487_v53 = vld [vmem:[%s4114_s22 + $0xaa8] sm:$0xff] }
  0x69   : > { %480 = vst [vmem:[%s4122_s23 + $0x588] sm:$0xff] %v479_v49  ;;  %482 = vst [vmem:[%s4122_s23 + $0x590] sm:$0xff] %v481_v50  ;;  %v489_v54 = vld [vmem:[%s4114_s22 + $0xab0] sm:$0xff]  ;;  %v491_v55 = vld [vmem:[%s4114_s22 + $0xab8] sm:$0xff] }
  0x6a   : > { %484 = vst [vmem:[%s4122_s23 + $0x598] sm:$0xff] %v483_v51  ;;  %486 = vst [vmem:[%s4122_s23 + $0x5a0] sm:$0xff] %v485_v52  ;;  %v493_v56 = vld [vmem:[%s4114_s22 + $0xac0] sm:$0xff]  ;;  %v495_v57 = vld [vmem:[%s4114_s22 + $0xac8] sm:$0xff] }
  0x6b   : > { %488 = vst [vmem:[%s4122_s23 + $0x5a8] sm:$0xff] %v487_v53  ;;  %490 = vst [vmem:[%s4122_s23 + $0x5b0] sm:$0xff] %v489_v54  ;;  %v497_v58 = vld [vmem:[%s4114_s22 + $0xad0] sm:$0xff]  ;;  %v499_v59 = vld [vmem:[%s4114_s22 + $0xad8] sm:$0xff] }
  0x6c   : > { %492 = vst [vmem:[%s4122_s23 + $0x5b8] sm:$0xff] %v491_v55  ;;  %494 = vst [vmem:[%s4122_s23 + $0x5c0] sm:$0xff] %v493_v56  ;;  %v501_v60 = vld [vmem:[%s4114_s22 + $0xae0] sm:$0xff]  ;;  %v503_v61 = vld [vmem:[%s4114_s22 + $0xae8] sm:$0xff] }
  0x6d   : > { %496 = vst [vmem:[%s4122_s23 + $0x5c8] sm:$0xff] %v495_v57  ;;  %498 = vst [vmem:[%s4122_s23 + $0x5d0] sm:$0xff] %v497_v58  ;;  %v505_v62 = vld [vmem:[%s4114_s22 + $0xaf0] sm:$0xff]  ;;  %v507_v63 = vld [vmem:[%s4114_s22 + $0xaf8] sm:$0xff] }
  0x6e   : > { %500 = vst [vmem:[%s4122_s23 + $0x5d8] sm:$0xff] %v499_v59  ;;  %502 = vst [vmem:[%s4122_s23 + $0x5e0] sm:$0xff] %v501_v60 }
  0x6f   : > { %504 = vst [vmem:[%s4122_s23 + $0x5e8] sm:$0xff] %v503_v61  ;;  %506 = vst [vmem:[%s4122_s23 + $0x5f0] sm:$0xff] %v505_v62 }
  0x70   : > { %508 = vst [vmem:[%s4122_s23 + $0x5f8] sm:$0xff] %v507_v63 }
  0x71 PF: > { %p3780_p5 = scmp.ge.s32.totalorder %s4061_s11, 1  ;;  %p513_p6 = scmp.lt.s32.totalorder %s4061_s11, 3 }
  0x73   : > { %p514_p7 = pnand %p3780_p5, %p513_p6 }
  0x75   : > { %517 = sbr.rel (%p514_p7) target bundleno = 690 (0x2b2), region = 47 }
  0x7a   : > { %s520_s24 = sand.u32 1, %s4053_s9   ;;  %v4063_v0 = vmov 0   ;;  %v4532_v35 = vld [vmem:[%s5264_s0] sm:$0x1]  ;;  %vm1702_vm0 = vcmask 392192   ;;  %vm3146_vm1 = vcmask 1041408  }
  0x7b   : > { %s4011_s25 = smul.u32 1536, %s520_s24  ;;  %1738 = vmatprep.mubr.bf16.mxu0 %v4063_v0  ;;  %1779 = vmatprep.mubr.bf16.mxu1 %v4063_v0  ;;  %s3781_s3 = sshll.u32 %s3774_s12, 6 }
  0x7c   : > { %p543_p8 = scmp.lt.s32.totalorder %s3781_s3, 127 }
  0x7d   : > { %s4507_s26 = scalar_lea.vmem [#allocation2], %s4011_s25 }
  0x7e   : > { %v678_v1 = vld [vmem:[%s4507_s26 + $0x400] sm:$0xff]  ;;  %v679_v3 = vld [vmem:[%s4507_s26 + $0x408] sm:$0xff]  ;;  %v680_v23 = vld [vmem:[%s4507_s26 + $0x410] sm:$0xff]  ;;  %s5319_s3 = smov (!%p543_p8, %s3781_s3), 127 }
  0x7f   : > { %v710_v2 = vld [vmem:[%s4507_s26 + $0x500] sm:$0xff]  ;;  %v711_v5 = vld [vmem:[%s4507_s26 + $0x508] sm:$0xff]  ;;  %v712_v24 = vld [vmem:[%s4507_s26 + $0x510] sm:$0xff]  ;;  %s3782_s4 = sshll.u32 %s5319_s3, 1 }
  0x80   : > { %v3912_v4 = vcombine.high %v678_v1, %v710_v2  ;;  %v3911_v6 = vcombine.low %v678_v1, %v710_v2  ;;  %v614_v7 = vld [vmem:[%s4507_s26 + $0x200] sm:$0xff]  ;;  %v3914_v9 = vcombine.high %v679_v3, %v711_v5  ;;  %v3913_v10 = vcombine.low %v679_v3, %v711_v5  ;;  %v615_v12 = vld [vmem:[%s4507_s26 + $0x208] sm:$0xff]  ;;  %v681_v25 = vld [vmem:[%s4507_s26 + $0x418] sm:$0xff]  ;;  %s5142_s7 = scalar_lea.vmem %s5266_s2, %s3782_s4 }
  0x81   : > { %v646_v8 = vld [vmem:[%s4507_s26 + $0x300] sm:$0xff]  ;;  %v647_v13 = vld [vmem:[%s4507_s26 + $0x308] sm:$0xff]  ;;  %v713_v26 = vld [vmem:[%s4507_s26 + $0x518] sm:$0xff]  ;;  %v3916_v29 = vcombine.high %v680_v23, %v712_v24  ;;  %v3915_v36 = vcombine.low %v680_v23, %v712_v24 }
  0x82   : > { %v3848_v11 = vcombine.high %v614_v7, %v646_v8  ;;  %v550_v14 = vld [vmem:[%s4507_s26] sm:$0xff]  ;;  %1716 = vmatprep.subr.bf16.mxu0 %v3912_v4  ;;  %v3850_v15 = vcombine.high %v615_v12, %v647_v13  ;;  %v551_v17 = vld [vmem:[%s4507_s26 + $0x8] sm:$0xff]  ;;  %1757 = vmatprep.subr.bf16.mxu1 %v3914_v9  ;;  %v3847_v19 = vcombine.low %v614_v7, %v646_v8  ;;  %v616_v31 = vld [vmem:[%s4507_s26 + $0x210] sm:$0xff] }
  0x83   : > { %v582_v16 = vld [vmem:[%s4507_s26 + $0x100] sm:$0xff]  ;;  %v583_v18 = vld [vmem:[%s4507_s26 + $0x108] sm:$0xff]  ;;  %1717 = vmatpush1.bf16.msra.mxu0 %v3911_v6  ;;  %1758 = vmatpush1.bf16.msra.mxu1 %v3913_v10  ;;  %v3849_v20 = vcombine.low %v615_v12, %v647_v13  ;;  %v3918_v30 = vcombine.high %v681_v25, %v713_v26  ;;  %v648_v32 = vld [vmem:[%s4507_s26 + $0x310] sm:$0xff]  ;;  %v3917_v37 = vcombine.low %v681_v25, %v713_v26 }
  0x84   : > { %1718 = vmatprep.subr.bf16.mxu0 %v3848_v11  ;;  %v3784_v21 = vcombine.high %v550_v14, %v582_v16  ;;  %1759 = vmatprep.subr.bf16.mxu1 %v3850_v15  ;;  %v3786_v22 = vcombine.high %v551_v17, %v583_v18  ;;  %v3783_v27 = vcombine.low %v550_v14, %v582_v16  ;;  %v617_v33 = vld [vmem:[%s4507_s26 + $0x218] sm:$0xff]  ;;  %v552_v40 = vld [vmem:[%s4507_s26 + $0x10] sm:$0xff]  ;;  %v682_v48 = vld [vmem:[%s4507_s26 + $0x420] sm:$0xff] }
  0x85   : > { %v3785_v28 = vcombine.low %v551_v17, %v583_v18  ;;  %v649_v34 = vld [vmem:[%s4507_s26 + $0x318] sm:$0xff]  ;;  %v3852_v38 = vcombine.high %v616_v31, %v648_v32  ;;  %v584_v41 = vld [vmem:[%s4507_s26 + $0x110] sm:$0xff]  ;;  %v3851_v44 = vcombine.low %v616_v31, %v648_v32  ;;  %v714_v49 = vld [vmem:[%s4507_s26 + $0x520] sm:$0xff] }
  0x86   : > { %v3854_v39 = vcombine.high %v617_v33, %v649_v34  ;;  %v553_v42 = vld [vmem:[%s4507_s26 + $0x18] sm:$0xff]  ;;  %v3853_v45 = vcombine.low %v617_v33, %v649_v34  ;;  %v3788_v46 = vcombine.high %v552_v40, %v584_v41  ;;  %v683_v50 = vld [vmem:[%s4507_s26 + $0x428] sm:$0xff]  ;;  %v3787_v52 = vcombine.low %v552_v40, %v584_v41  ;;  %v618_v56 = vld [vmem:[%s4507_s26 + $0x220] sm:$0xff] }
  0x87   : > { %1719 = vmatpush1.bf16.msra.mxu0 %v3847_v19  ;;  %1760 = vmatpush1.bf16.msra.mxu1 %v3849_v20  ;;  %v585_v43 = vld [vmem:[%s4507_s26 + $0x118] sm:$0xff]  ;;  %v715_v51 = vld [vmem:[%s4507_s26 + $0x528] sm:$0xff]  ;;  %v3920_v54 = vcombine.high %v682_v48, %v714_v49  ;;  %v650_v57 = vld [vmem:[%s4507_s26 + $0x320] sm:$0xff]  ;;  %v3919_v60 = vcombine.low %v682_v48, %v714_v49 }
  0x88   : > { %1720 = vmatprep.subr.bf16.mxu0 %v3784_v21  ;;  %1761 = vmatprep.subr.bf16.mxu1 %v3786_v22  ;;  %v3790_v47 = vcombine.high %v553_v42, %v585_v43  ;;  %v3789_v53 = vcombine.low %v553_v42, %v585_v43  ;;  %v3922_v55 = vcombine.high %v683_v50, %v715_v51  ;;  %v619_v58 = vld [vmem:[%s4507_s26 + $0x228] sm:$0xff]  ;;  %v554_v1 = vld [vmem:[%s4507_s26 + $0x20] sm:$0xff]  ;;  %v684_v9 = vld [vmem:[%s4507_s26 + $0x430] sm:$0xff] }
  0x89   : > { %v651_v59 = vld [vmem:[%s4507_s26 + $0x328] sm:$0xff]  ;;  %v3921_v61 = vcombine.low %v683_v50, %v715_v51  ;;  %v3856_v62 = vcombine.high %v618_v56, %v650_v57  ;;  %v586_v2 = vld [vmem:[%s4507_s26 + $0x120] sm:$0xff]  ;;  %v3855_v5 = vcombine.low %v618_v56, %v650_v57  ;;  %v716_v10 = vld [vmem:[%s4507_s26 + $0x530] sm:$0xff] }
  0x8a   : > { %v3858_v63 = vcombine.high %v619_v58, %v651_v59  ;;  %v555_v3 = vld [vmem:[%s4507_s26 + $0x28] sm:$0xff]  ;;  %v3857_v6 = vcombine.low %v619_v58, %v651_v59  ;;  %v3792_v7 = vcombine.high %v554_v1, %v586_v2  ;;  %v685_v11 = vld [vmem:[%s4507_s26 + $0x438] sm:$0xff]  ;;  %v3791_v13 = vcombine.low %v554_v1, %v586_v2  ;;  %v620_v17 = vld [vmem:[%s4507_s26 + $0x230] sm:$0xff] }
  0x8b   : > { %1721 = vmatpush1.bf16.msra.mxu0 %v3783_v27  ;;  %1762 = vmatpush1.bf16.msra.mxu1 %v3785_v28  ;;  %v587_v4 = vld [vmem:[%s4507_s26 + $0x128] sm:$0xff]  ;;  %v717_v12 = vld [vmem:[%s4507_s26 + $0x538] sm:$0xff]  ;;  %v3924_v15 = vcombine.high %v684_v9, %v716_v10  ;;  %v652_v18 = vld [vmem:[%s4507_s26 + $0x330] sm:$0xff]  ;;  %v3923_v21 = vcombine.low %v684_v9, %v716_v10 }
  0x8c   : > { %1798 = vmatprep.subr.bf16.mxu0 %v3916_v29  ;;  %1839 = vmatprep.subr.bf16.mxu1 %v3918_v30  ;;  %v3794_v8 = vcombine.high %v555_v3, %v587_v4  ;;  %v3793_v14 = vcombine.low %v555_v3, %v587_v4  ;;  %v3926_v16 = vcombine.high %v685_v11, %v717_v12  ;;  %v621_v19 = vld [vmem:[%s4507_s26 + $0x238] sm:$0xff]  ;;  %v556_v25 = vld [vmem:[%s4507_s26 + $0x30] sm:$0xff]  ;;  %v686_v33 = vld [vmem:[%s4507_s26 + $0x440] sm:$0xff] }
  0x8d   : > { %v653_v20 = vld [vmem:[%s4507_s26 + $0x338] sm:$0xff]  ;;  %v3925_v22 = vcombine.low %v685_v11, %v717_v12  ;;  %v3860_v23 = vcombine.high %v620_v17, %v652_v18  ;;  %v588_v26 = vld [vmem:[%s4507_s26 + $0x130] sm:$0xff]  ;;  %v3859_v29 = vcombine.low %v620_v17, %v652_v18  ;;  %v718_v34 = vld [vmem:[%s4507_s26 + $0x540] sm:$0xff] }
  0x8e   : > { %3975 = vmatmul.mubr.msk.bf16.vlgmr.msra.gmra.mxu0 %vm1702_vm0, %v4532_v35  ;;  %3976 = vmatmul.mubr.msk.bf16.vlgmr.msra.gmra.mxu1 %vm1702_vm0, %v4532_v35  ;;  %v3862_v24 = vcombine.high %v621_v19, %v653_v20  ;;  %v557_v27 = vld [vmem:[%s4507_s26 + $0x38] sm:$0xff]  ;;  %v3861_v30 = vcombine.low %v621_v19, %v653_v20  ;;  %v3796_v31 = vcombine.high %v556_v25, %v588_v26  ;;  %v622_v42 = vld [vmem:[%s4507_s26 + $0x240] sm:$0xff]  ;;  %v688_v58 = vld [vmem:[%s4507_s26 + $0x450] sm:$0xff] }
  0x8f   : > { %1799 = vmatpush1.bf16.msra.mxu0 %v3915_v36  ;;  %1840 = vmatpush1.bf16.msra.mxu1 %v3917_v37  ;;  %v589_v28 = vld [vmem:[%s4507_s26 + $0x138] sm:$0xff]  ;;  %v687_v36 = vld [vmem:[%s4507_s26 + $0x448] sm:$0xff]  ;;  %v3928_v40 = vcombine.high %v686_v33, %v718_v34  ;;  %v654_v43 = vld [vmem:[%s4507_s26 + $0x340] sm:$0xff] }
  0x90   : > { %1800 = vmatprep.subr.bf16.mxu0 %v3852_v38  ;;  %1841 = vmatprep.subr.bf16.mxu1 %v3854_v39  ;;  %v3798_v32 = vcombine.high %v557_v27, %v589_v28  ;;  %v719_v37 = vld [vmem:[%s4507_s26 + $0x548] sm:$0xff]  ;;  %v3795_v38 = vcombine.low %v556_v25, %v588_v26  ;;  %v3797_v39 = vcombine.low %v557_v27, %v589_v28  ;;  %v558_v50 = vld [vmem:[%s4507_s26 + $0x40] sm:$0xff]  ;;  %v720_v59 = vld [vmem:[%s4507_s26 + $0x550] sm:$0xff] }
  0x91   : > { %1820 = vmatprep.mubr.bf16.mxu0 %v4063_v0  ;;  %1861 = vmatprep.mubr.bf16.mxu1 %v4063_v0  ;;  %v3930_v41 = vcombine.high %v687_v36, %v719_v37  ;;  %v3864_v48 = vcombine.high %v622_v42, %v654_v43  ;;  %v590_v51 = vld [vmem:[%s4507_s26 + $0x140] sm:$0xff]  ;;  %v3932_v1 = vcombine.high %v688_v58, %v720_v59  ;;  %v624_v3 = vld [vmem:[%s4507_s26 + $0x250] sm:$0xff] }
  0x92   : > { %v3800_v56 = vcombine.high %v558_v50, %v590_v51  ;;  %v656_v4 = vld [vmem:[%s4507_s26 + $0x350] sm:$0xff]  ;;  %v690_v19 = vld [vmem:[%s4507_s26 + $0x460] sm:$0xff] }
  0x93   : > { %1801 = vmatpush1.bf16.msra.mxu0 %v3851_v44  ;;  %1842 = vmatpush1.bf16.msra.mxu1 %v3853_v45  ;;  %v623_v44 = vld [vmem:[%s4507_s26 + $0x248] sm:$0xff]  ;;  %v3868_v9 = vcombine.high %v624_v3, %v656_v4  ;;  %v560_v11 = vld [vmem:[%s4507_s26 + $0x50] sm:$0xff]  ;;  %v722_v20 = vld [vmem:[%s4507_s26 + $0x560] sm:$0xff] }
  0x94   : > { %1802 = vmatprep.subr.bf16.mxu0 %v3788_v46  ;;  %1843 = vmatprep.subr.bf16.mxu1 %v3790_v47  ;;  %v655_v45 = vld [vmem:[%s4507_s26 + $0x348] sm:$0xff]  ;;  %v3927_v46 = vcombine.low %v686_v33, %v718_v34  ;;  %v3929_v47 = vcombine.low %v687_v36, %v719_v37  ;;  %v592_v12 = vld [vmem:[%s4507_s26 + $0x150] sm:$0xff]  ;;  %v3936_v25 = vcombine.high %v690_v19, %v722_v20  ;;  %v626_v27 = vld [vmem:[%s4507_s26 + $0x260] sm:$0xff] }
  0x95   : > { %v3866_v49 = vcombine.high %v623_v44, %v655_v45  ;;  %v3804_v17 = vcombine.high %v560_v11, %v592_v12  ;;  %v658_v28 = vld [vmem:[%s4507_s26 + $0x360] sm:$0xff] }
  0x96   : > { %v3872_v33 = vcombine.high %v626_v27, %v658_v28  ;;  %v562_v36 = vld [vmem:[%s4507_s26 + $0x60] sm:$0xff] }
  0x97   : > { %1803 = vmatpush1.bf16.msra.mxu0 %v3787_v52  ;;  %1844 = vmatpush1.bf16.msra.mxu1 %v3789_v53  ;;  %v559_v52 = vld [vmem:[%s4507_s26 + $0x48] sm:$0xff]  ;;  %v594_v37 = vld [vmem:[%s4507_s26 + $0x160] sm:$0xff] }
  0x98   : > { %1880 = vmatprep.subr.bf16.mxu0 %v3920_v54  ;;  %1921 = vmatprep.subr.bf16.mxu1 %v3922_v55  ;;  %v591_v53 = vld [vmem:[%s4507_s26 + $0x148] sm:$0xff]  ;;  %v3863_v54 = vcombine.low %v622_v42, %v654_v43  ;;  %v3865_v55 = vcombine.low %v623_v44, %v655_v45  ;;  %v3808_v42 = vcombine.high %v562_v36, %v594_v37  ;;  %v692_v44 = vld [vmem:[%s4507_s26 + $0x470] sm:$0xff] }
  0x99   : > { %v3802_v57 = vcombine.high %v559_v52, %v591_v53  ;;  %v724_v45 = vld [vmem:[%s4507_s26 + $0x570] sm:$0xff] }
  0x9a   : > { %3977 = vmatmul.mubr.msk.bf16.vlgmr.msra.gmra.mxu0 %vm1702_vm0, %v4532_v35  ;;  %3978 = vmatmul.mubr.msk.bf16.vlgmr.msra.gmra.mxu1 %vm1702_vm0, %v4532_v35 }
  0x9b   : > { %1881 = vmatpush1.bf16.msra.mxu0 %v3919_v60  ;;  %1922 = vmatpush1.bf16.msra.mxu1 %v3921_v61  ;;  %v689_v60 = vld [vmem:[%s4507_s26 + $0x458] sm:$0xff] }
  0x9c   : > { %1882 = vmatprep.subr.bf16.mxu0 %v3856_v62  ;;  %1923 = vmatprep.subr.bf16.mxu1 %v3858_v63  ;;  %v721_v61 = vld [vmem:[%s4507_s26 + $0x558] sm:$0xff]  ;;  %v3799_v62 = vcombine.low %v558_v50, %v590_v51  ;;  %v3801_v63 = vcombine.low %v559_v52, %v591_v53  ;;  %v3940_v50 = vcombine.high %v692_v44, %v724_v45  ;;  %v628_v52 = vld [vmem:[%s4507_s26 + $0x270] sm:$0xff] }
  0x9d   : > { %1902 = vmatprep.mubr.bf16.mxu0 %v4063_v0  ;;  %1943 = vmatprep.mubr.bf16.mxu1 %v4063_v0  ;;  %v3934_v2 = vcombine.high %v689_v60, %v721_v61  ;;  %v660_v53 = vld [vmem:[%s4507_s26 + $0x370] sm:$0xff] }
  0x9f   : > { %1883 = vmatpush1.bf16.msra.mxu0 %v3855_v5  ;;  %1924 = vmatpush1.bf16.msra.mxu1 %v3857_v6  ;;  %v625_v5 = vld [vmem:[%s4507_s26 + $0x258] sm:$0xff] }
  0xa0   : > { %1884 = vmatprep.subr.bf16.mxu0 %v3792_v7  ;;  %1925 = vmatprep.subr.bf16.mxu1 %v3794_v8  ;;  %v657_v6 = vld [vmem:[%s4507_s26 + $0x358] sm:$0xff]  ;;  %v3931_v7 = vcombine.low %v688_v58, %v720_v59  ;;  %v3933_v8 = vcombine.low %v689_v60, %v721_v61  ;;  %v3876_v58 = vcombine.high %v628_v52, %v660_v53  ;;  %v564_v60 = vld [vmem:[%s4507_s26 + $0x70] sm:$0xff] }
  0xa1   : > { %v3870_v10 = vcombine.high %v625_v5, %v657_v6  ;;  %v596_v61 = vld [vmem:[%s4507_s26 + $0x170] sm:$0xff] }
  0xa3   : > { %1885 = vmatpush1.bf16.msra.mxu0 %v3791_v13  ;;  %1926 = vmatpush1.bf16.msra.mxu1 %v3793_v14  ;;  %v561_v13 = vld [vmem:[%s4507_s26 + $0x58] sm:$0xff] }
  0xa4   : > { %1962 = vmatprep.subr.bf16.mxu0 %v3924_v15  ;;  %2003 = vmatprep.subr.bf16.mxu1 %v3926_v16  ;;  %v593_v14 = vld [vmem:[%s4507_s26 + $0x158] sm:$0xff]  ;;  %v3867_v15 = vcombine.low %v624_v3, %v656_v4  ;;  %v3869_v16 = vcombine.low %v625_v5, %v657_v6  ;;  %v3812_v3 = vcombine.high %v564_v60, %v596_v61  ;;  %v694_v5 = vld [vmem:[%s4507_s26 + $0x480] sm:$0xff] }
  0xa5   : > { %v3806_v18 = vcombine.high %v561_v13, %v593_v14  ;;  %v726_v6 = vld [vmem:[%s4507_s26 + $0x580] sm:$0xff] }
  0xa6   : > { %3979 = vmatmul.mubr.msk.bf16.vlgmr.msra.gmra.mxu0 %vm1702_vm0, %v4532_v35  ;;  %3980 = vmatmul.mubr.msk.bf16.vlgmr.msra.gmra.mxu1 %vm1702_vm0, %v4532_v35 }
  0xa7   : > { %1963 = vmatpush1.bf16.msra.mxu0 %v3923_v21  ;;  %2004 = vmatpush1.bf16.msra.mxu1 %v3925_v22  ;;  %v691_v21 = vld [vmem:[%s4507_s26 + $0x468] sm:$0xff] }
  0xa8   : > { %1964 = vmatprep.subr.bf16.mxu0 %v3860_v23  ;;  %2005 = vmatprep.subr.bf16.mxu1 %v3862_v24  ;;  %v723_v22 = vld [vmem:[%s4507_s26 + $0x568] sm:$0xff]  ;;  %v3803_v23 = vcombine.low %v560_v11, %v592_v12  ;;  %v3805_v24 = vcombine.low %v561_v13, %v593_v14  ;;  %v3944_v11 = vcombine.high %v694_v5, %v726_v6  ;;  %v630_v13 = vld [vmem:[%s4507_s26 + $0x280] sm:$0xff] }
  0xa9   : > { %1984 = vmatprep.mubr.bf16.mxu0 %v4063_v0  ;;  %2025 = vmatprep.mubr.bf16.mxu1 %v4063_v0  ;;  %v3938_v26 = vcombine.high %v691_v21, %v723_v22  ;;  %v662_v14 = vld [vmem:[%s4507_s26 + $0x380] sm:$0xff] }
  0xab   : > { %1965 = vmatpush1.bf16.msra.mxu0 %v3859_v29  ;;  %2006 = vmatpush1.bf16.msra.mxu1 %v3861_v30  ;;  %v627_v29 = vld [vmem:[%s4507_s26 + $0x268] sm:$0xff] }
  0xac   : > { %1966 = vmatprep.subr.bf16.mxu0 %v3796_v31  ;;  %2007 = vmatprep.subr.bf16.mxu1 %v3798_v32  ;;  %v659_v30 = vld [vmem:[%s4507_s26 + $0x368] sm:$0xff]  ;;  %v3935_v31 = vcombine.low %v690_v19, %v722_v20  ;;  %v3937_v32 = vcombine.low %v691_v21, %v723_v22  ;;  %v3880_v19 = vcombine.high %v630_v13, %v662_v14  ;;  %v566_v21 = vld [vmem:[%s4507_s26 + $0x80] sm:$0xff] }
  0xad   : > { %v3874_v34 = vcombine.high %v627_v29, %v659_v30  ;;  %v598_v22 = vld [vmem:[%s4507_s26 + $0x180] sm:$0xff] }
  0xaf   : > { %1967 = vmatpush1.bf16.msra.mxu0 %v3795_v38  ;;  %2008 = vmatpush1.bf16.msra.mxu1 %v3797_v39  ;;  %v563_v38 = vld [vmem:[%s4507_s26 + $0x68] sm:$0xff] }
  0xb0   : > { %2044 = vmatprep.subr.bf16.mxu0 %v3928_v40  ;;  %2085 = vmatprep.subr.bf16.mxu1 %v3930_v41  ;;  %v595_v39 = vld [vmem:[%s4507_s26 + $0x168] sm:$0xff]  ;;  %v3871_v40 = vcombine.low %v626_v27, %v658_v28  ;;  %v3873_v41 = vcombine.low %v627_v29, %v659_v30  ;;  %v3816_v27 = vcombine.high %v566_v21, %v598_v22  ;;  %v696_v29 = vld [vmem:[%s4507_s26 + $0x490] sm:$0xff] }
  0xb1   : > { %v3810_v43 = vcombine.high %v563_v38, %v595_v39  ;;  %v728_v30 = vld [vmem:[%s4507_s26 + $0x590] sm:$0xff] }
  0xb2   : > { %3981 = vmatmul.mubr.msk.bf16.vlgmr.msra.gmra.mxu0 %vm1702_vm0, %v4532_v35  ;;  %3982 = vmatmul.mubr.msk.bf16.vlgmr.msra.gmra.mxu1 %vm1702_vm0, %v4532_v35 }
  0xb3   : > { %2045 = vmatpush1.bf16.msra.mxu0 %v3927_v46  ;;  %2086 = vmatpush1.bf16.msra.mxu1 %v3929_v47  ;;  %v693_v46 = vld [vmem:[%s4507_s26 + $0x478] sm:$0xff] }
  0xb4   : > { %2046 = vmatprep.subr.bf16.mxu0 %v3864_v48  ;;  %2087 = vmatprep.subr.bf16.mxu1 %v3866_v49  ;;  %v725_v47 = vld [vmem:[%s4507_s26 + $0x578] sm:$0xff]  ;;  %v3807_v48 = vcombine.low %v562_v36, %v594_v37  ;;  %v3809_v49 = vcombine.low %v563_v38, %v595_v39  ;;  %v3948_v36 = vcombine.high %v696_v29, %v728_v30  ;;  %v632_v38 = vld [vmem:[%s4507_s26 + $0x290] sm:$0xff] }
  0xb5   : > { %2066 = vmatprep.mubr.bf16.mxu0 %v4063_v0  ;;  %2107 = vmatprep.mubr.bf16.mxu1 %v4063_v0  ;;  %v3942_v51 = vcombine.high %v693_v46, %v725_v47  ;;  %v664_v39 = vld [vmem:[%s4507_s26 + $0x390] sm:$0xff] }
  0xb7   : > { %2047 = vmatpush1.bf16.msra.mxu0 %v3863_v54  ;;  %2088 = vmatpush1.bf16.msra.mxu1 %v3865_v55  ;;  %v629_v54 = vld [vmem:[%s4507_s26 + $0x278] sm:$0xff] }
  0xb8   : > { %2048 = vmatprep.subr.bf16.mxu0 %v3800_v56  ;;  %2089 = vmatprep.subr.bf16.mxu1 %v3802_v57  ;;  %v661_v55 = vld [vmem:[%s4507_s26 + $0x378] sm:$0xff]  ;;  %v3939_v56 = vcombine.low %v692_v44, %v724_v45  ;;  %v3941_v57 = vcombine.low %v693_v46, %v725_v47  ;;  %v3884_v44 = vcombine.high %v632_v38, %v664_v39  ;;  %v568_v46 = vld [vmem:[%s4507_s26 + $0x90] sm:$0xff] }
  0xb9   : > { %v3878_v59 = vcombine.high %v629_v54, %v661_v55  ;;  %v600_v47 = vld [vmem:[%s4507_s26 + $0x190] sm:$0xff] }
  0xbb   : > { %2049 = vmatpush1.bf16.msra.mxu0 %v3799_v62  ;;  %2090 = vmatpush1.bf16.msra.mxu1 %v3801_v63  ;;  %v565_v62 = vld [vmem:[%s4507_s26 + $0x78] sm:$0xff] }
  0xbc   : > { %2126 = vmatprep.subr.bf16.mxu0 %v3932_v1  ;;  %2167 = vmatprep.subr.bf16.mxu1 %v3934_v2  ;;  %v597_v63 = vld [vmem:[%s4507_s26 + $0x178] sm:$0xff]  ;;  %v3875_v1 = vcombine.low %v628_v52, %v660_v53  ;;  %v3877_v2 = vcombine.low %v629_v54, %v661_v55  ;;  %v3820_v52 = vcombine.high %v568_v46, %v600_v47  ;;  %v698_v54 = vld [vmem:[%s4507_s26 + $0x4a0] sm:$0xff] }
  0xbd   : > { %v3814_v4 = vcombine.high %v565_v62, %v597_v63  ;;  %v730_v55 = vld [vmem:[%s4507_s26 + $0x5a0] sm:$0xff] }
  0xbe   : > { %3983 = vmatmul.mubr.msk.bf16.vlgmr.msra.gmra.mxu0 %vm1702_vm0, %v4532_v35  ;;  %3984 = vmatmul.mubr.msk.bf16.vlgmr.msra.gmra.mxu1 %vm1702_vm0, %v4532_v35 }
  0xbf   : > { %2127 = vmatpush1.bf16.msra.mxu0 %v3931_v7  ;;  %2168 = vmatpush1.bf16.msra.mxu1 %v3933_v8  ;;  %v695_v7 = vld [vmem:[%s4507_s26 + $0x488] sm:$0xff] }
  0xc0   : > { %2128 = vmatprep.subr.bf16.mxu0 %v3868_v9  ;;  %2169 = vmatprep.subr.bf16.mxu1 %v3870_v10  ;;  %v727_v8 = vld [vmem:[%s4507_s26 + $0x588] sm:$0xff]  ;;  %v3811_v9 = vcombine.low %v564_v60, %v596_v61  ;;  %v3813_v10 = vcombine.low %v565_v62, %v597_v63  ;;  %v3952_v60 = vcombine.high %v698_v54, %v730_v55  ;;  %v634_v62 = vld [vmem:[%s4507_s26 + $0x2a0] sm:$0xff] }
  0xc1   : > { %2148 = vmatprep.mubr.bf16.mxu0 %v4063_v0  ;;  %2189 = vmatprep.mubr.bf16.mxu1 %v4063_v0  ;;  %v3946_v12 = vcombine.high %v695_v7, %v727_v8  ;;  %v666_v63 = vld [vmem:[%s4507_s26 + $0x3a0] sm:$0xff] }
  0xc3   : > { %2129 = vmatpush1.bf16.msra.mxu0 %v3867_v15  ;;  %2170 = vmatpush1.bf16.msra.mxu1 %v3869_v16  ;;  %v631_v15 = vld [vmem:[%s4507_s26 + $0x288] sm:$0xff] }
  0xc4   : > { %2130 = vmatprep.subr.bf16.mxu0 %v3804_v17  ;;  %2171 = vmatprep.subr.bf16.mxu1 %v3806_v18  ;;  %v663_v16 = vld [vmem:[%s4507_s26 + $0x388] sm:$0xff]  ;;  %v3943_v17 = vcombine.low %v694_v5, %v726_v6  ;;  %v3945_v18 = vcombine.low %v695_v7, %v727_v8  ;;  %v3888_v5 = vcombine.high %v634_v62, %v666_v63  ;;  %v570_v7 = vld [vmem:[%s4507_s26 + $0xa0] sm:$0xff] }
  0xc5   : > { %v3882_v20 = vcombine.high %v631_v15, %v663_v16  ;;  %v602_v8 = vld [vmem:[%s4507_s26 + $0x1a0] sm:$0xff] }
  0xc7   : > { %2131 = vmatpush1.bf16.msra.mxu0 %v3803_v23  ;;  %2172 = vmatpush1.bf16.msra.mxu1 %v3805_v24  ;;  %v567_v23 = vld [vmem:[%s4507_s26 + $0x88] sm:$0xff] }
  0xc8   : > { %2208 = vmatprep.subr.bf16.mxu0 %v3936_v25  ;;  %2249 = vmatprep.subr.bf16.mxu1 %v3938_v26  ;;  %v599_v24 = vld [vmem:[%s4507_s26 + $0x188] sm:$0xff]  ;;  %v3879_v25 = vcombine.low %v630_v13, %v662_v14  ;;  %v3881_v26 = vcombine.low %v631_v15, %v663_v16  ;;  %v3824_v13 = vcombine.high %v570_v7, %v602_v8  ;;  %v700_v15 = vld [vmem:[%s4507_s26 + $0x4b0] sm:$0xff] }
  0xc9   : > { %v3818_v28 = vcombine.high %v567_v23, %v599_v24  ;;  %v732_v16 = vld [vmem:[%s4507_s26 + $0x5b0] sm:$0xff] }
  0xca   : > { %3985 = vmatmul.mubr.msk.bf16.vlgmr.msra.gmra.mxu0 %vm1702_vm0, %v4532_v35  ;;  %3986 = vmatmul.mubr.msk.bf16.vlgmr.msra.gmra.mxu1 %vm1702_vm0, %v4532_v35 }
  0xcb   : > { %2209 = vmatpush1.bf16.msra.mxu0 %v3935_v31  ;;  %2250 = vmatpush1.bf16.msra.mxu1 %v3937_v32  ;;  %v697_v31 = vld [vmem:[%s4507_s26 + $0x498] sm:$0xff] }
  0xcc   : > { %2210 = vmatprep.subr.bf16.mxu0 %v3872_v33  ;;  %2251 = vmatprep.subr.bf16.mxu1 %v3874_v34  ;;  %v729_v32 = vld [vmem:[%s4507_s26 + $0x598] sm:$0xff]  ;;  %v3815_v33 = vcombine.low %v566_v21, %v598_v22  ;;  %v3817_v34 = vcombine.low %v567_v23, %v599_v24  ;;  %v3956_v21 = vcombine.high %v700_v15, %v732_v16  ;;  %v636_v23 = vld [vmem:[%s4507_s26 + $0x2b0] sm:$0xff] }
  0xcd   : > { %2230 = vmatprep.mubr.bf16.mxu0 %v4063_v0  ;;  %2271 = vmatprep.mubr.bf16.mxu1 %v4063_v0  ;;  %v3950_v37 = vcombine.high %v697_v31, %v729_v32  ;;  %v668_v24 = vld [vmem:[%s4507_s26 + $0x3b0] sm:$0xff] }
  0xcf   : > { %2211 = vmatpush1.bf16.msra.mxu0 %v3871_v40  ;;  %2252 = vmatpush1.bf16.msra.mxu1 %v3873_v41  ;;  %v633_v40 = vld [vmem:[%s4507_s26 + $0x298] sm:$0xff] }
  0xd0   : > { %2212 = vmatprep.subr.bf16.mxu0 %v3808_v42  ;;  %2253 = vmatprep.subr.bf16.mxu1 %v3810_v43  ;;  %v665_v41 = vld [vmem:[%s4507_s26 + $0x398] sm:$0xff]  ;;  %v3947_v42 = vcombine.low %v696_v29, %v728_v30  ;;  %v3949_v43 = vcombine.low %v697_v31, %v729_v32  ;;  %v3892_v29 = vcombine.high %v636_v23, %v668_v24  ;;  %v572_v31 = vld [vmem:[%s4507_s26 + $0xb0] sm:$0xff] }
  0xd1   : > { %v3886_v45 = vcombine.high %v633_v40, %v665_v41  ;;  %v604_v32 = vld [vmem:[%s4507_s26 + $0x1b0] sm:$0xff] }
  0xd3   : > { %2213 = vmatpush1.bf16.msra.mxu0 %v3807_v48  ;;  %2254 = vmatpush1.bf16.msra.mxu1 %v3809_v49  ;;  %v569_v48 = vld [vmem:[%s4507_s26 + $0x98] sm:$0xff] }
  0xd4   : > { %2290 = vmatprep.subr.bf16.mxu0 %v3940_v50  ;;  %2331 = vmatprep.subr.bf16.mxu1 %v3942_v51  ;;  %v601_v49 = vld [vmem:[%s4507_s26 + $0x198] sm:$0xff]  ;;  %v3883_v50 = vcombine.low %v632_v38, %v664_v39  ;;  %v3885_v51 = vcombine.low %v633_v40, %v665_v41  ;;  %v3828_v38 = vcombine.high %v572_v31, %v604_v32  ;;  %v702_v40 = vld [vmem:[%s4507_s26 + $0x4c0] sm:$0xff] }
  0xd5   : > { %v3822_v53 = vcombine.high %v569_v48, %v601_v49  ;;  %v734_v41 = vld [vmem:[%s4507_s26 + $0x5c0] sm:$0xff] }
  0xd6   : > { %3987 = vmatmul.mubr.msk.bf16.vlgmr.msra.gmra.mxu0 %vm1702_vm0, %v4532_v35  ;;  %3988 = vmatmul.mubr.msk.bf16.vlgmr.msra.gmra.mxu1 %vm1702_vm0, %v4532_v35 }
  0xd7   : > { %2291 = vmatpush1.bf16.msra.mxu0 %v3939_v56  ;;  %2332 = vmatpush1.bf16.msra.mxu1 %v3941_v57  ;;  %v699_v56 = vld [vmem:[%s4507_s26 + $0x4a8] sm:$0xff] }
  0xd8   : > { %2292 = vmatprep.subr.bf16.mxu0 %v3876_v58  ;;  %2333 = vmatprep.subr.bf16.mxu1 %v3878_v59  ;;  %v731_v57 = vld [vmem:[%s4507_s26 + $0x5a8] sm:$0xff]  ;;  %v3819_v58 = vcombine.low %v568_v46, %v600_v47  ;;  %v3821_v59 = vcombine.low %v569_v48, %v601_v49  ;;  %v3960_v46 = vcombine.high %v702_v40, %v734_v41  ;;  %v638_v48 = vld [vmem:[%s4507_s26 + $0x2c0] sm:$0xff] }
  0xd9   : > { %2312 = vmatprep.mubr.bf16.mxu0 %v4063_v0  ;;  %2353 = vmatprep.mubr.bf16.mxu1 %v4063_v0  ;;  %v3954_v61 = vcombine.high %v699_v56, %v731_v57  ;;  %v670_v49 = vld [vmem:[%s4507_s26 + $0x3c0] sm:$0xff] }
  0xdb   : > { %2293 = vmatpush1.bf16.msra.mxu0 %v3875_v1  ;;  %2334 = vmatpush1.bf16.msra.mxu1 %v3877_v2  ;;  %v635_v1 = vld [vmem:[%s4507_s26 + $0x2a8] sm:$0xff] }
  0xdc   : > { %2294 = vmatprep.subr.bf16.mxu0 %v3812_v3  ;;  %2335 = vmatprep.subr.bf16.mxu1 %v3814_v4  ;;  %v667_v2 = vld [vmem:[%s4507_s26 + $0x3a8] sm:$0xff]  ;;  %v3951_v3 = vcombine.low %v698_v54, %v730_v55  ;;  %v3953_v4 = vcombine.low %v699_v56, %v731_v57  ;;  %v3896_v54 = vcombine.high %v638_v48, %v670_v49  ;;  %v574_v56 = vld [vmem:[%s4507_s26 + $0xc0] sm:$0xff] }
  0xdd   : > { %v3890_v6 = vcombine.high %v635_v1, %v667_v2  ;;  %v606_v57 = vld [vmem:[%s4507_s26 + $0x1c0] sm:$0xff] }
  0xdf   : > { %2295 = vmatpush1.bf16.msra.mxu0 %v3811_v9  ;;  %2336 = vmatpush1.bf16.msra.mxu1 %v3813_v10  ;;  %v571_v9 = vld [vmem:[%s4507_s26 + $0xa8] sm:$0xff] }
  0xe0   : > { %2372 = vmatprep.subr.bf16.mxu0 %v3944_v11  ;;  %2413 = vmatprep.subr.bf16.mxu1 %v3946_v12  ;;  %v603_v10 = vld [vmem:[%s4507_s26 + $0x1a8] sm:$0xff]  ;;  %v3887_v11 = vcombine.low %v634_v62, %v666_v63  ;;  %v3889_v12 = vcombine.low %v635_v1, %v667_v2  ;;  %v3832_v62 = vcombine.high %v574_v56, %v606_v57  ;;  %v704_v1 = vld [vmem:[%s4507_s26 + $0x4d0] sm:$0xff] }
  0xe1   : > { %v3826_v14 = vcombine.high %v571_v9, %v603_v10  ;;  %v736_v2 = vld [vmem:[%s4507_s26 + $0x5d0] sm:$0xff] }
  0xe2   : > { %3989 = vmatmul.mubr.msk.bf16.vlgmr.msra.gmra.mxu0 %vm1702_vm0, %v4532_v35  ;;  %3990 = vmatmul.mubr.msk.bf16.vlgmr.msra.gmra.mxu1 %vm1702_vm0, %v4532_v35 }
  0xe3   : > { %2373 = vmatpush1.bf16.msra.mxu0 %v3943_v17  ;;  %2414 = vmatpush1.bf16.msra.mxu1 %v3945_v18  ;;  %v701_v17 = vld [vmem:[%s4507_s26 + $0x4b8] sm:$0xff] }
  0xe4   : > { %2374 = vmatprep.subr.bf16.mxu0 %v3880_v19  ;;  %2415 = vmatprep.subr.bf16.mxu1 %v3882_v20  ;;  %v733_v18 = vld [vmem:[%s4507_s26 + $0x5b8] sm:$0xff]  ;;  %v3823_v19 = vcombine.low %v570_v7, %v602_v8  ;;  %v3825_v20 = vcombine.low %v571_v9, %v603_v10  ;;  %v3964_v7 = vcombine.high %v704_v1, %v736_v2  ;;  %v640_v9 = vld [vmem:[%s4507_s26 + $0x2d0] sm:$0xff] }
  0xe5   : > { %2394 = vmatprep.mubr.bf16.mxu0 %v4063_v0  ;;  %2435 = vmatprep.mubr.bf16.mxu1 %v4063_v0  ;;  %v3958_v22 = vcombine.high %v701_v17, %v733_v18  ;;  %v672_v10 = vld [vmem:[%s4507_s26 + $0x3d0] sm:$0xff] }
  0xe7   : > { %2375 = vmatpush1.bf16.msra.mxu0 %v3879_v25  ;;  %2416 = vmatpush1.bf16.msra.mxu1 %v3881_v26  ;;  %v637_v25 = vld [vmem:[%s4507_s26 + $0x2b8] sm:$0xff] }
  0xe8   : > { %2376 = vmatprep.subr.bf16.mxu0 %v3816_v27  ;;  %2417 = vmatprep.subr.bf16.mxu1 %v3818_v28  ;;  %v669_v26 = vld [vmem:[%s4507_s26 + $0x3b8] sm:$0xff]  ;;  %v3955_v27 = vcombine.low %v700_v15, %v732_v16  ;;  %v3957_v28 = vcombine.low %v701_v17, %v733_v18  ;;  %v3900_v15 = vcombine.high %v640_v9, %v672_v10  ;;  %v576_v17 = vld [vmem:[%s4507_s26 + $0xd0] sm:$0xff] }
  0xe9   : > { %v3894_v30 = vcombine.high %v637_v25, %v669_v26  ;;  %v608_v18 = vld [vmem:[%s4507_s26 + $0x1d0] sm:$0xff] }
  0xeb   : > { %2377 = vmatpush1.bf16.msra.mxu0 %v3815_v33  ;;  %2418 = vmatpush1.bf16.msra.mxu1 %v3817_v34  ;;  %v573_v33 = vld [vmem:[%s4507_s26 + $0xb8] sm:$0xff] }
  0xec   : > { %2454 = vmatprep.subr.bf16.mxu0 %v3948_v36  ;;  %2495 = vmatprep.subr.bf16.mxu1 %v3950_v37  ;;  %v605_v34 = vld [vmem:[%s4507_s26 + $0x1b8] sm:$0xff]  ;;  %v3891_v36 = vcombine.low %v636_v23, %v668_v24  ;;  %v3893_v37 = vcombine.low %v637_v25, %v669_v26  ;;  %v3836_v23 = vcombine.high %v576_v17, %v608_v18  ;;  %v706_v25 = vld [vmem:[%s4507_s26 + $0x4e0] sm:$0xff] }
  0xed   : > { %v3830_v39 = vcombine.high %v573_v33, %v605_v34  ;;  %v738_v26 = vld [vmem:[%s4507_s26 + $0x5e0] sm:$0xff] }
  0xee   : > { %3991 = vmatmul.mubr.msk.bf16.vlgmr.msra.gmra.mxu0 %vm1702_vm0, %v4532_v35  ;;  %3992 = vmatmul.mubr.msk.bf16.vlgmr.msra.gmra.mxu1 %vm1702_vm0, %v4532_v35 }
  0xef   : > { %2455 = vmatpush1.bf16.msra.mxu0 %v3947_v42  ;;  %2496 = vmatpush1.bf16.msra.mxu1 %v3949_v43  ;;  %v703_v42 = vld [vmem:[%s4507_s26 + $0x4c8] sm:$0xff] }
  0xf0   : > { %2456 = vmatprep.subr.bf16.mxu0 %v3884_v44  ;;  %2497 = vmatprep.subr.bf16.mxu1 %v3886_v45  ;;  %v735_v43 = vld [vmem:[%s4507_s26 + $0x5c8] sm:$0xff]  ;;  %v3827_v44 = vcombine.low %v572_v31, %v604_v32  ;;  %v3829_v45 = vcombine.low %v573_v33, %v605_v34  ;;  %v642_v32 = vld [vmem:[%s4507_s26 + $0x2e0] sm:$0xff] }
  0xf1   : > { %2476 = vmatprep.mubr.bf16.mxu0 %v4063_v0  ;;  %2517 = vmatprep.mubr.bf16.mxu1 %v4063_v0  ;;  %v3962_v47 = vcombine.high %v703_v42, %v735_v43  ;;  %v674_v33 = vld [vmem:[%s4507_s26 + $0x3e0] sm:$0xff]  ;;  %v643_v34 = vld [vmem:[%s4507_s26 + $0x2e8] sm:$0xff] }
  0xf3   : > { %2457 = vmatpush1.bf16.msra.mxu0 %v3883_v50  ;;  %2498 = vmatpush1.bf16.msra.mxu1 %v3885_v51  ;;  %v639_v50 = vld [vmem:[%s4507_s26 + $0x2c8] sm:$0xff] }
  0xf4   : > { %2458 = vmatprep.subr.bf16.mxu0 %v3820_v52  ;;  %2499 = vmatprep.subr.bf16.mxu1 %v3822_v53  ;;  %v671_v51 = vld [vmem:[%s4507_s26 + $0x3c8] sm:$0xff]  ;;  %v3959_v52 = vcombine.low %v702_v40, %v734_v41  ;;  %v3961_v53 = vcombine.low %v703_v42, %v735_v43  ;;  %v578_v41 = vld [vmem:[%s4507_s26 + $0xe0] sm:$0xff] }
  0xf5   : > { %v3898_v55 = vcombine.high %v639_v50, %v671_v51  ;;  %v610_v42 = vld [vmem:[%s4507_s26 + $0x1e0] sm:$0xff] }
  0xf6   : > { %v4773_v43 = vld [vmem:[%s5264_s0] sm:$0x1] }
  0xf7   : > { %2459 = vmatpush1.bf16.msra.mxu0 %v3819_v58  ;;  %2500 = vmatpush1.bf16.msra.mxu1 %v3821_v59  ;;  %v575_v58 = vld [vmem:[%s4507_s26 + $0xc8] sm:$0xff] }
  0xf8   : > { %2536 = vmatprep.subr.bf16.mxu0 %v3952_v60  ;;  %2577 = vmatprep.subr.bf16.mxu1 %v3954_v61  ;;  %v607_v59 = vld [vmem:[%s4507_s26 + $0x1c8] sm:$0xff]  ;;  %v3895_v60 = vcombine.low %v638_v48, %v670_v49  ;;  %v3897_v61 = vcombine.low %v639_v50, %v671_v51  ;;  %v3840_v48 = vcombine.high %v578_v41, %v610_v42  ;;  %v708_v50 = vld [vmem:[%s4507_s26 + $0x4f0] sm:$0xff] }
  0xf9   : > { %v3834_v63 = vcombine.high %v575_v58, %v607_v59  ;;  %v740_v51 = vld [vmem:[%s4507_s26 + $0x5f0] sm:$0xff] }
  0xfa   : > { %3993 = vmatmul.mubr.msk.bf16.vlgmr.msra.gmra.mxu0 %vm1702_vm0, %v4532_v35  ;;  %3994 = vmatmul.mubr.msk.bf16.vlgmr.msra.gmra.mxu1 %vm1702_vm0, %v4532_v35 }
  0xfb   : > { %2537 = vmatpush1.bf16.msra.mxu0 %v3951_v3  ;;  %2578 = vmatpush1.bf16.msra.mxu1 %v3953_v4  ;;  %v705_v3 = vld [vmem:[%s4507_s26 + $0x4d8] sm:$0xff] }
  0xfc   : > { %2538 = vmatprep.subr.bf16.mxu0 %v3888_v5  ;;  %2579 = vmatprep.subr.bf16.mxu1 %v3890_v6  ;;  %v737_v4 = vld [vmem:[%s4507_s26 + $0x5d8] sm:$0xff]  ;;  %v3831_v5 = vcombine.low %v574_v56, %v606_v57  ;;  %v3833_v6 = vcombine.low %v575_v58, %v607_v59  ;;  %v3972_v56 = vcombine.high %v708_v50, %v740_v51  ;;  %v644_v58 = vld [vmem:[%s4507_s26 + $0x2f0] sm:$0xff] }
  0xfd   : > { %2558 = vmatprep.mubr.bf16.mxu0 %v4063_v0  ;;  %2599 = vmatprep.mubr.bf16.mxu1 %v4063_v0  ;;  %v3966_v8 = vcombine.high %v705_v3, %v737_v4  ;;  %v676_v59 = vld [vmem:[%s4507_s26 + $0x3f0] sm:$0xff] }
  0xff   : > { %2539 = vmatpush1.bf16.msra.mxu0 %v3887_v11  ;;  %2580 = vmatpush1.bf16.msra.mxu1 %v3889_v12  ;;  %v641_v11 = vld [vmem:[%s4507_s26 + $0x2d8] sm:$0xff] }
 0x100   : > { %2540 = vmatprep.subr.bf16.mxu0 %v3824_v13  ;;  %2581 = vmatprep.subr.bf16.mxu1 %v3826_v14  ;;  %v673_v12 = vld [vmem:[%s4507_s26 + $0x3d8] sm:$0xff]  ;;  %v3963_v13 = vcombine.low %v704_v1, %v736_v2  ;;  %v3965_v14 = vcombine.low %v705_v3, %v737_v4  ;;  %v3908_v1 = vcombine.high %v644_v58, %v676_v59  ;;  %v580_v3 = vld [vmem:[%s4507_s26 + $0xf0] sm:$0xff] }
 0x101   : > { %v3902_v16 = vcombine.high %v641_v11, %v673_v12  ;;  %v612_v4 = vld [vmem:[%s4507_s26 + $0x1f0] sm:$0xff] }
 0x103   : > { %2541 = vmatpush1.bf16.msra.mxu0 %v3823_v19  ;;  %2582 = vmatpush1.bf16.msra.mxu1 %v3825_v20  ;;  %v577_v19 = vld [vmem:[%s4507_s26 + $0xd8] sm:$0xff] }
 0x104   : > { %2618 = vmatprep.subr.bf16.mxu0 %v3956_v21  ;;  %2659 = vmatprep.subr.bf16.mxu1 %v3958_v22  ;;  %v609_v20 = vld [vmem:[%s4507_s26 + $0x1d8] sm:$0xff]  ;;  %v3899_v21 = vcombine.low %v640_v9, %v672_v10  ;;  %v3901_v22 = vcombine.low %v641_v11, %v673_v12  ;;  %v3844_v9 = vcombine.high %v580_v3, %v612_v4 }
 0x105   : > { %v3838_v24 = vcombine.high %v577_v19, %v609_v20  ;;  %v3843_v11 = vcombine.low %v580_v3, %v612_v4 }
 0x106   : > { %3995 = vmatmul.mubr.msk.bf16.vlgmr.msra.gmra.mxu0 %vm1702_vm0, %v4532_v35  ;;  %3996 = vmatmul.mubr.msk.bf16.vlgmr.msra.gmra.mxu1 %vm1702_vm0, %v4532_v35 }
 0x107   : > { %2619 = vmatpush1.bf16.msra.mxu0 %v3955_v27  ;;  %2660 = vmatpush1.bf16.msra.mxu1 %v3957_v28  ;;  %v707_v27 = vld [vmem:[%s4507_s26 + $0x4e8] sm:$0xff]  ;;  %v3835_v28 = vcombine.low %v576_v17, %v608_v18 }
 0x108   : > { %2620 = vmatprep.subr.bf16.mxu0 %v3892_v29  ;;  %2661 = vmatprep.subr.bf16.mxu1 %v3894_v30  ;;  %v3837_v29 = vcombine.low %v577_v19, %v609_v20  ;;  %v3968_v30 = vcombine.high %v706_v25, %v738_v26 }
 0x109   : > { %2640 = vmatprep.mubr.bf16.mxu0 %v4063_v0  ;;  %2681 = vmatprep.mubr.bf16.mxu1 %v4063_v0 }
 0x10b   : > { %2621 = vmatpush1.bf16.msra.mxu0 %v3891_v36  ;;  %2662 = vmatpush1.bf16.msra.mxu1 %v3893_v37  ;;  %v675_v36 = vld [vmem:[%s4507_s26 + $0x3e8] sm:$0xff]  ;;  %v3967_v37 = vcombine.low %v706_v25, %v738_v26 }
 0x10c   : > { %2622 = vmatprep.subr.bf16.mxu0 %v3828_v38  ;;  %2663 = vmatprep.subr.bf16.mxu1 %v3830_v39  ;;  %v3904_v39 = vcombine.high %v642_v32, %v674_v33  ;;  %v3906_v40 = vcombine.high %v643_v34, %v675_v36 }
 0x10f   : > { %2623 = vmatpush1.bf16.msra.mxu0 %v3827_v44  ;;  %2664 = vmatpush1.bf16.msra.mxu1 %v3829_v45  ;;  %v579_v44 = vld [vmem:[%s4507_s26 + $0xe8] sm:$0xff] }
 0x110   : > { %2700 = vmatprep.subr.bf16.mxu0 %v3960_v46  ;;  %2741 = vmatprep.subr.bf16.mxu1 %v3962_v47  ;;  %v611_v45 = vld [vmem:[%s4507_s26 + $0x1e8] sm:$0xff]  ;;  %v3903_v46 = vcombine.low %v642_v32, %v674_v33  ;;  %v3905_v47 = vcombine.low %v643_v34, %v675_v36 }
 0x111   : > { %v3842_v49 = vcombine.high %v579_v44, %v611_v45 }
 0x112   : > { %3997 = vmatmul.mubr.msk.bf16.vlgmr.msra.gmra.mxu0 %vm1702_vm0, %v4532_v35  ;;  %3998 = vmatmul.mubr.msk.bf16.vlgmr.msra.gmra.mxu1 %vm1702_vm0, %v4532_v35 }
 0x113   : > { %2701 = vmatpush1.bf16.msra.mxu0 %v3959_v52  ;;  %2742 = vmatpush1.bf16.msra.mxu1 %v3961_v53  ;;  %v709_v52 = vld [vmem:[%s4507_s26 + $0x4f8] sm:$0xff] }
 0x114   : > { %2702 = vmatprep.subr.bf16.mxu0 %v3896_v54  ;;  %2743 = vmatprep.subr.bf16.mxu1 %v3898_v55  ;;  %v741_v53 = vld [vmem:[%s4507_s26 + $0x5f8] sm:$0xff]  ;;  %v3839_v54 = vcombine.low %v578_v41, %v610_v42  ;;  %v3841_v55 = vcombine.low %v579_v44, %v611_v45 }
 0x115   : > { %2722 = vmatprep.mubr.bf16.mxu0 %v4063_v0  ;;  %2763 = vmatprep.mubr.bf16.mxu1 %v4063_v0  ;;  %v3974_v57 = vcombine.high %v709_v52, %v741_v53 }
 0x117   : > { %2703 = vmatpush1.bf16.msra.mxu0 %v3895_v60  ;;  %2744 = vmatpush1.bf16.msra.mxu1 %v3897_v61  ;;  %v645_v60 = vld [vmem:[%s4507_s26 + $0x2f8] sm:$0xff] }
 0x118   : > { %2704 = vmatprep.subr.bf16.mxu0 %v3832_v62  ;;  %2745 = vmatprep.subr.bf16.mxu1 %v3834_v63  ;;  %v677_v61 = vld [vmem:[%s4507_s26 + $0x3f8] sm:$0xff]  ;;  %v3971_v62 = vcombine.low %v708_v50, %v740_v51  ;;  %v3973_v63 = vcombine.low %v709_v52, %v741_v53 }
 0x119   : > { %v3910_v2 = vcombine.high %v645_v60, %v677_v61 }
 0x11b   : > { %2705 = vmatpush1.bf16.msra.mxu0 %v3831_v5  ;;  %2746 = vmatpush1.bf16.msra.mxu1 %v3833_v6  ;;  %v581_v5 = vld [vmem:[%s4507_s26 + $0xf8] sm:$0xff] }
 0x11c   : > { %2782 = vmatprep.subr.bf16.mxu0 %v3964_v7  ;;  %2823 = vmatprep.subr.bf16.mxu1 %v3966_v8  ;;  %v613_v6 = vld [vmem:[%s4507_s26 + $0x1f8] sm:$0xff]  ;;  %v3907_v7 = vcombine.low %v644_v58, %v676_v59  ;;  %v3909_v8 = vcombine.low %v645_v60, %v677_v61 }
 0x11d   : > { %v3846_v10 = vcombine.high %v581_v5, %v613_v6  ;;  %v3845_v12 = vcombine.low %v581_v5, %v613_v6 }
 0x11e   : > { %3999 = vmatmul.mubr.msk.bf16.vlgmr.msra.gmra.mxu0 %vm1702_vm0, %v4532_v35  ;;  %4000 = vmatmul.mubr.msk.bf16.vlgmr.msra.gmra.mxu1 %vm1702_vm0, %v4532_v35  ;;  %v739_v35 = vld [vmem:[%s4507_s26 + $0x5e8] sm:$0xff] }
 0x11f   : > { %2783 = vmatpush1.bf16.msra.mxu0 %v3963_v13  ;;  %2824 = vmatpush1.bf16.msra.mxu1 %v3965_v14  ;;  %v3970_v31 = vcombine.high %v707_v27, %v739_v35  ;;  %v3969_v38 = vcombine.low %v707_v27, %v739_v35 }
 0x120   : > { %2784 = vmatprep.subr.bf16.mxu0 %v3900_v15  ;;  %2825 = vmatprep.subr.bf16.mxu1 %v3902_v16 }
 0x121   : > { %2804 = vmatprep.mubr.bf16.mxu0 %v4063_v0  ;;  %2845 = vmatprep.mubr.bf16.mxu1 %v4063_v0 }
 0x123   : > { %2785 = vmatpush1.bf16.msra.mxu0 %v3899_v21  ;;  %2826 = vmatpush1.bf16.msra.mxu1 %v3901_v22 }
 0x124   : > { %2786 = vmatprep.subr.bf16.mxu0 %v3836_v23  ;;  %2827 = vmatprep.subr.bf16.mxu1 %v3838_v24 }
 0x127   : > { %2787 = vmatpush1.bf16.msra.mxu0 %v3835_v28  ;;  %2828 = vmatpush1.bf16.msra.mxu1 %v3837_v29 }
 0x128   : > { %2864 = vmatprep.subr.bf16.mxu0 %v3968_v30  ;;  %2905 = vmatprep.subr.bf16.mxu1 %v3970_v31 }
 0x12a   : > { %4001 = vmatmul.mubr.msk.bf16.vlgmr.msra.gmra.mxu0 %vm1702_vm0, %v4773_v43  ;;  %4002 = vmatmul.mubr.msk.bf16.vlgmr.msra.gmra.mxu1 %vm1702_vm0, %v4773_v43 }
 0x12b   : > { %2865 = vmatpush1.bf16.msra.mxu0 %v3967_v37  ;;  %2906 = vmatpush1.bf16.msra.mxu1 %v3969_v38 }
 0x12c   : > { %2866 = vmatprep.subr.bf16.mxu0 %v3904_v39  ;;  %2907 = vmatprep.subr.bf16.mxu1 %v3906_v40 }
 0x12d   : > { %2886 = vmatprep.mubr.bf16.mxu0 %v4063_v0  ;;  %2927 = vmatprep.mubr.bf16.mxu1 %v4063_v0 }
 0x12f   : > { %2867 = vmatpush1.bf16.msra.mxu0 %v3903_v46  ;;  %2908 = vmatpush1.bf16.msra.mxu1 %v3905_v47 }
 0x130   : > { %2868 = vmatprep.subr.bf16.mxu0 %v3840_v48  ;;  %2909 = vmatprep.subr.bf16.mxu1 %v3842_v49 }
 0x133   : > { %2869 = vmatpush1.bf16.msra.mxu0 %v3839_v54  ;;  %2910 = vmatpush1.bf16.msra.mxu1 %v3841_v55 }
 0x134   : > { %2946 = vmatprep.subr.bf16.mxu0 %v3972_v56  ;;  %2987 = vmatprep.subr.bf16.mxu1 %v3974_v57 }
 0x136   : > { %4003 = vmatmul.mubr.msk.bf16.vlgmr.msra.gmra.mxu0 %vm1702_vm0, %v4773_v43  ;;  %4004 = vmatmul.mubr.msk.bf16.vlgmr.msra.gmra.mxu1 %vm1702_vm0, %v4773_v43 }
 0x137   : > { %2947 = vmatpush1.bf16.msra.mxu0 %v3971_v62  ;;  %2988 = vmatpush1.bf16.msra.mxu1 %v3973_v63 }
 0x138   : > { %2948 = vmatprep.subr.bf16.mxu0 %v3908_v1  ;;  %2989 = vmatprep.subr.bf16.mxu1 %v3910_v2 }
 0x139   : > { %2968 = vmatprep.mubr.bf16.mxu0 %v4063_v0  ;;  %3009 = vmatprep.mubr.bf16.mxu1 %v4063_v0 }
 0x13b   : > { %2949 = vmatpush1.bf16.msra.mxu0 %v3907_v7  ;;  %2990 = vmatpush1.bf16.msra.mxu1 %v3909_v8 }
 0x13c   : > { %2950 = vmatprep.subr.bf16.mxu0 %v3844_v9  ;;  %2991 = vmatprep.subr.bf16.mxu1 %v3846_v10 }
 0x13f   : > { %2951 = vmatpush1.bf16.msra.mxu0 %v3843_v11  ;;  %2992 = vmatpush1.bf16.msra.mxu1 %v3845_v12 }
 0x142   : > { %4005 = vmatmul.mubr.msk.bf16.vlgmr.msra.gmra.mxu0 %vm1702_vm0, %v4773_v43  ;;  %4006 = vmatmul.mubr.msk.bf16.vlgmr.msra.gmra.mxu1 %vm1702_vm0, %v4773_v43 }
 0x14e   : > { %v1740_v13 = vpop.f32.mrf.mxu0  ;;  %v1781_v15 = vpop.f32.mrf.mxu1 }
 0x14f   : > { %v3018_v14 = vmax.f32 %v1740_v13, 0.0  ;;  %v3020_v16 = vmax.f32 %v1781_v15, 0.0 }
 0x150   : > { %v1742_v0 = vpop.f32.mrf.mxu0  ;;  %v1783_v19 = vpop.f32.mrf.mxu1 }
 0x151   : > { %v4805_v17 = vmin.f32 %v3018_v14, 6.0  ;;  %v3019_v18 = vmax.f32 %v1742_v0, 0.0  ;;  %v4809_v22 = vmin.f32 %v3020_v16, 6.0  ;;  %v3021_v24 = vmax.f32 %v1783_v19, 0.0 }
 0x152   : > { %v1744_v20 = vpop.f32.mrf.mxu0  ;;  %v1785_v25 = vpop.f32.mrf.mxu1 }
 0x153   : > { %v3147_v21 = vsel %vm3146_vm1, %v4805_v17, 0.0  ;;  %v4811_v23 = vmin.f32 %v3019_v18, 6.0  ;;  %v3150_v29 = vsel %vm3146_vm1, %v4809_v22, 0.0  ;;  %v4817_v30 = vmin.f32 %v3021_v24, 6.0 }
 0x154   : > { %v1745_v26 = vpop.f32.mrf.mxu0  ;;  %v1786_v35 = vpop.f32.mrf.mxu1 }
 0x155   : > { %v3148_v27 = vsel %vm3146_vm1, %v4811_v23, 0.0  ;;  %v3152_v33 = vsel %vm3146_vm1, %v4817_v30, 0.0 }
 0x156   : > { %v3149_v28 = vadd.f32 %v3148_v27, %v3147_v21 }
 0x158   : > { %v3151_v31 = vadd.f32 %v3150_v29, %v3149_v28 }
 0x15a   : > { %v1822_v32 = vpop.f32.mrf.mxu0  ;;  %v1863_v36 = vpop.f32.mrf.mxu1  ;;  %v3153_v42 = vadd.f32 %v3152_v33, %v3151_v31 }
 0x15b   : > { %v3022_v34 = vmax.f32 %v1822_v32, 0.0  ;;  %v3024_v37 = vmax.f32 %v1863_v36, 0.0 }
 0x15c   : > { %v1824_v38 = vpop.f32.mrf.mxu0  ;;  %v1865_v41 = vpop.f32.mrf.mxu1 }
 0x15d   : > { %v4821_v39 = vmin.f32 %v3022_v34, 6.0  ;;  %v3023_v40 = vmax.f32 %v1824_v38, 0.0  ;;  %v4825_v45 = vmin.f32 %v3024_v37, 6.0  ;;  %v3025_v47 = vmax.f32 %v1865_v41, 0.0 }
 0x15e   : > { %v1826_v43 = vpop.f32.mrf.mxu0  ;;  %v1867_v48 = vpop.f32.mrf.mxu1 }
 0x15f   : > { %v3154_v44 = vsel %vm3146_vm1, %v4821_v39, 0.0  ;;  %v4827_v46 = vmin.f32 %v3023_v40, 6.0  ;;  %v3158_v54 = vsel %vm3146_vm1, %v4825_v45, 0.0  ;;  %v4833_v55 = vmin.f32 %v3025_v47, 6.0 }
 0x160   : > { %v3155_v49 = vadd.f32 %v3154_v44, %v3153_v42  ;;  %v1827_v50 = vpop.f32.mrf.mxu0  ;;  %v1868_v52 = vpop.f32.mrf.mxu1 }
 0x161   : > { %v3156_v51 = vsel %vm3146_vm1, %v4827_v46, 0.0  ;;  %v3160_v58 = vsel %vm3146_vm1, %v4833_v55, 0.0 }
 0x162   : > { %v3157_v53 = vadd.f32 %v3156_v51, %v3155_v49 }
 0x164   : > { %v3159_v56 = vadd.f32 %v3158_v54, %v3157_v53 }
 0x166   : > { %v1904_v57 = vpop.f32.mrf.mxu0  ;;  %v1945_v60 = vpop.f32.mrf.mxu1  ;;  %v3161_v3 = vadd.f32 %v3160_v58, %v3159_v56 }
 0x167   : > { %v3026_v59 = vmax.f32 %v1904_v57, 0.0  ;;  %v3028_v61 = vmax.f32 %v1945_v60, 0.0 }
 0x168   : > { %v1906_v62 = vpop.f32.mrf.mxu0  ;;  %v1947_v2 = vpop.f32.mrf.mxu1 }
 0x169   : > { %v4837_v63 = vmin.f32 %v3026_v59, 6.0  ;;  %v3027_v1 = vmax.f32 %v1906_v62, 0.0  ;;  %v4841_v6 = vmin.f32 %v3028_v61, 6.0  ;;  %v3029_v8 = vmax.f32 %v1947_v2, 0.0 }
 0x16a   : > { %v1908_v4 = vpop.f32.mrf.mxu0  ;;  %v1949_v9 = vpop.f32.mrf.mxu1 }
 0x16b   : > { %v3162_v5 = vsel %vm3146_vm1, %v4837_v63, 0.0  ;;  %v4843_v7 = vmin.f32 %v3027_v1, 6.0  ;;  %v3166_v15 = vsel %vm3146_vm1, %v4841_v6, 0.0  ;;  %v4849_v16 = vmin.f32 %v3029_v8, 6.0 }
 0x16c   : > { %v3163_v10 = vadd.f32 %v3162_v5, %v3161_v3  ;;  %v1909_v11 = vpop.f32.mrf.mxu0  ;;  %v1950_v13 = vpop.f32.mrf.mxu1 }
 0x16d   : > { %v3164_v12 = vsel %vm3146_vm1, %v4843_v7, 0.0  ;;  %v3168_v19 = vsel %vm3146_vm1, %v4849_v16, 0.0 }
 0x16e   : > { %v3165_v14 = vadd.f32 %v3164_v12, %v3163_v10 }
 0x170   : > { %v3167_v0 = vadd.f32 %v3166_v15, %v3165_v14 }
 0x172   : > { %v1986_v18 = vpop.f32.mrf.mxu0  ;;  %v2027_v21 = vpop.f32.mrf.mxu1  ;;  %v3169_v28 = vadd.f32 %v3168_v19, %v3167_v0 }
 0x173   : > { %v3030_v20 = vmax.f32 %v1986_v18, 0.0  ;;  %v3032_v24 = vmax.f32 %v2027_v21, 0.0 }
 0x174   : > { %v1988_v25 = vpop.f32.mrf.mxu0  ;;  %v2029_v35 = vpop.f32.mrf.mxu1 }
 0x175   : > { %v4853_v26 = vmin.f32 %v3030_v20, 6.0  ;;  %v3031_v27 = vmax.f32 %v1988_v25, 0.0  ;;  %v4857_v32 = vmin.f32 %v3032_v24, 6.0  ;;  %v3033_v34 = vmax.f32 %v2029_v35, 0.0 }
 0x176   : > { %v1990_v29 = vpop.f32.mrf.mxu0  ;;  %v2031_v36 = vpop.f32.mrf.mxu1 }
 0x177   : > { %v3170_v31 = vsel %vm3146_vm1, %v4853_v26, 0.0  ;;  %v4859_v33 = vmin.f32 %v3031_v27, 6.0  ;;  %v3174_v43 = vsel %vm3146_vm1, %v4857_v32, 0.0  ;;  %v4865_v44 = vmin.f32 %v3033_v34, 6.0 }
 0x178   : > { %v3171_v37 = vadd.f32 %v3170_v31, %v3169_v28  ;;  %v1991_v38 = vpop.f32.mrf.mxu0  ;;  %v2032_v41 = vpop.f32.mrf.mxu1 }
 0x179   : > { %v3172_v40 = vsel %vm3146_vm1, %v4859_v33, 0.0  ;;  %v3176_v49 = vsel %vm3146_vm1, %v4865_v44, 0.0 }
 0x17a   : > { %v3173_v42 = vadd.f32 %v3172_v40, %v3171_v37 }
 0x17c   : > { %v3175_v47 = vadd.f32 %v3174_v43, %v3173_v42 }
 0x17e   : > { %v2068_v48 = vpop.f32.mrf.mxu0  ;;  %v2109_v51 = vpop.f32.mrf.mxu1  ;;  %v3177_v58 = vadd.f32 %v3176_v49, %v3175_v47 }
 0x17f   : > { %v3034_v50 = vmax.f32 %v2068_v48, 0.0  ;;  %v3036_v52 = vmax.f32 %v2109_v51, 0.0 }
 0x180   : > { %v2070_v53 = vpop.f32.mrf.mxu0  ;;  %v2111_v57 = vpop.f32.mrf.mxu1 }
 0x181   : > { %v4869_v54 = vmin.f32 %v3034_v50, 6.0  ;;  %v3035_v56 = vmax.f32 %v2070_v53, 0.0  ;;  %v4873_v61 = vmin.f32 %v3036_v52, 6.0  ;;  %v3037_v1 = vmax.f32 %v2111_v57, 0.0 }
 0x182   : > { %v2072_v59 = vpop.f32.mrf.mxu0  ;;  %v2113_v2 = vpop.f32.mrf.mxu1 }
 0x183   : > { %v3178_v60 = vsel %vm3146_vm1, %v4869_v54, 0.0  ;;  %v4875_v62 = vmin.f32 %v3035_v56, 6.0  ;;  %v3182_v10 = vsel %vm3146_vm1, %v4873_v61, 0.0  ;;  %v4881_v11 = vmin.f32 %v3037_v1, 6.0 }
 0x184   : > { %v3179_v3 = vadd.f32 %v3178_v60, %v3177_v58  ;;  %v2073_v4 = vpop.f32.mrf.mxu0  ;;  %v2114_v8 = vpop.f32.mrf.mxu1 }
 0x185   : > { %v3180_v5 = vsel %vm3146_vm1, %v4875_v62, 0.0  ;;  %v3184_v14 = vsel %vm3146_vm1, %v4881_v11, 0.0 }
 0x186   : > { %v3181_v9 = vadd.f32 %v3180_v5, %v3179_v3 }
 0x188   : > { %v3183_v12 = vadd.f32 %v3182_v10, %v3181_v9 }
 0x18a   : > { %v2150_v13 = vpop.f32.mrf.mxu0  ;;  %v2191_v0 = vpop.f32.mrf.mxu1  ;;  %v3185_v25 = vadd.f32 %v3184_v14, %v3183_v12 }
 0x18b   : > { %v3038_v15 = vmax.f32 %v2150_v13, 0.0  ;;  %v3040_v18 = vmax.f32 %v2191_v0, 0.0 }
 0x18c   : > { %v2152_v19 = vpop.f32.mrf.mxu0  ;;  %v2193_v24 = vpop.f32.mrf.mxu1 }
 0x18d   : > { %v4885_v20 = vmin.f32 %v3038_v15, 6.0  ;;  %v3039_v21 = vmax.f32 %v2152_v19, 0.0  ;;  %v4889_v28 = vmin.f32 %v3040_v18, 6.0  ;;  %v3041_v31 = vmax.f32 %v2193_v24, 0.0 }
 0x18e   : > { %v2154_v27 = vpop.f32.mrf.mxu0  ;;  %v2195_v34 = vpop.f32.mrf.mxu1 }
 0x18f   : > { %v3186_v35 = vsel %vm3146_vm1, %v4885_v20, 0.0  ;;  %v4891_v29 = vmin.f32 %v3039_v21, 6.0  ;;  %v3190_v42 = vsel %vm3146_vm1, %v4889_v28, 0.0  ;;  %v4897_v43 = vmin.f32 %v3041_v31, 6.0 }
 0x190   : > { %v3187_v36 = vadd.f32 %v3186_v35, %v3185_v25  ;;  %v2155_v37 = vpop.f32.mrf.mxu0  ;;  %v2196_v40 = vpop.f32.mrf.mxu1 }
 0x191   : > { %v3188_v38 = vsel %vm3146_vm1, %v4891_v29, 0.0  ;;  %v3192_v49 = vsel %vm3146_vm1, %v4897_v43, 0.0 }
 0x192   : > { %v3189_v41 = vadd.f32 %v3188_v38, %v3187_v36 }
 0x194   : > { %v3191_v47 = vadd.f32 %v3190_v42, %v3189_v41 }
 0x196   : > { %v2232_v48 = vpop.f32.mrf.mxu0  ;;  %v2273_v51 = vpop.f32.mrf.mxu1  ;;  %v3193_v59 = vadd.f32 %v3192_v49, %v3191_v47 }
 0x197   : > { %v3042_v50 = vmax.f32 %v2232_v48, 0.0  ;;  %v3044_v52 = vmax.f32 %v2273_v51, 0.0 }
 0x198   : > { %v2234_v53 = vpop.f32.mrf.mxu0  ;;  %v2275_v58 = vpop.f32.mrf.mxu1 }
 0x199   : > { %v4901_v56 = vmin.f32 %v3042_v50, 6.0  ;;  %v3043_v57 = vmax.f32 %v2234_v53, 0.0  ;;  %v4905_v2 = vmin.f32 %v3044_v52, 6.0  ;;  %v3045_v4 = vmax.f32 %v2275_v58, 0.0 }
 0x19a   : > { %v2236_v60 = vpop.f32.mrf.mxu0  ;;  %v2277_v5 = vpop.f32.mrf.mxu1 }
 0x19b   : > { %v3194_v1 = vsel %vm3146_vm1, %v4901_v56, 0.0  ;;  %v4907_v3 = vmin.f32 %v3043_v57, 6.0  ;;  %v3198_v14 = vsel %vm3146_vm1, %v4905_v2, 0.0  ;;  %v4913_v15 = vmin.f32 %v3045_v4, 6.0 }
 0x19c   : > { %v3195_v8 = vadd.f32 %v3194_v1, %v3193_v59  ;;  %v2237_v9 = vpop.f32.mrf.mxu0  ;;  %v2278_v12 = vpop.f32.mrf.mxu1 }
 0x19d   : > { %v3196_v10 = vsel %vm3146_vm1, %v4907_v3, 0.0  ;;  %v3200_v19 = vsel %vm3146_vm1, %v4913_v15, 0.0 }
 0x19e   : > { %v3197_v13 = vadd.f32 %v3196_v10, %v3195_v8 }
 0x1a0   : > { %v3199_v0 = vadd.f32 %v3198_v14, %v3197_v13 }
 0x1a2   : > { %v2314_v18 = vpop.f32.mrf.mxu0  ;;  %v2355_v24 = vpop.f32.mrf.mxu1  ;;  %v3201_v36 = vadd.f32 %v3200_v19, %v3199_v0 }
 0x1a3   : > { %v3046_v21 = vmax.f32 %v2314_v18, 0.0  ;;  %v3048_v25 = vmax.f32 %v2355_v24, 0.0 }
 0x1a4   : > { %v2316_v27 = vpop.f32.mrf.mxu0  ;;  %v2357_v34 = vpop.f32.mrf.mxu1 }
 0x1a5   : > { %v4917_v35 = vmin.f32 %v3046_v21, 6.0  ;;  %v3047_v31 = vmax.f32 %v2316_v27, 0.0  ;;  %v4919_v37 = vmin.f32 %v3048_v25, 6.0  ;;  %v3049_v38 = vmax.f32 %v2357_v34, 0.0 }
 0x1a6   : > { %v2318_v40 = vpop.f32.mrf.mxu0  ;;  %v2359_v47 = vpop.f32.mrf.mxu1 }
 0x1a7   : > { %v3202_v41 = vsel %vm3146_vm1, %v4917_v35, 0.0  ;;  %v4923_v42 = vmin.f32 %v3047_v31, 6.0  ;;  %v4925_v49 = vmin.f32 %v3049_v38, 6.0  ;;  %v3206_v53 = vsel %vm3146_vm1, %v4919_v37, 0.0 }
 0x1a8   : > { %v3203_v48 = vadd.f32 %v3202_v41, %v3201_v36  ;;  %v2319_v50 = vpop.f32.mrf.mxu0  ;;  %v2360_v52 = vpop.f32.mrf.mxu1 }
 0x1a9   : > { %v3204_v51 = vsel %vm3146_vm1, %v4923_v42, 0.0  ;;  %v3208_v58 = vsel %vm3146_vm1, %v4925_v49, 0.0 }
 0x1aa   : > { %v3205_v57 = vadd.f32 %v3204_v51, %v3203_v48 }
 0x1ac   : > { %v3207_v59 = vadd.f32 %v3206_v53, %v3205_v57 }
 0x1ae   : > { %v2396_v60 = vpop.f32.mrf.mxu0  ;;  %v3209_v1 = vadd.f32 %v3208_v58, %v3207_v59  ;;  %v2437_v5 = vpop.f32.mrf.mxu1 }
 0x1af   : > { %v3050_v4 = vmax.f32 %v2396_v60, 0.0  ;;  %v3052_v8 = vmax.f32 %v2437_v5, 0.0 }
 0x1b0   : > { %3210 = vadd.xlane.f32.xlu0 %v3209_v1  ;;  %v2398_v9 = vpop.f32.mrf.mxu0  ;;  %v2439_v12 = vpop.f32.mrf.mxu1 }
 0x1b1   : > { %v4933_v10 = vmin.f32 %v3050_v4, 6.0  ;;  %v3051_v13 = vmax.f32 %v2398_v9, 0.0  ;;  %v4937_v18 = vmin.f32 %v3052_v8, 6.0  ;;  %v3053_v19 = vmax.f32 %v2439_v12, 0.0 }
 0x1b2   : > { %v2400_v14 = vpop.f32.mrf.mxu0  ;;  %v2441_v24 = vpop.f32.mrf.mxu1 }
 0x1b3   : > { %v3430_v0 = vsel %vm3146_vm1, %v4933_v10, 0.0  ;;  %v4939_v21 = vmin.f32 %v3051_v13, 6.0  ;;  %v3433_v36 = vsel %vm3146_vm1, %v4937_v18, 0.0  ;;  %v4945_v38 = vmin.f32 %v3053_v19, 6.0 }
 0x1b4   : > { %v2401_v25 = vpop.f32.mrf.mxu0  ;;  %v2442_v31 = vpop.f32.mrf.mxu1 }
 0x1b5   : > { %v3431_v27 = vsel %vm3146_vm1, %v4939_v21, 0.0  ;;  %v3435_v47 = vsel %vm3146_vm1, %v4945_v38, 0.0 }
 0x1b6   : > { %v3432_v34 = vadd.f32 %v3431_v27, %v3430_v0 }
 0x1b8   : > { %v3434_v40 = vadd.f32 %v3433_v36, %v3432_v34 }
 0x1ba   : > { %v2478_v41 = vpop.f32.mrf.mxu0  ;;  %v2519_v50 = vpop.f32.mrf.mxu1  ;;  %v3436_v59 = vadd.f32 %v3435_v47, %v3434_v40 }
 0x1bb   : > { %v3054_v48 = vmax.f32 %v2478_v41, 0.0  ;;  %v3056_v51 = vmax.f32 %v2519_v50, 0.0 }
 0x1bc   : > { %v2480_v52 = vpop.f32.mrf.mxu0  ;;  %v2521_v58 = vpop.f32.mrf.mxu1 }
 0x1bd   : > { %v4949_v53 = vmin.f32 %v3054_v48, 6.0  ;;  %v3055_v57 = vmax.f32 %v2480_v52, 0.0  ;;  %v4953_v4 = vmin.f32 %v3056_v51, 6.0  ;;  %v3057_v8 = vmax.f32 %v2521_v58, 0.0 }
 0x1be   : > { %v2482_v60 = vpop.f32.mrf.mxu0  ;;  %v2523_v9 = vpop.f32.mrf.mxu1 }
 0x1bf   : > { %v3437_v1 = vsel %vm3146_vm1, %v4949_v53, 0.0  ;;  %v4955_v5 = vmin.f32 %v3055_v57, 6.0  ;;  %v3441_v24 = vsel %vm3146_vm1, %v4953_v4, 0.0  ;;  %v4961_v25 = vmin.f32 %v3057_v8, 6.0 }
 0x1c0   : > { %v3438_v12 = vadd.f32 %v3437_v1, %v3436_v59  ;;  %v2483_v13 = vpop.f32.mrf.mxu0  ;;  %v2524_v0 = vpop.f32.mrf.mxu1 }
 0x1c1   : > { %v3439_v14 = vsel %vm3146_vm1, %v4955_v5, 0.0  ;;  %v3443_v34 = vsel %vm3146_vm1, %v4961_v25, 0.0 }
 0x1c2   : > { %v3440_v19 = vadd.f32 %v3439_v14, %v3438_v12 }
 0x1c4   : > { %v3442_v27 = vadd.f32 %v3441_v24, %v3440_v19 }
 0x1c6   : > { %v2560_v31 = vpop.f32.mrf.mxu0  ;;  %v2601_v40 = vpop.f32.mrf.mxu1  ;;  %v3444_v52 = vadd.f32 %v3443_v34, %v3442_v27 }
 0x1c7   : > { %v3058_v36 = vmax.f32 %v2560_v31, 0.0  ;;  %v3060_v41 = vmax.f32 %v2601_v40, 0.0 }
 0x1c8   : > { %v2562_v47 = vpop.f32.mrf.mxu0  ;;  %v2603_v51 = vpop.f32.mrf.mxu1 }
 0x1c9   : > { %v4965_v48 = vmin.f32 %v3058_v36, 6.0  ;;  %v3059_v50 = vmax.f32 %v2562_v47, 0.0  ;;  %v4969_v59 = vmin.f32 %v3060_v41, 6.0  ;;  %v3061_v1 = vmax.f32 %v2603_v51, 0.0 }
 0x1ca   : > { %v2564_v57 = vpop.f32.mrf.mxu0  ;;  %v2605_v8 = vpop.f32.mrf.mxu1 }
 0x1cb   : > { %v3445_v58 = vsel %vm3146_vm1, %v4965_v48, 0.0  ;;  %v4971_v60 = vmin.f32 %v3059_v50, 6.0  ;;  %v3449_v19 = vsel %vm3146_vm1, %v4969_v59, 0.0  ;;  %v4977_v24 = vmin.f32 %v3061_v1, 6.0 }
 0x1cc   : > { %v3446_v9 = vadd.f32 %v3445_v58, %v3444_v52  ;;  %v2565_v12 = vpop.f32.mrf.mxu0  ;;  %v2606_v14 = vpop.f32.mrf.mxu1 }
 0x1cd   : > { %v3447_v13 = vsel %vm3146_vm1, %v4971_v60, 0.0  ;;  %v3451_v34 = vsel %vm3146_vm1, %v4977_v24, 0.0 }
 0x1ce   : > { %v3448_v0 = vadd.f32 %v3447_v13, %v3446_v9 }
 0x1d0   : > { %v3450_v27 = vadd.f32 %v3449_v19, %v3448_v0 }
 0x1d2   : > { %v2642_v31 = vpop.f32.mrf.mxu0  ;;  %v2683_v40 = vpop.f32.mrf.mxu1  ;;  %v3452_v57 = vadd.f32 %v3451_v34, %v3450_v27 }
 0x1d3   : > { %v3062_v36 = vmax.f32 %v2642_v31, 0.0  ;;  %v3064_v41 = vmax.f32 %v2683_v40, 0.0 }
 0x1d4   : > { %v2644_v47 = vpop.f32.mrf.mxu0  ;;  %v2685_v52 = vpop.f32.mrf.mxu1 }
 0x1d5   : > { %v4981_v50 = vmin.f32 %v3062_v36, 6.0  ;;  %v3063_v51 = vmax.f32 %v2644_v47, 0.0  ;;  %v4985_v1 = vmin.f32 %v3064_v41, 6.0  ;;  %v3065_v12 = vmax.f32 %v2685_v52, 0.0 }
 0x1d6   : > { %v2646_v58 = vpop.f32.mrf.mxu0  ;;  %v2687_v13 = vpop.f32.mrf.mxu1 }
 0x1d7   : > { %v3453_v8 = vsel %vm3146_vm1, %v4981_v50, 0.0  ;;  %5283 = vst [vmem:[#allocation3_spill] sm:$0xff] %v4985_v1  ;;  %v4987_v9 = vmin.f32 %v3063_v51, 6.0  ;;  %v3457_v27 = vsel %vm3146_vm1, %v4985_v1, 0.0  ;;  %v4993_v34 = vmin.f32 %v3065_v12, 6.0 }
 0x1d8   : > { %v3454_v14 = vadd.f32 %v3453_v8, %v3452_v57  ;;  %v2647_v0 = vpop.f32.mrf.mxu0  ;;  %v2688_v31 = vpop.f32.mrf.mxu1 }
 0x1d9   : > { %5284 = vst [vmem:[#allocation4_spill] sm:$0xff] %v4987_v9  ;;  %v3455_v19 = vsel %vm3146_vm1, %v4987_v9, 0.0  ;;  %5285 = vst [vmem:[#allocation5_spill] sm:$0xff] %v4993_v34  ;;  %v3459_v41 = vsel %vm3146_vm1, %v4993_v34, 0.0 }
 0x1da   : > { %v3456_v36 = vadd.f32 %v3455_v19, %v3454_v14 }
 0x1dc   : > { %v3458_v40 = vadd.f32 %v3457_v27, %v3456_v36 }
 0x1de   : > { %v2724_v47 = vpop.f32.mrf.mxu0  ;;  %v2765_v52 = vpop.f32.mrf.mxu1  ;;  %v3460_v31 = vadd.f32 %v3459_v41, %v3458_v40 }
 0x1df   : > { %v3066_v51 = vmax.f32 %v2724_v47, 0.0  ;;  %v3068_v58 = vmax.f32 %v2765_v52, 0.0 }
 0x1e0   : > { %v2726_v57 = vpop.f32.mrf.mxu0  ;;  %v2767_v0 = vpop.f32.mrf.mxu1 }
 0x1e1   : > { %v4997_v8 = vmin.f32 %v3066_v51, 6.0  ;;  %v3067_v13 = vmax.f32 %v2726_v57, 0.0  ;;  %v5001_v12 = vmin.f32 %v3068_v58, 6.0  ;;  %v3069_v27 = vmax.f32 %v2767_v0, 0.0 }
 0x1e2   : > { %v2728_v14 = vpop.f32.mrf.mxu0  ;;  %v2769_v1 = vpop.f32.mrf.mxu1 }
 0x1e3   : > { %5286 = vst [vmem:[#allocation6_spill] sm:$0xff] %v4997_v8  ;;  %v3461_v19 = vsel %vm3146_vm1, %v4997_v8, 0.0  ;;  %5287 = vst [vmem:[#allocation7_spill] sm:$0xff] %v5001_v12  ;;  %v5003_v36 = vmin.f32 %v3067_v13, 6.0  ;;  %v3465_v40 = vsel %vm3146_vm1, %v5001_v12, 0.0  ;;  %v5009_v41 = vmin.f32 %v3069_v27, 6.0 }
 0x1e4   : > { %v3462_v34 = vadd.f32 %v3461_v19, %v3460_v31  ;;  %v2729_v47 = vpop.f32.mrf.mxu0  ;;  %v2770_v51 = vpop.f32.mrf.mxu1 }
 0x1e5   : > { %5288 = vst [vmem:[#allocation8_spill] sm:$0xff] %v5003_v36  ;;  %v3463_v52 = vsel %vm3146_vm1, %v5003_v36, 0.0  ;;  %5289 = vst [vmem:[#allocation9_spill] sm:$0xff] %v5009_v41  ;;  %v3467_v58 = vsel %vm3146_vm1, %v5009_v41, 0.0 }
 0x1e6   : > { %v3464_v9 = vadd.f32 %v3463_v52, %v3462_v34 }
 0x1e8   : > { %v3466_v57 = vadd.f32 %v3465_v40, %v3464_v9 }
 0x1ea   : > { %v2806_v14 = vpop.f32.mrf.mxu0  ;;  %v2847_v0 = vpop.f32.mrf.mxu1  ;;  %v3468_v51 = vadd.f32 %v3467_v58, %v3466_v57 }
 0x1eb   : > { %v3070_v13 = vmax.f32 %v2806_v14, 0.0  ;;  %v3072_v1 = vmax.f32 %v2847_v0, 0.0 }
 0x1ec   : > { %v2808_v31 = vpop.f32.mrf.mxu0  ;;  %v2849_v36 = vpop.f32.mrf.mxu1 }
 0x1ed   : > { %v5013_v19 = vmin.f32 %v3070_v13, 6.0  ;;  %v3071_v47 = vmax.f32 %v2808_v31, 0.0  ;;  %v5017_v27 = vmin.f32 %v3072_v1, 6.0  ;;  %v3073_v40 = vmax.f32 %v2849_v36, 0.0 }
 0x1ee   : > { %v2810_v34 = vpop.f32.mrf.mxu0  ;;  %v2851_v12 = vpop.f32.mrf.mxu1 }
 0x1ef   : > { %5290 = vst [vmem:[#allocation10_spill] sm:$0xff] %v5013_v19  ;;  %v3469_v52 = vsel %vm3146_vm1, %v5013_v19, 0.0  ;;  %5291 = vst [vmem:[#allocation11_spill] sm:$0xff] %v5017_v27  ;;  %v5019_v9 = vmin.f32 %v3071_v47, 6.0  ;;  %v3473_v57 = vsel %vm3146_vm1, %v5017_v27, 0.0  ;;  %v5025_v58 = vmin.f32 %v3073_v40, 6.0 }
 0x1f0   : > { %v3470_v41 = vadd.f32 %v3469_v52, %v3468_v51  ;;  %v2811_v14 = vpop.f32.mrf.mxu0  ;;  %v2852_v13 = vpop.f32.mrf.mxu1 }
 0x1f1   : > { %5292 = vst [vmem:[#allocation12_spill] sm:$0xff] %v5019_v9  ;;  %v3471_v0 = vsel %vm3146_vm1, %v5019_v9, 0.0  ;;  %5293 = vst [vmem:[#allocation13_spill] sm:$0xff] %v5025_v58  ;;  %v3475_v1 = vsel %vm3146_vm1, %v5025_v58, 0.0 }
 0x1f2   : > { %v3472_v8 = vadd.f32 %v3471_v0, %v3470_v41 }
 0x1f4   : > { %v3474_v31 = vadd.f32 %v3473_v57, %v3472_v8 }
 0x1f6   : > { %v2888_v34 = vpop.f32.mrf.mxu0  ;;  %v2929_v36 = vpop.f32.mrf.mxu1  ;;  %v3476_v13 = vadd.f32 %v3475_v1, %v3474_v31 }
 0x1f7   : > { %v3074_v47 = vmax.f32 %v2888_v34, 0.0  ;;  %v3076_v12 = vmax.f32 %v2929_v36, 0.0 }
 0x1f8   : > { %v2890_v51 = vpop.f32.mrf.mxu0  ;;  %v2931_v9 = vpop.f32.mrf.mxu1 }
 0x1f9   : > { %v5029_v52 = vmin.f32 %v3074_v47, 6.0  ;;  %v3075_v14 = vmax.f32 %v2890_v51, 0.0  ;;  %v5033_v40 = vmin.f32 %v3076_v12, 6.0  ;;  %v3077_v57 = vmax.f32 %v2931_v9, 0.0 }
 0x1fa   : > { %v2892_v41 = vpop.f32.mrf.mxu0  ;;  %v2933_v27 = vpop.f32.mrf.mxu1 }
 0x1fb   : > { %v3477_v0 = vsel %vm3146_vm1, %v5029_v52, 0.0  ;;  %5294 = vst [vmem:[#allocation14_spill] sm:$0xff] %v5033_v40  ;;  %v5035_v8 = vmin.f32 %v3075_v14, 6.0  ;;  %v3481_v31 = vsel %vm3146_vm1, %v5033_v40, 0.0  ;;  %v5041_v1 = vmin.f32 %v3077_v57, 6.0 }
 0x1fc   : > { %v3478_v58 = vadd.f32 %v3477_v0, %v3476_v13  ;;  %v2893_v34 = vpop.f32.mrf.mxu0  ;;  %v2934_v47 = vpop.f32.mrf.mxu1 }
 0x1fd   : > { %5295 = vst [vmem:[#allocation15_spill] sm:$0xff] %v5035_v8  ;;  %v3479_v36 = vsel %vm3146_vm1, %v5035_v8, 0.0  ;;  %5296 = vst [vmem:[#allocation16_spill] sm:$0xff] %v5041_v1  ;;  %v3483_v12 = vsel %vm3146_vm1, %v5041_v1, 0.0 }
 0x1fe   : > { %v3480_v19 = vadd.f32 %v3479_v36, %v3478_v58 }
 0x200   : > { %v3482_v51 = vadd.f32 %v3481_v31, %v3480_v19 }
 0x202   : > { %v2970_v41 = vpop.f32.mrf.mxu0  ;;  %v3011_v9 = vpop.f32.mrf.mxu1  ;;  %v3484_v47 = vadd.f32 %v3483_v12, %v3482_v51 }
 0x203   : > { %v3078_v14 = vmax.f32 %v2970_v41, 0.0  ;;  %v3080_v27 = vmax.f32 %v3011_v9, 0.0 }
 0x204   : > { %v2972_v13 = vpop.f32.mrf.mxu0  ;;  %v3013_v8 = vpop.f32.mrf.mxu1 }
 0x205   : > { %v5045_v0 = vmin.f32 %v3078_v14, 6.0  ;;  %v3079_v34 = vmax.f32 %v2972_v13, 0.0  ;;  %v5047_v58 = vmin.f32 %v3080_v27, 6.0  ;;  %v3081_v36 = vmax.f32 %v3013_v8, 0.0 }
 0x206   : > { %v2974_v40 = vpop.f32.mrf.mxu0  ;;  %v3015_v31 = vpop.f32.mrf.mxu1 }
 0x207   : > { %5297 = vst [vmem:[#allocation17_spill] sm:$0xff] %v5045_v0  ;;  %5298 = vst [vmem:[#allocation18_spill] sm:$0xff] %v5047_v58  ;;  %v3485_v19 = vsel %vm3146_vm1, %v5045_v0, 0.0  ;;  %v5051_v57 = vmin.f32 %v3079_v34, 6.0  ;;  %v3489_v14 = vsel %vm3146_vm1, %v5047_v58, 0.0  ;;  %v5057_v51 = vmin.f32 %v3081_v36, 6.0 }
 0x208   : > { %v3486_v1 = vadd.f32 %v3485_v19, %v3484_v47  ;;  %v2975_v41 = vpop.f32.mrf.mxu0  ;;  %v3016_v12 = vpop.f32.mrf.mxu1  ;;  %v4064_v34 = vmov 1983009808   ;;  %v3283_v19 = vlaneseq }
 0x209   : > { %v3487_v9 = vsel %vm3146_vm1, %v5051_v57, 0.0  ;;  %v3491_v27 = vsel %vm3146_vm1, %v5057_v51, 0.0  ;;  %v3281_v47 = vunpack.c.l.s4 %v4064_v34 }
 0x20a   : > { %v3488_v8 = vadd.f32 %v3487_v9, %v3486_v1  ;;  %v3284_v41 = vshrl.u32 %v3283_v19, 7 }
 0x20b   : > { %v3282_v31 = vunpack.c.0.s8 %v3281_v47 }
 0x20c   : > { %v3490_v40 = vadd.f32 %v3489_v14, %v3488_v8 }
 0x20d   : > { %v5065_v36 = vsub.s32 %v3282_v31, %v3284_v41 }
 0x20e   : > { %v3492_v13 = vadd.f32 %v3491_v27, %v3490_v40 }
 0x210   : > { %3493 = vadd.xlane.f32.xlu0 %v3492_v13 }
 0x239   : > { %v3211_v58 = vpop.xlane.xlu0 %3210 }
 0x23a   : > { %v5063_v0 = vmul.f32 0.00024414063, %v3211_v58 }
 0x23c   : > { %v3214_v1 = vsub.f32 %v4805_v17, %v5063_v0  ;;  %v3215_v14 = vsub.f32 %v4811_v23, %v5063_v0  ;;  %v3216_v9 = vsub.f32 %v4809_v22, %v5063_v0  ;;  %v3217_v12 = vsub.f32 %v4817_v30, %v5063_v0 }
 0x23d   : > { %v3218_v8 = vsub.f32 %v4821_v39, %v5063_v0  ;;  %v3219_v58 = vsub.f32 %v4827_v46, %v5063_v0  ;;  %v3220_v40 = vsub.f32 %v4825_v45, %v5063_v0  ;;  %v3221_v17 = vsub.f32 %v4833_v55, %v5063_v0 }
 0x23e   : > { %v3222_v23 = vsub.f32 %v4837_v63, %v5063_v0  ;;  %v3223_v22 = vsub.f32 %v4843_v7, %v5063_v0  ;;  %v3224_v30 = vsub.f32 %v4841_v6, %v5063_v0  ;;  %v3225_v39 = vsub.f32 %v4849_v16, %v5063_v0 }
 0x23f   : > { %v3226_v46 = vsub.f32 %v4853_v26, %v5063_v0  ;;  %v3227_v45 = vsub.f32 %v4859_v33, %v5063_v0  ;;  %v3228_v55 = vsub.f32 %v4857_v32, %v5063_v0  ;;  %v3229_v63 = vsub.f32 %v4865_v44, %v5063_v0 }
 0x240   : > { %v3230_v6 = vsub.f32 %v4869_v54, %v5063_v0  ;;  %v3231_v7 = vsub.f32 %v4875_v62, %v5063_v0  ;;  %v3232_v16 = vsub.f32 %v4873_v61, %v5063_v0  ;;  %v3233_v26 = vsub.f32 %v4881_v11, %v5063_v0 }
 0x241   : > { %v3234_v32 = vsub.f32 %v4885_v20, %v5063_v0  ;;  %v3235_v33 = vsub.f32 %v4891_v29, %v5063_v0  ;;  %v3236_v44 = vsub.f32 %v4889_v28, %v5063_v0  ;;  %v3237_v54 = vsub.f32 %v4897_v43, %v5063_v0 }
 0x242   : > { %v3238_v62 = vsub.f32 %v4901_v56, %v5063_v0  ;;  %v3239_v61 = vsub.f32 %v4907_v3, %v5063_v0  ;;  %v3240_v11 = vsub.f32 %v4905_v2, %v5063_v0  ;;  %v3241_v20 = vsub.f32 %v4913_v15, %v5063_v0 }
 0x243   : > { %v3242_v29 = vsub.f32 %v4917_v35, %v5063_v0  ;;  %v3243_v28 = vsub.f32 %v4923_v42, %v5063_v0  ;;  %v3244_v43 = vsub.f32 %v4919_v37, %v5063_v0  ;;  %v3245_v56 = vsub.f32 %v4925_v49, %v5063_v0 }
 0x244   : > { %v3278_v3 = vcombine.low %v3214_v1, %v3215_v14  ;;  %v3279_v27 = vcombine.low %v3216_v9, %v3217_v12  ;;  %v3295_v13 = vcombine.low %v3218_v8, %v3219_v58  ;;  %v3296_v2 = vcombine.low %v3220_v40, %v3221_v17 }
 0x245   : > { %v3312_v34 = vcombine.low %v3222_v23, %v3223_v22  ;;  %v3313_v47 = vcombine.low %v3224_v30, %v3225_v39  ;;  %v3329_v15 = vcombine.low %v3226_v46, %v3227_v45  ;;  %v3330_v19 = vcombine.low %v3228_v55, %v3229_v63 }
 0x246   : > { %v3286_v35 = vrot.slane %v3278_v3, %v5065_v36  ;;  %v3293_v31 = vrot.slane %v3279_v27, %v5065_v36  ;;  %v3303_v42 = vrot.slane %v3295_v13, %v5065_v36  ;;  %v3310_v37 = vrot.slane %v3296_v2, %v5065_v36 }
 0x247   : > { %v3320_v49 = vrot.slane %v3312_v34, %v5065_v36  ;;  %v3327_v0 = vrot.slane %v3313_v47, %v5065_v36  ;;  %v3337_v41 = vrot.slane %v3329_v15, %v5065_v36  ;;  %v3344_v1 = vrot.slane %v3330_v19, %v5065_v36 }
 0x248   : > { %v3294_v14 = vcombine.low %v3286_v35, %v3293_v31  ;;  %v3311_v9 = vcombine.low %v3303_v42, %v3310_v37  ;;  %v3346_v12 = vcombine.low %v3230_v6, %v3231_v7  ;;  %v3347_v8 = vcombine.low %v3232_v16, %v3233_v26  ;;  %v5306_v31 = vld [vmem:[#allocation10_spill] sm:$0xff]  ;;  %v5307_v37 = vld [vmem:[#allocation12_spill] sm:$0xff] }
 0x249   : > { %v3328_v58 = vcombine.low %v3320_v49, %v3327_v0  ;;  %v3345_v40 = vcombine.low %v3337_v41, %v3344_v1  ;;  %v3363_v17 = vcombine.low %v3234_v32, %v3235_v33  ;;  %v3364_v23 = vcombine.low %v3236_v44, %v3237_v54  ;;  %v5308_v0 = vld [vmem:[#allocation11_spill] sm:$0xff]  ;;  %v5309_v1 = vld [vmem:[#allocation13_spill] sm:$0xff] }
 0x24a   : > { %v3354_v22 = vrot.slane %v3346_v12, %v5065_v36  ;;  %v3361_v30 = vrot.slane %v3347_v8, %v5065_v36  ;;  %v3380_v39 = vcombine.low %v3238_v62, %v3239_v61  ;;  %v3381_v46 = vcombine.low %v3240_v11, %v3241_v20  ;;  %3422 = vst [vmem:[%s5142_s7] sm:$0xff] %v3294_v14  ;;  %v5310_v12 = vld [vmem:[#allocation15_spill] sm:$0xff] }
 0x24b   : > { %3423 = vst [vmem:[%s5142_s7 + $0x8] sm:$0xff] %v3311_v9  ;;  %v3371_v45 = vrot.slane %v3363_v17, %v5065_v36  ;;  %v3378_v55 = vrot.slane %v3364_v23, %v5065_v36  ;;  %v3397_v63 = vcombine.low %v3242_v29, %v3243_v28  ;;  %v3398_v6 = vcombine.low %v3244_v43, %v3245_v56  ;;  %v5312_v17 = vld [vmem:[#allocation16_spill] sm:$0xff] }
 0x24c   : > { %3424 = vst [vmem:[%s5142_s7 + $0x10] sm:$0xff] %v3328_v58  ;;  %3425 = vst [vmem:[%s5142_s7 + $0x18] sm:$0xff] %v3345_v40  ;;  %v3362_v7 = vcombine.low %v3354_v22, %v3361_v30  ;;  %v3388_v16 = vrot.slane %v3380_v39, %v5065_v36  ;;  %v3395_v26 = vrot.slane %v3381_v46, %v5065_v36  ;;  %v5311_v58 = vld [vmem:[#allocation14_spill] sm:$0xff]  ;;  %v5313_v22 = vld [vmem:[#allocation17_spill] sm:$0xff] }
 0x24d   : > { %v3379_v32 = vcombine.low %v3371_v45, %v3378_v55  ;;  %v3405_v33 = vrot.slane %v3397_v63, %v5065_v36  ;;  %v3412_v44 = vrot.slane %v3398_v6, %v5065_v36  ;;  %v5314_v46 = vld [vmem:[#allocation18_spill] sm:$0xff] }
 0x24e   : > { %v3396_v54 = vcombine.low %v3388_v16, %v3395_v26  ;;  %3426 = vst [vmem:[%s5142_s7 + $0x20] sm:$0xff] %v3362_v7 }
 0x24f   : > { %v3413_v62 = vcombine.low %v3405_v33, %v3412_v44  ;;  %3427 = vst [vmem:[%s5142_s7 + $0x28] sm:$0xff] %v3379_v32 }
 0x250   : > { %3428 = vst [vmem:[%s5142_s7 + $0x30] sm:$0xff] %v3396_v54 }
 0x251   : > { %3429 = vst [vmem:[%s5142_s7 + $0x38] sm:$0xff] %v3413_v62 }
 0x299   : > { %v3494_v61 = vpop.xlane.xlu0 %3493 }
 0x29a   : > { %v5164_v11 = vmul.f32 0.00024414063, %v3494_v61 }
 0x29c   : > { %v3496_v20 = vsub.f32 %v4933_v10, %v5164_v11  ;;  %v3497_v29 = vsub.f32 %v4939_v21, %v5164_v11  ;;  %v3498_v28 = vsub.f32 %v4937_v18, %v5164_v11  ;;  %v3499_v43 = vsub.f32 %v4945_v38, %v5164_v11 }
 0x29d   : > { %v3500_v56 = vsub.f32 %v4949_v53, %v5164_v11  ;;  %v3501_v3 = vsub.f32 %v4955_v5, %v5164_v11  ;;  %v3502_v27 = vsub.f32 %v4953_v4, %v5164_v11  ;;  %v3503_v10 = vsub.f32 %v4961_v25, %v5164_v11  ;;  %v5299_v4 = vld [vmem:[#allocation4_spill] sm:$0xff]  ;;  %v5300_v25 = vld [vmem:[#allocation3_spill] sm:$0xff] }
 0x29e   : > { %v3504_v21 = vsub.f32 %v4965_v48, %v5164_v11  ;;  %v3505_v18 = vsub.f32 %v4971_v60, %v5164_v11  ;;  %v3506_v38 = vsub.f32 %v4969_v59, %v5164_v11  ;;  %v3507_v53 = vsub.f32 %v4977_v24, %v5164_v11  ;;  %v5301_v48 = vld [vmem:[#allocation5_spill] sm:$0xff]  ;;  %v5302_v60 = vld [vmem:[#allocation6_spill] sm:$0xff]  ;;  %v5303_v59 = vld [vmem:[#allocation8_spill] sm:$0xff] }
 0x29f   : > { %v3508_v5 = vsub.f32 %v4981_v50, %v5164_v11  ;;  %v3509_v13 = vsub.f32 %v5299_v4, %v5164_v11  ;;  %v3510_v2 = vsub.f32 %v5300_v25, %v5164_v11  ;;  %v3511_v34 = vsub.f32 %v5301_v48, %v5164_v11  ;;  %v5304_v24 = vld [vmem:[#allocation7_spill] sm:$0xff]  ;;  %v5305_v50 = vld [vmem:[#allocation9_spill] sm:$0xff] }
 0x2a0   : > { %v3512_v47 = vsub.f32 %v5302_v60, %v5164_v11  ;;  %v3513_v15 = vsub.f32 %v5303_v59, %v5164_v11  ;;  %v3514_v19 = vsub.f32 %v5304_v24, %v5164_v11  ;;  %v3515_v35 = vsub.f32 %v5305_v50, %v5164_v11 }
 0x2a1   : > { %v3516_v42 = vsub.f32 %v5306_v31, %v5164_v11  ;;  %v3517_v49 = vsub.f32 %v5307_v37, %v5164_v11  ;;  %v3518_v41 = vsub.f32 %v5308_v0, %v5164_v11  ;;  %v3519_v14 = vsub.f32 %v5309_v1, %v5164_v11 }
 0x2a2   : > { %v3520_v9 = vsub.f32 %v5029_v52, %v5164_v11  ;;  %v3521_v8 = vsub.f32 %v5310_v12, %v5164_v11  ;;  %v3522_v40 = vsub.f32 %v5311_v58, %v5164_v11  ;;  %v3523_v23 = vsub.f32 %v5312_v17, %v5164_v11 }
 0x2a3   : > { %v3524_v30 = vsub.f32 %v5313_v22, %v5164_v11  ;;  %v3525_v39 = vsub.f32 %v5051_v57, %v5164_v11  ;;  %v3526_v45 = vsub.f32 %v5314_v46, %v5164_v11  ;;  %v3527_v52 = vsub.f32 %v5057_v51, %v5164_v11 }
 0x2a4   : > { %v3560_v55 = vcombine.low %v3496_v20, %v3497_v29  ;;  %v3561_v63 = vcombine.low %v3498_v28, %v3499_v43  ;;  %v3577_v6 = vcombine.low %v3500_v56, %v3501_v3  ;;  %v3578_v7 = vcombine.low %v3502_v27, %v3503_v10 }
 0x2a5   : > { %v3594_v16 = vcombine.low %v3504_v21, %v3505_v18  ;;  %v3595_v26 = vcombine.low %v3506_v38, %v3507_v53  ;;  %v3611_v32 = vcombine.low %v3508_v5, %v3509_v13  ;;  %v3612_v33 = vcombine.low %v3510_v2, %v3511_v34 }
 0x2a6   : > { %v3568_v44 = vrot.slane %v3560_v55, %v5065_v36  ;;  %v3575_v54 = vrot.slane %v3561_v63, %v5065_v36  ;;  %v3585_v57 = vrot.slane %v3577_v6, %v5065_v36  ;;  %v3592_v62 = vrot.slane %v3578_v7, %v5065_v36 }
 0x2a7   : > { %v3602_v61 = vrot.slane %v3594_v16, %v5065_v36  ;;  %v3609_v51 = vrot.slane %v3595_v26, %v5065_v36  ;;  %v3619_v11 = vrot.slane %v3611_v32, %v5065_v36  ;;  %v3626_v20 = vrot.slane %v3612_v33, %v5065_v36 }
 0x2a8   : > { %v3576_v29 = vcombine.low %v3568_v44, %v3575_v54  ;;  %v3593_v28 = vcombine.low %v3585_v57, %v3592_v62  ;;  %v3628_v43 = vcombine.low %v3512_v47, %v3513_v15  ;;  %v3629_v56 = vcombine.low %v3514_v19, %v3515_v35 }
 0x2a9   : > { %v3610_v3 = vcombine.low %v3602_v61, %v3609_v51  ;;  %v3627_v27 = vcombine.low %v3619_v11, %v3626_v20  ;;  %v3645_v10 = vcombine.low %v3516_v42, %v3517_v49  ;;  %v3646_v21 = vcombine.low %v3518_v41, %v3519_v14 }
 0x2aa   : > { %v3636_v18 = vrot.slane %v3628_v43, %v5065_v36  ;;  %v3643_v38 = vrot.slane %v3629_v56, %v5065_v36  ;;  %v3662_v53 = vcombine.low %v3520_v9, %v3521_v8  ;;  %v3663_v5 = vcombine.low %v3522_v40, %v3523_v23  ;;  %3704 = vst [vmem:[%s5142_s7 + $0x40] sm:$0xff] %v3576_v29 }
 0x2ab   : > { %3705 = vst [vmem:[%s5142_s7 + $0x48] sm:$0xff] %v3593_v28  ;;  %v3653_v4 = vrot.slane %v3645_v10, %v5065_v36  ;;  %v3660_v13 = vrot.slane %v3646_v21, %v5065_v36  ;;  %v3679_v25 = vcombine.low %v3524_v30, %v3525_v39  ;;  %v3680_v2 = vcombine.low %v3526_v45, %v3527_v52 }
 0x2ac   : > { %3706 = vst [vmem:[%s5142_s7 + $0x50] sm:$0xff] %v3610_v3  ;;  %3707 = vst [vmem:[%s5142_s7 + $0x58] sm:$0xff] %v3627_v27  ;;  %v3644_v48 = vcombine.low %v3636_v18, %v3643_v38  ;;  %v3670_v34 = vrot.slane %v3662_v53, %v5065_v36  ;;  %v3677_v60 = vrot.slane %v3663_v5, %v5065_v36 }
 0x2ad   : > { %v3661_v47 = vcombine.low %v3653_v4, %v3660_v13  ;;  %v3687_v59 = vrot.slane %v3679_v25, %v5065_v36  ;;  %v3694_v15 = vrot.slane %v3680_v2, %v5065_v36 }
 0x2ae   : > { %v3678_v24 = vcombine.low %v3670_v34, %v3677_v60  ;;  %3708 = vst [vmem:[%s5142_s7 + $0x60] sm:$0xff] %v3644_v48 }
 0x2af   : > { %v3695_v19 = vcombine.low %v3687_v59, %v3694_v15  ;;  %3709 = vst [vmem:[%s5142_s7 + $0x68] sm:$0xff] %v3661_v47 }
 0x2b0   : > { %3710 = vst [vmem:[%s5142_s7 + $0x70] sm:$0xff] %v3678_v24 }
 0x2b1   : > { %3711 = vst [vmem:[%s5142_s7 + $0x78] sm:$0xff] %v3695_v19 }
 0x2b2 PF: > { %p9_p9 = scmp.ge.s32.totalorder %s4097_s13, 4   ;;  %s5315_s9 = smov %s4057_s10 }
 0x2b3   : > { %s5316_s10 = smov %s4106_s16  ;;  %s5317_s11 = smov %s4097_s13 }
 0x2b4   :  { %11 = sbr.rel (!%p9_p9) target bundleno = 2 (0x2), region = 86 }

// kernel: gnet_forward.5
= control target key start
LH: loop header
LB: loop body
LE: loop exit
PB: predicated region body
PF: predicated region fallthrough
CT: control target
= control target key end

     0   :  { %s1061_s9 = smov 0   ;;  %s1063_s10 = smov 0   ;;  %s1308_s0 = inlined_call_operand.vmem [shape: bf16[4,32], index: 0, kind: input, shape index: {}]   ;;  %s1309_s1 = inlined_call_operand.vmem [shape: bf16[32,4096], index: 1, kind: input, shape index: {}]   ;;  %s1310_s2 = inlined_call_operand.vmem [shape: f32[4,4096], index: 2, kind: output, shape index: {}]  }
   0x1   :  { %s1065_s11 = smov 0  }
   0x2 LB: > { %s942_s12 = sadd.s32 4294967295, %s1043_s11   ;;  %s1078_s13 = sadd.s32 1, %s1043_s11   ;;  %s1043_s11 = sphi %s1065_s11, %s1313_s11   ;;  %s1039_s10 = sphi %s1063_s10, %s1312_s10   ;;  %s1035_s9 = sphi %s1061_s9, %s1311_s9  }
   0x3   : > { %s37_s14 = ssub.s32 %s1043_s11, %s1078_s13  ;;  %s40_s15 = sadd.s32 1, %s1039_s10 }
   0x4   : > { %p38_p0 = scmp.eq.s32.totalorder %s37_s14, 0  ;;  %p47_p1 = scmp.ne.s32.totalorder %s1039_s10, %s1035_s9 }
   0x5   : > { %p48_p2 = scmp.eq.s32.totalorder %s1043_s11, 0  ;;  %p945_p4 = scmp.ge.s32.totalorder %s1043_s11, 2 }
   0x6   : > { %s1087_s16 = scalar_select %p38_p0, %s1039_s10, %s40_s15  }
   0x7   : > { %p49_p3 = por %p48_p2, %p47_p1  ;;  %102 = sbr.rel (%p945_p4) target bundleno = 32 (0x20), region = 20 }
   0xc   : > { %105 = sbr.rel (!%p49_p3) target bundleno = 32 (0x20), region = 24  ;;  %s107_s17 = sand.u32 (%p49_p3), 1, %s1039_s10  }
   0xd   : > { %s995_s18 = sshll.u32 (%p49_p3), %s1043_s11, 6  ;;  %s946_s19 = sshll.u32 (%p49_p3), %s107_s17, 8 }
   0xe   : > { %s1095_s22 = scalar_lea.vmem (%p49_p3), %s1309_s1, %s995_s18  ;;  %s1100_s23 = scalar_lea.vmem (%p49_p3), [#allocation2], %s946_s19 }
   0xf   : > { %v125_v0 = vld [vmem:[%s1095_s22] sm:$0xff] (%p49_p3)  ;;  %v127_v1 = vld [vmem:[%s1095_s22 + $0x8] sm:$0xff] (%p49_p3)  ;;  %v129_v2 = vld [vmem:[%s1095_s22 + $0x10] sm:$0xff] (%p49_p3) }
  0x10   : > { %126 = vst [vmem:[%s1100_s23] sm:$0xff] (%p49_p3), %v125_v0  ;;  %128 = vst [vmem:[%s1100_s23 + $0x8] sm:$0xff] (%p49_p3), %v127_v1  ;;  %v131_v3 = vld [vmem:[%s1095_s22 + $0x18] sm:$0xff] (%p49_p3)  ;;  %v133_v4 = vld [vmem:[%s1095_s22 + $0x20] sm:$0xff] (%p49_p3) }
  0x11   : > { %130 = vst [vmem:[%s1100_s23 + $0x10] sm:$0xff] %v129_v2  ;;  %v135_v5 = vld [vmem:[%s1095_s22 + $0x28] sm:$0xff]  ;;  %132 = vst [vmem:[%s1100_s23 + $0x18] sm:$0xff] %v131_v3  ;;  %v137_v6 = vld [vmem:[%s1095_s22 + $0x30] sm:$0xff] }
  0x12   : > { %134 = vst [vmem:[%s1100_s23 + $0x20] sm:$0xff] %v133_v4  ;;  %136 = vst [vmem:[%s1100_s23 + $0x28] sm:$0xff] %v135_v5  ;;  %v139_v7 = vld [vmem:[%s1095_s22 + $0x38] sm:$0xff]  ;;  %v141_v8 = vld [vmem:[%s1095_s22 + $0x80] sm:$0xff] }
  0x13   : > { %138 = vst [vmem:[%s1100_s23 + $0x30] sm:$0xff] %v137_v6  ;;  %140 = vst [vmem:[%s1100_s23 + $0x38] sm:$0xff] %v139_v7  ;;  %v143_v9 = vld [vmem:[%s1095_s22 + $0x88] sm:$0xff]  ;;  %v145_v10 = vld [vmem:[%s1095_s22 + $0x90] sm:$0xff] }
  0x14   : > { %142 = vst [vmem:[%s1100_s23 + $0x40] sm:$0xff] %v141_v8  ;;  %v147_v11 = vld [vmem:[%s1095_s22 + $0x98] sm:$0xff]  ;;  %144 = vst [vmem:[%s1100_s23 + $0x48] sm:$0xff] %v143_v9  ;;  %v149_v12 = vld [vmem:[%s1095_s22 + $0xa0] sm:$0xff] }
  0x15   : > { %146 = vst [vmem:[%s1100_s23 + $0x50] sm:$0xff] %v145_v10  ;;  %148 = vst [vmem:[%s1100_s23 + $0x58] sm:$0xff] %v147_v11  ;;  %v151_v13 = vld [vmem:[%s1095_s22 + $0xa8] sm:$0xff]  ;;  %v153_v14 = vld [vmem:[%s1095_s22 + $0xb0] sm:$0xff] }
  0x16   : > { %150 = vst [vmem:[%s1100_s23 + $0x60] sm:$0xff] %v149_v12  ;;  %152 = vst [vmem:[%s1100_s23 + $0x68] sm:$0xff] %v151_v13  ;;  %v155_v15 = vld [vmem:[%s1095_s22 + $0xb8] sm:$0xff]  ;;  %v157_v16 = vld [vmem:[%s1095_s22 + $0x100] sm:$0xff] }
  0x17   : > { %154 = vst [vmem:[%s1100_s23 + $0x70] sm:$0xff] %v153_v14  ;;  %v159_v17 = vld [vmem:[%s1095_s22 + $0x108] sm:$0xff]  ;;  %156 = vst [vmem:[%s1100_s23 + $0x78] sm:$0xff] %v155_v15  ;;  %v161_v18 = vld [vmem:[%s1095_s22 + $0x110] sm:$0xff] }
  0x18   : > { %158 = vst [vmem:[%s1100_s23 + $0x80] sm:$0xff] %v157_v16  ;;  %160 = vst [vmem:[%s1100_s23 + $0x88] sm:$0xff] %v159_v17  ;;  %v163_v19 = vld [vmem:[%s1095_s22 + $0x118] sm:$0xff]  ;;  %v165_v20 = vld [vmem:[%s1095_s22 + $0x120] sm:$0xff] }
  0x19   : > { %162 = vst [vmem:[%s1100_s23 + $0x90] sm:$0xff] %v161_v18  ;;  %164 = vst [vmem:[%s1100_s23 + $0x98] sm:$0xff] %v163_v19  ;;  %v167_v21 = vld [vmem:[%s1095_s22 + $0x128] sm:$0xff]  ;;  %v169_v22 = vld [vmem:[%s1095_s22 + $0x130] sm:$0xff] }
  0x1a   : > { %166 = vst [vmem:[%s1100_s23 + $0xa0] sm:$0xff] %v165_v20  ;;  %v171_v23 = vld [vmem:[%s1095_s22 + $0x138] sm:$0xff]  ;;  %168 = vst [vmem:[%s1100_s23 + $0xa8] sm:$0xff] %v167_v21  ;;  %v173_v24 = vld [vmem:[%s1095_s22 + $0x180] sm:$0xff] }
  0x1b   : > { %170 = vst [vmem:[%s1100_s23 + $0xb0] sm:$0xff] %v169_v22  ;;  %172 = vst [vmem:[%s1100_s23 + $0xb8] sm:$0xff] %v171_v23  ;;  %v175_v25 = vld [vmem:[%s1095_s22 + $0x188] sm:$0xff]  ;;  %v177_v26 = vld [vmem:[%s1095_s22 + $0x190] sm:$0xff] }
  0x1c   : > { %174 = vst [vmem:[%s1100_s23 + $0xc0] sm:$0xff] %v173_v24  ;;  %176 = vst [vmem:[%s1100_s23 + $0xc8] sm:$0xff] %v175_v25  ;;  %v179_v27 = vld [vmem:[%s1095_s22 + $0x198] sm:$0xff]  ;;  %v181_v28 = vld [vmem:[%s1095_s22 + $0x1a0] sm:$0xff] }
  0x1d   : > { %178 = vst [vmem:[%s1100_s23 + $0xd0] sm:$0xff] %v177_v26  ;;  %v183_v29 = vld [vmem:[%s1095_s22 + $0x1a8] sm:$0xff]  ;;  %180 = vst [vmem:[%s1100_s23 + $0xd8] sm:$0xff] %v179_v27  ;;  %v185_v30 = vld [vmem:[%s1095_s22 + $0x1b0] sm:$0xff] }
  0x1e   : > { %182 = vst [vmem:[%s1100_s23 + $0xe0] sm:$0xff] %v181_v28  ;;  %184 = vst [vmem:[%s1100_s23 + $0xe8] sm:$0xff] %v183_v29  ;;  %v187_v31 = vld [vmem:[%s1095_s22 + $0x1b8] sm:$0xff] }
  0x1f   : > { %186 = vst [vmem:[%s1100_s23 + $0xf0] sm:$0xff] %v185_v30  ;;  %188 = vst [vmem:[%s1100_s23 + $0xf8] sm:$0xff] %v187_v31 }
  0x20 PF: > { %p949_p5 = scmp.ge.s32.totalorder %s1043_s11, 1  ;;  %p193_p6 = scmp.lt.s32.totalorder %s1043_s11, 3 }
  0x22   : > { %p194_p7 = pnand %p949_p5, %p193_p6 }
  0x23   : > { %s200_s24 = sand.u32 (!%p194_p7), 1, %s1035_s9   ;;  %s951_s29 = sshll.u32 (!%p194_p7), %s942_s12, 4 }
  0x24   : > { %197 = sbr.rel (%p194_p7) target bundleno = 429 (0x1ad), region = 47  ;;  %s950_s25 = sshll.u32 (!%p194_p7), %s200_s24, 8 }
  0x25   : > { %s1168_s26 = scalar_lea.vmem (!%p194_p7), [#allocation2], %s950_s25  ;;  %p223_p8 = scmp.lt.s32.totalorder (!%p194_p7), %s951_s29, 31 }
  0x29   : > { %v1045_v32 = vmov 0   ;;  %v246_v33 = vld [vmem:[%s1168_s26 + $0x80] sm:$0xff]  ;;  %v247_v35 = vld [vmem:[%s1168_s26 + $0x88] sm:$0xff]  ;;  %v248_v46 = vld [vmem:[%s1168_s26 + $0x90] sm:$0xff]  ;;  %vm422_vm0 = vcmask 261120   ;;  %vm786_vm1 = vcmask 1043456  }
  0x2a   : > { %458 = vmatprep.mubr.bf16.mxu0 %v1045_v32  ;;  %499 = vmatprep.mubr.bf16.mxu1 %v1045_v32  ;;  %v254_v34 = vld [vmem:[%s1168_s26 + $0xc0] sm:$0xff]  ;;  %v255_v37 = vld [vmem:[%s1168_s26 + $0xc8] sm:$0xff]  ;;  %v256_v48 = vld [vmem:[%s1168_s26 + $0xd0] sm:$0xff]  ;;  %s1315_s29 = smov (!%p223_p8, %s951_s29), 31 }
  0x2b   : > { %v970_v36 = vcombine.high %v246_v33, %v254_v34  ;;  %v969_v38 = vcombine.low %v246_v33, %v254_v34  ;;  %v230_v39 = vld [vmem:[%s1168_s26] sm:$0xff]  ;;  %v972_v41 = vcombine.high %v247_v35, %v255_v37  ;;  %v971_v42 = vcombine.low %v247_v35, %v255_v37  ;;  %v231_v44 = vld [vmem:[%s1168_s26 + $0x8] sm:$0xff]  ;;  %v249_v49 = vld [vmem:[%s1168_s26 + $0x98] sm:$0xff]  ;;  %s952_s30 = sshll.u32 %s1315_s29, 2 }
  0x2c   : > { %v238_v40 = vld [vmem:[%s1168_s26 + $0x40] sm:$0xff]  ;;  %v239_v45 = vld [vmem:[%s1168_s26 + $0x48] sm:$0xff]  ;;  %v257_v50 = vld [vmem:[%s1168_s26 + $0xd8] sm:$0xff]  ;;  %v974_v53 = vcombine.high %v248_v46, %v256_v48  ;;  %v973_v60 = vcombine.low %v248_v46, %v256_v48  ;;  %s226_s5 = scalar_lea.vmem %s1310_s2, %s952_s30 }
  0x2d   : > { %v954_v43 = vcombine.high %v230_v39, %v238_v40  ;;  %438 = vmatprep.subr.bf16.mxu0 %v970_v36  ;;  %v956_v47 = vcombine.high %v231_v44, %v239_v45  ;;  %479 = vmatprep.subr.bf16.mxu1 %v972_v41  ;;  %v953_v51 = vcombine.low %v230_v39, %v238_v40  ;;  %v232_v55 = vld [vmem:[%s1168_s26 + $0x10] sm:$0xff]  ;;  %v233_v57 = vld [vmem:[%s1168_s26 + $0x18] sm:$0xff]  ;;  %v1189_v59 = vld [vmem:[%s1308_s0] sm:$0x3] }
  0x2e   : > { %439 = vmatpush1.bf16.msra.mxu0 %v969_v38  ;;  %480 = vmatpush1.bf16.msra.mxu1 %v971_v42  ;;  %v955_v52 = vcombine.low %v231_v44, %v239_v45  ;;  %v976_v54 = vcombine.high %v249_v49, %v257_v50  ;;  %v240_v56 = vld [vmem:[%s1168_s26 + $0x50] sm:$0xff]  ;;  %v241_v58 = vld [vmem:[%s1168_s26 + $0x58] sm:$0xff]  ;;  %v975_v61 = vcombine.low %v249_v49, %v257_v50  ;;  %v250_v0 = vld [vmem:[%s1168_s26 + $0xa0] sm:$0xff] }
  0x2f   : > { %440 = vmatprep.subr.bf16.mxu0 %v954_v43  ;;  %481 = vmatprep.subr.bf16.mxu1 %v956_v47  ;;  %v958_v62 = vcombine.high %v232_v55, %v240_v56  ;;  %v960_v63 = vcombine.high %v233_v57, %v241_v58  ;;  %v258_v1 = vld [vmem:[%s1168_s26 + $0xe0] sm:$0xff]  ;;  %v251_v2 = vld [vmem:[%s1168_s26 + $0xa8] sm:$0xff]  ;;  %v957_v4 = vcombine.low %v232_v55, %v240_v56  ;;  %v252_v16 = vld [vmem:[%s1168_s26 + $0xb0] sm:$0xff] }
  0x30   : > { %v259_v3 = vld [vmem:[%s1168_s26 + $0xe8] sm:$0xff]  ;;  %v959_v5 = vcombine.low %v233_v57, %v241_v58  ;;  %v978_v6 = vcombine.high %v250_v0, %v258_v1  ;;  %v234_v8 = vld [vmem:[%s1168_s26 + $0x20] sm:$0xff]  ;;  %v977_v12 = vcombine.low %v250_v0, %v258_v1  ;;  %v260_v17 = vld [vmem:[%s1168_s26 + $0xf0] sm:$0xff] }
  0x31   : > { %v980_v7 = vcombine.high %v251_v2, %v259_v3  ;;  %v242_v9 = vld [vmem:[%s1168_s26 + $0x60] sm:$0xff]  ;;  %v235_v10 = vld [vmem:[%s1168_s26 + $0x28] sm:$0xff]  ;;  %v979_v13 = vcombine.low %v251_v2, %v259_v3  ;;  %v253_v18 = vld [vmem:[%s1168_s26 + $0xb8] sm:$0xff]  ;;  %v982_v22 = vcombine.high %v252_v16, %v260_v17  ;;  %v981_v28 = vcombine.low %v252_v16, %v260_v17 }
  0x32   : > { %441 = vmatpush1.bf16.msra.mxu0 %v953_v51  ;;  %482 = vmatpush1.bf16.msra.mxu1 %v955_v52  ;;  %v243_v11 = vld [vmem:[%s1168_s26 + $0x68] sm:$0xff]  ;;  %v962_v14 = vcombine.high %v234_v8, %v242_v9  ;;  %v261_v19 = vld [vmem:[%s1168_s26 + $0xf8] sm:$0xff]  ;;  %v961_v20 = vcombine.low %v234_v8, %v242_v9  ;;  %v236_v24 = vld [vmem:[%s1168_s26 + $0x30] sm:$0xff] }
  0x33   : > { %520 = vmatprep.subr.bf16.mxu0 %v974_v53  ;;  %561 = vmatprep.subr.bf16.mxu1 %v976_v54  ;;  %v964_v15 = vcombine.high %v235_v10, %v243_v11  ;;  %v963_v21 = vcombine.low %v235_v10, %v243_v11  ;;  %v984_v23 = vcombine.high %v253_v18, %v261_v19  ;;  %v244_v25 = vld [vmem:[%s1168_s26 + $0x70] sm:$0xff]  ;;  %v237_v26 = vld [vmem:[%s1168_s26 + $0x38] sm:$0xff] }
  0x34   : > { %v245_v27 = vld [vmem:[%s1168_s26 + $0x78] sm:$0xff]  ;;  %v983_v29 = vcombine.low %v253_v18, %v261_v19  ;;  %v966_v30 = vcombine.high %v236_v24, %v244_v25  ;;  %v965_v33 = vcombine.low %v236_v24, %v244_v25 }
  0x35   : > { %985 = vmatmul.mubr.msk.bf16.vlgmr.msra.gmra.mxu0 %vm422_vm0, %v1189_v59  ;;  %986 = vmatmul.mubr.msk.bf16.vlgmr.msra.gmra.mxu1 %vm422_vm0, %v1189_v59  ;;  %v968_v31 = vcombine.high %v237_v26, %v245_v27  ;;  %v967_v34 = vcombine.low %v237_v26, %v245_v27 }
  0x36   : > { %521 = vmatpush1.bf16.msra.mxu0 %v973_v60  ;;  %562 = vmatpush1.bf16.msra.mxu1 %v975_v61 }
  0x37   : > { %522 = vmatprep.subr.bf16.mxu0 %v958_v62  ;;  %563 = vmatprep.subr.bf16.mxu1 %v960_v63 }
  0x38   : > { %540 = vmatprep.mubr.bf16.mxu0 %v1045_v32  ;;  %581 = vmatprep.mubr.bf16.mxu1 %v1045_v32 }
  0x3a   : > { %523 = vmatpush1.bf16.msra.mxu0 %v957_v4  ;;  %564 = vmatpush1.bf16.msra.mxu1 %v959_v5 }
  0x3b   : > { %602 = vmatprep.subr.bf16.mxu0 %v978_v6  ;;  %643 = vmatprep.subr.bf16.mxu1 %v980_v7 }
  0x3d   : > { %987 = vmatmul.mubr.msk.bf16.vlgmr.msra.gmra.mxu0 %vm422_vm0, %v1189_v59  ;;  %988 = vmatmul.mubr.msk.bf16.vlgmr.msra.gmra.mxu1 %vm422_vm0, %v1189_v59 }
  0x3e   : > { %603 = vmatpush1.bf16.msra.mxu0 %v977_v12  ;;  %644 = vmatpush1.bf16.msra.mxu1 %v979_v13 }
  0x3f   : > { %604 = vmatprep.subr.bf16.mxu0 %v962_v14  ;;  %645 = vmatprep.subr.bf16.mxu1 %v964_v15 }
  0x40   : > { %622 = vmatprep.mubr.bf16.mxu0 %v1045_v32  ;;  %663 = vmatprep.mubr.bf16.mxu1 %v1045_v32 }
  0x42   : > { %605 = vmatpush1.bf16.msra.mxu0 %v961_v20  ;;  %646 = vmatpush1.bf16.msra.mxu1 %v963_v21 }
  0x43   : > { %684 = vmatprep.subr.bf16.mxu0 %v982_v22  ;;  %725 = vmatprep.subr.bf16.mxu1 %v984_v23 }
  0x45   : > { %989 = vmatmul.mubr.msk.bf16.vlgmr.msra.gmra.mxu0 %vm422_vm0, %v1189_v59  ;;  %990 = vmatmul.mubr.msk.bf16.vlgmr.msra.gmra.mxu1 %vm422_vm0, %v1189_v59 }
  0x46   : > { %685 = vmatpush1.bf16.msra.mxu0 %v981_v28  ;;  %726 = vmatpush1.bf16.msra.mxu1 %v983_v29 }
  0x47   : > { %686 = vmatprep.subr.bf16.mxu0 %v966_v30  ;;  %727 = vmatprep.subr.bf16.mxu1 %v968_v31 }
  0x48   : > { %704 = vmatprep.mubr.bf16.mxu0 %v1045_v32  ;;  %745 = vmatprep.mubr.bf16.mxu1 %v1045_v32 }
  0x4a   : > { %687 = vmatpush1.bf16.msra.mxu0 %v965_v33  ;;  %728 = vmatpush1.bf16.msra.mxu1 %v967_v34 }
  0x4d   : > { %991 = vmatmul.mubr.msk.bf16.vlgmr.msra.gmra.mxu0 %vm422_vm0, %v1189_v59  ;;  %992 = vmatmul.mubr.msk.bf16.vlgmr.msra.gmra.mxu1 %vm422_vm0, %v1189_v59 }
  0xf5   : > { %v460_v35 = vpop.f32.mrf.mxu0  ;;  %v501_v37 = vpop.f32.mrf.mxu1 }
  0xf6   : > { %v754_v36 = vmax.f32 %v460_v35, 0.0  ;;  %v756_v38 = vmax.f32 %v501_v37, 0.0 }
  0xf7   : > { %v462_v39 = vpop.f32.mrf.mxu0  ;;  %v503_v42 = vpop.f32.mrf.mxu1 }
  0xf8   : > { %v1229_v40 = vmin.f32 %v754_v36, 6.0  ;;  %v755_v41 = vmax.f32 %v462_v39, 0.0  ;;  %v1231_v43 = vmin.f32 %v756_v38, 6.0  ;;  %v757_v32 = vmax.f32 %v503_v42, 0.0 }
  0xf9   : > { %v464_v44 = vpop.f32.mrf.mxu0  ;;  %v505_v46 = vpop.f32.mrf.mxu1 }
  0xfa   : > { %v1233_v45 = vmin.f32 %v755_v41, 6.0  ;;  %v787_v48 = vsel %vm786_vm1, %v1229_v40, 0.0  ;;  %v790_v49 = vsel %vm786_vm1, %v1231_v43, 0.0  ;;  %v1241_v51 = vmin.f32 %v757_v32, 6.0 }
  0xfb   : > { %v465_v47 = vpop.f32.mrf.mxu0  ;;  %v506_v52 = vpop.f32.mrf.mxu1 }
  0xfc   : > { %v788_v50 = vsel %vm786_vm1, %v1233_v45, 0.0  ;;  %v792_v60 = vsel %vm786_vm1, %v1241_v51, 0.0 }
  0xfd   : > { %v789_v53 = vadd.f32 %v788_v50, %v787_v48  ;;  %v542_v54 = vpop.f32.mrf.mxu0  ;;  %v583_v56 = vpop.f32.mrf.mxu1 }
  0xfe   : > { %v758_v55 = vmax.f32 %v542_v54, 0.0  ;;  %v760_v58 = vmax.f32 %v583_v56, 0.0 }
  0xff   : > { %v791_v57 = vadd.f32 %v790_v49, %v789_v53  ;;  %v544_v59 = vpop.f32.mrf.mxu0  ;;  %v585_v63 = vpop.f32.mrf.mxu1 }
 0x100   : > { %v1245_v61 = vmin.f32 %v758_v55, 6.0  ;;  %v759_v62 = vmax.f32 %v544_v59, 0.0  ;;  %v1247_v1 = vmin.f32 %v760_v58, 6.0  ;;  %v761_v2 = vmax.f32 %v585_v63, 0.0 }
 0x101   : > { %v793_v0 = vadd.f32 %v792_v60, %v791_v57  ;;  %v546_v3 = vpop.f32.mrf.mxu0  ;;  %v587_v6 = vpop.f32.mrf.mxu1 }
 0x102   : > { %v794_v4 = vsel %vm786_vm1, %v1245_v61, 0.0  ;;  %v1251_v5 = vmin.f32 %v759_v62, 6.0  ;;  %v1255_v10 = vmin.f32 %v761_v2, 6.0  ;;  %v798_v12 = vsel %vm786_vm1, %v1247_v1, 0.0 }
 0x103   : > { %v795_v7 = vadd.f32 %v794_v4, %v793_v0  ;;  %v547_v8 = vpop.f32.mrf.mxu0  ;;  %v588_v11 = vpop.f32.mrf.mxu1 }
 0x104   : > { %v796_v9 = vsel %vm786_vm1, %v1251_v5, 0.0  ;;  %v800_v23 = vsel %vm786_vm1, %v1255_v10, 0.0 }
 0x105   : > { %v624_v13 = vpop.f32.mrf.mxu0  ;;  %v797_v14 = vadd.f32 %v796_v9, %v795_v7  ;;  %v665_v16 = vpop.f32.mrf.mxu1 }
 0x106   : > { %v762_v15 = vmax.f32 %v624_v13, 0.0  ;;  %v764_v17 = vmax.f32 %v665_v16, 0.0 }
 0x107   : > { %v626_v18 = vpop.f32.mrf.mxu0  ;;  %v799_v19 = vadd.f32 %v798_v12, %v797_v14  ;;  %v667_v22 = vpop.f32.mrf.mxu1 }
 0x108   : > { %v1259_v20 = vmin.f32 %v762_v15, 6.0  ;;  %v763_v21 = vmax.f32 %v626_v18, 0.0  ;;  %v1263_v24 = vmin.f32 %v764_v17, 6.0  ;;  %v765_v25 = vmax.f32 %v667_v22, 0.0 }
 0x109   : > { %v628_v26 = vpop.f32.mrf.mxu0  ;;  %v801_v27 = vadd.f32 %v800_v23, %v799_v19  ;;  %v669_v29 = vpop.f32.mrf.mxu1 }
 0x10a   : > { %v1265_v28 = vmin.f32 %v763_v21, 6.0  ;;  %v834_v31 = vsel %vm786_vm1, %v1259_v20, 0.0  ;;  %v837_v33 = vsel %vm786_vm1, %v1263_v24, 0.0  ;;  %v1273_v35 = vmin.f32 %v765_v25, 6.0 }
 0x10b   : > { %802 = vadd.xlane.f32.xlu0 %v801_v27  ;;  %v629_v30 = vpop.f32.mrf.mxu0  ;;  %v670_v36 = vpop.f32.mrf.mxu1 }
 0x10c   : > { %v835_v34 = vsel %vm786_vm1, %v1265_v28, 0.0  ;;  %v839_v46 = vsel %vm786_vm1, %v1273_v35, 0.0 }
 0x10d   : > { %v836_v37 = vadd.f32 %v835_v34, %v834_v31  ;;  %v706_v38 = vpop.f32.mrf.mxu0  ;;  %v747_v41 = vpop.f32.mrf.mxu1 }
 0x10e   : > { %v766_v39 = vmax.f32 %v706_v38, 0.0  ;;  %v768_v32 = vmax.f32 %v747_v41, 0.0 }
 0x10f   : > { %v838_v42 = vadd.f32 %v837_v33, %v836_v37  ;;  %v708_v44 = vpop.f32.mrf.mxu0  ;;  %v749_v49 = vpop.f32.mrf.mxu1 }
 0x110   : > { %v782_v47 = vmin.f32 %v766_v39, 6.0  ;;  %v767_v48 = vmax.f32 %v708_v44, 0.0  ;;  %v784_v52 = vmin.f32 %v768_v32, 6.0  ;;  %v769_v53 = vmax.f32 %v749_v49, 0.0 }
 0x111   : > { %v840_v50 = vadd.f32 %v839_v46, %v838_v42  ;;  %v710_v54 = vpop.f32.mrf.mxu0  ;;  %v751_v57 = vpop.f32.mrf.mxu1 }
 0x112   : > { %v841_v55 = vsel %vm786_vm1, %v782_v47, 0.0  ;;  %v783_v56 = vmin.f32 %v767_v48, 6.0  ;;  %v845_v60 = vsel %vm786_vm1, %v784_v52, 0.0  ;;  %v785_v63 = vmin.f32 %v769_v53, 6.0 }
 0x113   : > { %v842_v58 = vadd.f32 %v841_v55, %v840_v50  ;;  %v711_v59 = vpop.f32.mrf.mxu0  ;;  %v752_v0 = vpop.f32.mrf.mxu1 }
 0x114   : > { %v843_v62 = vsel %vm786_vm1, %v783_v56, 0.0  ;;  %v847_v4 = vsel %vm786_vm1, %v785_v63, 0.0 }
 0x115   : > { %v844_v2 = vadd.f32 %v843_v62, %v842_v58 }
 0x117   : > { %v846_v3 = vadd.f32 %v845_v60, %v844_v2 }
 0x119   : > { %v848_v6 = vadd.f32 %v847_v4, %v846_v3 }
 0x11b   : > { %849 = vadd.xlane.f32.xlu0 %v848_v6 }
 0x194   : > { %v803_v7 = vpop.xlane.xlu0 %802 }
 0x195   : > { %v805_v8 = vmul.f32 0.0009765625, %v803_v7 }
 0x197   : > { %v806_v9 = vsub.f32 %v1229_v40, %v805_v8  ;;  %v807_v11 = vsub.f32 %v1233_v45, %v805_v8  ;;  %v808_v12 = vsub.f32 %v1231_v43, %v805_v8  ;;  %v809_v13 = vsub.f32 %v1241_v51, %v805_v8 }
 0x198   : > { %v810_v14 = vsub.f32 %v1245_v61, %v805_v8  ;;  %v811_v15 = vsub.f32 %v1251_v5, %v805_v8  ;;  %v812_v16 = vsub.f32 %v1247_v1, %v805_v8  ;;  %v813_v17 = vsub.f32 %v1255_v10, %v805_v8 }
 0x199   : > { %v822_v18 = vcombine.low %v806_v9, %v807_v11  ;;  %v823_v40 = vcombine.low %v808_v12, %v809_v13 }
 0x19a   : > { %v824_v19 = vcombine.low %v810_v14, %v811_v15  ;;  %v825_v45 = vcombine.low %v812_v16, %v813_v17 }
 0x19b   : > { %830 = vst [vmem:[%s226_s5] sm:$0xff] %v822_v18  ;;  %831 = vst [vmem:[%s226_s5 + $0x8] sm:$0xff] %v823_v40 }
 0x19c   : > { %832 = vst [vmem:[%s226_s5 + $0x10] sm:$0xff] %v824_v19  ;;  %833 = vst [vmem:[%s226_s5 + $0x18] sm:$0xff] %v825_v45 }
 0x1a4   : > { %v850_v43 = vpop.xlane.xlu0 %849 }
 0x1a5   : > { %v851_v51 = vmul.f32 0.0009765625, %v850_v43 }
 0x1a7   : > { %v852_v21 = vsub.f32 %v1259_v20, %v851_v51  ;;  %v853_v61 = vsub.f32 %v1265_v28, %v851_v51  ;;  %v854_v5 = vsub.f32 %v1263_v24, %v851_v51  ;;  %v855_v1 = vsub.f32 %v1273_v35, %v851_v51 }
 0x1a8   : > { %v856_v22 = vsub.f32 %v782_v47, %v851_v51  ;;  %v857_v10 = vsub.f32 %v783_v56, %v851_v51  ;;  %v858_v23 = vsub.f32 %v784_v52, %v851_v51  ;;  %v859_v25 = vsub.f32 %v785_v63, %v851_v51 }
 0x1a9   : > { %v868_v26 = vcombine.low %v852_v21, %v853_v61  ;;  %v869_v27 = vcombine.low %v854_v5, %v855_v1 }
 0x1aa   : > { %v870_v29 = vcombine.low %v856_v22, %v857_v10  ;;  %v871_v30 = vcombine.low %v858_v23, %v859_v25 }
 0x1ab   : > { %876 = vst [vmem:[%s226_s5 + $0x20] sm:$0xff] %v868_v26  ;;  %877 = vst [vmem:[%s226_s5 + $0x28] sm:$0xff] %v869_v27 }
 0x1ac   : > { %878 = vst [vmem:[%s226_s5 + $0x30] sm:$0xff] %v870_v29  ;;  %879 = vst [vmem:[%s226_s5 + $0x38] sm:$0xff] %v871_v30 }
 0x1ad PF: > { %p9_p9 = scmp.ge.s32.totalorder %s1078_s13, 4   ;;  %s1311_s9 = smov %s1039_s10 }
 0x1ae   : > { %s1312_s10 = smov %s1087_s16  ;;  %s1313_s11 = smov %s1078_s13 }
 0x1af   :  { %11 = sbr.rel (!%p9_p9) target bundleno = 2 (0x2), region = 86 }

// kernel: gnet_forward.6
= control target key start
LH: loop header
LB: loop body
LE: loop exit
PB: predicated region body
PF: predicated region fallthrough
CT: control target
= control target key end

     0   :  { %s588_s9 = smov 0   ;;  %s590_s10 = smov 0   ;;  %s661_s0 = inlined_call_operand.vmem [shape: bf16[8,64], index: 0, kind: input, shape index: {}]   ;;  %s662_s1 = inlined_call_operand.vmem [shape: bf16[64,1024], index: 1, kind: input, shape index: {}]   ;;  %s663_s2 = inlined_call_operand.vmem [shape: f32[8,1024], index: 2, kind: output, shape index: {}]  }
   0x1   :  { %s592_s11 = smov 0  }
   0x2 LB: > { %s467_s12 = sadd.s32 4294967295, %s570_s11   ;;  %s605_s13 = sadd.s32 1, %s570_s11   ;;  %s570_s11 = sphi %s592_s11, %s666_s11   ;;  %s566_s10 = sphi %s590_s10, %s665_s10   ;;  %s562_s9 = sphi %s588_s9, %s664_s9  }
   0x3   : > { %s37_s14 = ssub.s32 %s570_s11, %s605_s13  ;;  %s40_s15 = sadd.s32 1, %s566_s10 }
   0x4   : > { %p38_p0 = scmp.eq.s32.totalorder %s37_s14, 0  ;;  %p47_p1 = scmp.ne.s32.totalorder %s566_s10, %s562_s9 }
   0x5   : > { %p48_p2 = scmp.eq.s32.totalorder %s570_s11, 0  ;;  %p470_p4 = scmp.ge.s32.totalorder %s570_s11, 2 }
   0x6   : > { %s614_s16 = scalar_select %p38_p0, %s566_s10, %s40_s15  }
   0x7   : > { %p49_p3 = por %p48_p2, %p47_p1  ;;  %102 = sbr.rel (%p470_p4) target bundleno = 24 (0x18), region = 20 }
   0xc   : > { %105 = sbr.rel (!%p49_p3) target bundleno = 24 (0x18), region = 24  ;;  %s107_s17 = sand.u32 (%p49_p3), 1, %s566_s10  }
   0xd   : > { %s498_s18 = sshll.u32 (%p49_p3), %s570_s11, 4  ;;  %s471_s19 = sshll.u32 (%p49_p3), %s107_s17, 7 }
   0xe   : > { %s622_s22 = scalar_lea.vmem (%p49_p3), %s662_s1, %s498_s18  ;;  %s109_s23 = scalar_lea.vmem (%p49_p3), [#allocation2], %s471_s19 }
   0xf   : > { %v125_v0 = vld [vmem:[%s622_s22] sm:$0xff] (%p49_p3)  ;;  %v127_v1 = vld [vmem:[%s622_s22 + $0x8] sm:$0xff] (%p49_p3) }
  0x10   : > { %v129_v2 = vld [vmem:[%s622_s22 + $0x20] sm:$0xff] (%p49_p3)  ;;  %126 = vst [vmem:[%s109_s23] sm:$0xff] (%p49_p3), %v125_v0  ;;  %128 = vst [vmem:[%s109_s23 + $0x8] sm:$0xff] (%p49_p3), %v127_v1  ;;  %v131_v3 = vld [vmem:[%s622_s22 + $0x28] sm:$0xff] (%p49_p3) }
  0x11   : > { %130 = vst [vmem:[%s109_s23 + $0x10] sm:$0xff] %v129_v2  ;;  %v133_v4 = vld [vmem:[%s622_s22 + $0x40] sm:$0xff]  ;;  %v135_v5 = vld [vmem:[%s622_s22 + $0x48] sm:$0xff]  ;;  %132 = vst [vmem:[%s109_s23 + $0x18] sm:$0xff] %v131_v3 }
  0x12   : > { %134 = vst [vmem:[%s109_s23 + $0x20] sm:$0xff] %v133_v4  ;;  %136 = vst [vmem:[%s109_s23 + $0x28] sm:$0xff] %v135_v5  ;;  %v137_v6 = vld [vmem:[%s622_s22 + $0x60] sm:$0xff]  ;;  %v139_v7 = vld [vmem:[%s622_s22 + $0x68] sm:$0xff] }
  0x13   : > { %v141_v8 = vld [vmem:[%s622_s22 + $0x80] sm:$0xff]  ;;  %138 = vst [vmem:[%s109_s23 + $0x30] sm:$0xff] %v137_v6  ;;  %140 = vst [vmem:[%s109_s23 + $0x38] sm:$0xff] %v139_v7  ;;  %v143_v9 = vld [vmem:[%s622_s22 + $0x88] sm:$0xff] }
  0x14   : > { %142 = vst [vmem:[%s109_s23 + $0x40] sm:$0xff] %v141_v8  ;;  %v145_v10 = vld [vmem:[%s622_s22 + $0xa0] sm:$0xff]  ;;  %v147_v11 = vld [vmem:[%s622_s22 + $0xa8] sm:$0xff]  ;;  %144 = vst [vmem:[%s109_s23 + $0x48] sm:$0xff] %v143_v9 }
  0x15   : > { %146 = vst [vmem:[%s109_s23 + $0x50] sm:$0xff] %v145_v10  ;;  %148 = vst [vmem:[%s109_s23 + $0x58] sm:$0xff] %v147_v11  ;;  %v149_v12 = vld [vmem:[%s622_s22 + $0xc0] sm:$0xff]  ;;  %v151_v13 = vld [vmem:[%s622_s22 + $0xc8] sm:$0xff] }
  0x16   : > { %v153_v14 = vld [vmem:[%s622_s22 + $0xe0] sm:$0xff]  ;;  %150 = vst [vmem:[%s109_s23 + $0x60] sm:$0xff] %v149_v12  ;;  %152 = vst [vmem:[%s109_s23 + $0x68] sm:$0xff] %v151_v13  ;;  %v155_v15 = vld [vmem:[%s622_s22 + $0xe8] sm:$0xff] }
  0x17   : > { %154 = vst [vmem:[%s109_s23 + $0x70] sm:$0xff] %v153_v14  ;;  %156 = vst [vmem:[%s109_s23 + $0x78] sm:$0xff] %v155_v15 }
  0x18 PF: > { %p474_p5 = scmp.ge.s32.totalorder %s570_s11, 1  ;;  %p161_p6 = scmp.lt.s32.totalorder %s570_s11, 3 }
  0x1a   : > { %p162_p7 = pnand %p474_p5, %p161_p6 }
  0x1b   : > { %s168_s24 = sand.u32 (!%p162_p7), 1, %s562_s9   ;;  %s476_s29 = sshll.u32 (!%p162_p7), %s467_s12, 2 }
  0x1c   : > { %165 = sbr.rel (%p162_p7) target bundleno = 399 (0x18f), region = 47  ;;  %s475_s25 = sshll.u32 (!%p162_p7), %s168_s24, 7 }
  0x1d   : > { %s170_s26 = scalar_lea.vmem (!%p162_p7), [#allocation2], %s475_s25  ;;  %p191_p8 = scmp.lt.s32.totalorder (!%p162_p7), %s476_s29, 7 }
  0x21   : > { %v572_v16 = vmov 0   ;;  %v524_v17 = vld [vmem:[%s170_s26 + $0x64] ss:$16 sps:$4 sm:$0xff]   ;;  %v526_v18 = vld [vmem:[%s170_s26 + $0x6c] ss:$16 sps:$4 sm:$0xff]   ;;  %vm294_vm0 = vcmask 523264  }
  0x22   : > { %330 = vmatprep.mubr.bf16.mxu0 %v572_v16  ;;  %371 = vmatprep.mubr.bf16.mxu1 %v572_v16  ;;  %v528_v19 = vld [vmem:[%s170_s26 + $0x60] ss:$16 sps:$4 sm:$0xff]   ;;  %v529_v20 = vld [vmem:[%s170_s26 + $0x68] ss:$16 sps:$4 sm:$0xff]   ;;  %v530_v21 = vld [vmem:[%s170_s26 + $0x44] ss:$16 sps:$4 sm:$0xff]  }
  0x23   : > { %306 = vmatprep.subr.bf16.mxu0 %v524_v17  ;;  %347 = vmatprep.subr.bf16.mxu1 %v526_v18  ;;  %v532_v22 = vld [vmem:[%s170_s26 + $0x4c] ss:$16 sps:$4 sm:$0xff]   ;;  %v534_v23 = vld [vmem:[%s170_s26 + $0x40] ss:$16 sps:$4 sm:$0xff]   ;;  %v535_v24 = vld [vmem:[%s170_s26 + $0x48] ss:$16 sps:$4 sm:$0xff]  }
  0x24   : > { %307 = vmatpush1.bf16.msra.mxu0 %v528_v19  ;;  %348 = vmatpush1.bf16.msra.mxu1 %v529_v20  ;;  %v536_v25 = vld [vmem:[%s170_s26 + $0x24] ss:$16 sps:$4 sm:$0xff]   ;;  %v538_v26 = vld [vmem:[%s170_s26 + $0x2c] ss:$16 sps:$4 sm:$0xff]   ;;  %v540_v27 = vld [vmem:[%s170_s26 + $0x20] ss:$16 sps:$4 sm:$0xff]  }
  0x25   : > { %308 = vmatprep.subr.bf16.mxu0 %v530_v21  ;;  %349 = vmatprep.subr.bf16.mxu1 %v532_v22  ;;  %v541_v28 = vld [vmem:[%s170_s26 + $0x28] ss:$16 sps:$4 sm:$0xff]   ;;  %v542_v29 = vld [vmem:[%s170_s26 + $0x4] ss:$16 sps:$4 sm:$0xff]   ;;  %v544_v30 = vld [vmem:[%s170_s26 + $0xc] ss:$16 sps:$4 sm:$0xff]  }
  0x26   : > { %v546_v31 = vld [vmem:[%s170_s26] ss:$16 sps:$4 sm:$0xff]   ;;  %v547_v32 = vld [vmem:[%s170_s26 + $0x8] ss:$16 sps:$4 sm:$0xff]   ;;  %s668_s29 = smov (!%p191_p8, %s476_s29), 7 }
  0x27   : > { %v197_v33 = vld [vmem:[%s661_s0] sm:$0xf]  ;;  %s477_s30 = sshll.u32 %s668_s29, 3 }
  0x28   : > { %309 = vmatpush1.bf16.msra.mxu0 %v534_v23  ;;  %350 = vmatpush1.bf16.msra.mxu1 %v535_v24  ;;  %s194_s5 = scalar_lea.vmem %s663_s2, %s477_s30 }
  0x29   : > { %310 = vmatprep.subr.bf16.mxu0 %v536_v25  ;;  %351 = vmatprep.subr.bf16.mxu1 %v538_v26 }
  0x2c   : > { %311 = vmatpush1.bf16.msra.mxu0 %v540_v27  ;;  %352 = vmatpush1.bf16.msra.mxu1 %v541_v28 }
  0x2d   : > { %312 = vmatprep.subr.bf16.mxu0 %v542_v29  ;;  %353 = vmatprep.subr.bf16.mxu1 %v544_v30 }
  0x30   : > { %313 = vmatpush1.bf16.msra.mxu0 %v546_v31  ;;  %354 = vmatpush1.bf16.msra.mxu1 %v547_v32 }
  0x33   : > { %494 = vmatmul.mubr.msk.bf16.vlgmr.msra.gmra.mxu0 %vm294_vm0, %v197_v33  ;;  %495 = vmatmul.mubr.msk.bf16.vlgmr.msra.gmra.mxu1 %vm294_vm0, %v197_v33 }
  0xf3   : > { %v332_v34 = vpop.f32.mrf.mxu0  ;;  %v373_v35 = vpop.f32.mrf.mxu1 }
  0xf4   : > { %v380_v36 = vmax.f32 %v332_v34, 0.0  ;;  %v382_v39 = vmax.f32 %v373_v35, 0.0 }
  0xf5   : > { %v334_v37 = vpop.f32.mrf.mxu0  ;;  %v375_v38 = vpop.f32.mrf.mxu1 }
  0xf6   : > { %v381_v40 = vmax.f32 %v334_v37, 0.0  ;;  %v383_v41 = vmax.f32 %v375_v38, 0.0  ;;  %v384_v44 = vmin.f32 %v380_v36, 6.0  ;;  %v386_v48 = vmin.f32 %v382_v39, 6.0 }
  0xf7   : > { %v336_v42 = vpop.f32.mrf.mxu0  ;;  %v377_v43 = vpop.f32.mrf.mxu1 }
  0xf8   : > { %v385_v45 = vmin.f32 %v381_v40, 6.0  ;;  %v387_v49 = vmin.f32 %v383_v41, 6.0 }
  0xf9   : > { %v337_v46 = vpop.f32.mrf.mxu0  ;;  %v378_v47 = vpop.f32.mrf.mxu1 }
  0xfa   : > { %v388_v50 = vadd.f32 %v385_v45, %v384_v44  ;;  %v397_v51 = vadd.f32 %v387_v49, %v386_v48 }
  0xfc   : > { %389 = vadd.xlane.f32.xlu0 %v388_v50 }
 0x100   : > { %398 = vadd.xlane.f32.xlu0 %v397_v51 }
 0x185   : > { %v390_v52 = vpop.xlane.xlu0 %389 }
 0x186   : > { %v392_v53 = vmul.f32 0.00390625, %v390_v52 }
 0x188   : > { %v393_v54 = vsub.f32 %v384_v44, %v392_v53  ;;  %v394_v55 = vsub.f32 %v385_v45, %v392_v53 }
 0x189   : > { %v399_v56 = vpop.xlane.xlu0 %398 }
 0x18a   : > { %395 = vst [vmem:[%s194_s5] sm:$0xff] %v393_v54  ;;  %v400_v57 = vmul.f32 0.00390625, %v399_v56  ;;  %396 = vst [vmem:[%s194_s5 + $0x8] sm:$0xff] %v394_v55 }
 0x18c   : > { %v401_v58 = vsub.f32 %v386_v48, %v400_v57  ;;  %v402_v59 = vsub.f32 %v387_v49, %v400_v57 }
 0x18e   : > { %403 = vst [vmem:[%s194_s5 + $0x10] sm:$0xff] %v401_v58  ;;  %404 = vst [vmem:[%s194_s5 + $0x18] sm:$0xff] %v402_v59 }
 0x18f PF: > { %p9_p9 = scmp.ge.s32.totalorder %s605_s13, 4   ;;  %s664_s9 = smov %s566_s10 }
 0x190   : > { %s665_s10 = smov %s614_s16  ;;  %s666_s11 = smov %s605_s13 }
 0x191   :  { %11 = sbr.rel (!%p9_p9) target bundleno = 2 (0x2), region = 86 }

// kernel: sub.14
= control target key start
LH: loop header
LB: loop body
LE: loop exit
PB: predicated region body
PF: predicated region fallthrough
CT: control target
= control target key end

     0   :  { %s130_s0 = inlined_call_operand.vmem [shape: f32[32,4], index: 0, kind: input, shape index: {}]   ;;  %s131_s1 = inlined_call_operand.vmem [shape: f32[32,4,4,4], index: 1, kind: output, shape index: {}]  }
   0x1   :  { %v4_v0 = vld [vmem:[%s130_s0] ss:$0 sm:$0xff]  ;;  %v42_v1 = vld [vmem:[%s130_s0 + $0x1] ss:$0 sm:$0xff]  ;;  %v44_v2 = vld [vmem:[%s130_s0 + $0x2] ss:$0 sm:$0xff] }
   0x2   :  { %5 = vst [vmem:[%s131_s1] sm:$0xf] %v4_v0  ;;  %43 = vst [vmem:[%s131_s1 + $0x10] sm:$0xf] %v42_v1  ;;  %v46_v3 = vld [vmem:[%s130_s0 + $0x3] ss:$0 sm:$0xff] }
   0x3   :  { %45 = vst [vmem:[%s131_s1 + $0x20] sm:$0xf] %v44_v2  ;;  %48 = vst [vmem:[%s131_s1 + $0x4] sm:$0xf] %v4_v0 }
   0x4   :  { %49 = vst [vmem:[%s131_s1 + $0x14] sm:$0xf] %v42_v1  ;;  %50 = vst [vmem:[%s131_s1 + $0x24] sm:$0xf] %v44_v2 }
   0x5   :  { %52 = vst [vmem:[%s131_s1 + $0x8] sm:$0xf] %v4_v0  ;;  %53 = vst [vmem:[%s131_s1 + $0x18] sm:$0xf] %v42_v1 }
   0x6   :  { %54 = vst [vmem:[%s131_s1 + $0x28] sm:$0xf] %v44_v2  ;;  %56 = vst [vmem:[%s131_s1 + $0xc] sm:$0xf] %v4_v0 }
   0x7   :  { %57 = vst [vmem:[%s131_s1 + $0x1c] sm:$0xf] %v42_v1  ;;  %58 = vst [vmem:[%s131_s1 + $0x2c] sm:$0xf] %v44_v2 }
   0x8   :  { %47 = vst [vmem:[%s131_s1 + $0x30] sm:$0xf] %v46_v3  ;;  %51 = vst [vmem:[%s131_s1 + $0x34] sm:$0xf] %v46_v3 }
   0x9   :  { %55 = vst [vmem:[%s131_s1 + $0x38] sm:$0xf] %v46_v3  ;;  %59 = vst [vmem:[%s131_s1 + $0x3c] sm:$0xf] %v46_v3 }

// kernel: gnet_forward.7
= control target key start
LH: loop header
LB: loop body
LE: loop exit
PB: predicated region body
PF: predicated region fallthrough
CT: control target
= control target key end

     0   :  { %s1213_s20 = smov 0   ;;  %s1742_s0 = inlined_call_operand.vmem [shape: f32[256,128], index: 0, kind: input, shape index: {}]   ;;  %s1743_s1 = inlined_call_operand.vmem [shape: f32[256,128], index: 1, kind: input, shape index: {}]   ;;  %s1744_s2 = inlined_call_operand.<no memory space> [shape: f32[1,1], index: 2, kind: input, shape index: {}]   ;;  %s1745_s3 = inlined_call_operand.vmem [shape: f32[256,1], index: 3, kind: output, shape index: {0}]   ;;  %s1746_s4 = inlined_call_operand.vmem [shape: f32[256,1], index: 4, kind: output, shape index: {1}]   ;;  %s1747_s5 = inlined_call_operand.vmem [shape: f32[256,1], index: 5, kind: output, shape index: {2}]  }
   0x1   :  { %11 = sst [smem:[#allocation2]] %s1744_s2 }
   0x2 LB: > { %s1016_s21 = sadd.s32 4294967295, %s1177_s20   ;;  %p1020_p0 = scmp.ge.s32.totalorder %s1177_s20, 1  ;;  %s1177_s20 = sphi %s1213_s20, %s17_s20  }
   0x3   : > { %p205_p1 = scmp.lt.s32.totalorder %s1177_s20, 3 }
   0x5   : > { %p206_p2 = pnand %p1020_p0, %p205_p1 }
   0x6   : > { %s1021_s22 = sshll.u32 (!%p206_p2), %s1016_s21, 4  ;;  %s1246_s29 = sld [smem:[#allocation2]] (!%p206_p2) }
   0x7   : > { %209 = sbr.rel (%p206_p2) target bundleno = 304 (0x130), region = 32  ;;  %p249_p3 = scmp.lt.s32.totalorder (!%p206_p2), %s1021_s22, 31 }
   0xc   : > { %s1752_s22 = smov (!%p249_p3, %s1021_s22), 31  ;;  %s1063_s30 = sadd.f32 -0.7, %s1246_s29 }
   0xd   : > { %s1221_s23 = sshll.u32 %s1752_s22, 3 }
   0xe   : > { %s1227_s25 = scalar_lea.vmem %s1742_s0, %s1221_s23  ;;  %s1233_s28 = scalar_lea.vmem %s1743_s1, %s1221_s23 }
   0xf   : > { %v1236_v0 = vld [vmem:[%s1227_s25 + $0x8] sm:$0xff]  ;;  %v1240_v2 = vld [vmem:[%s1227_s25] sm:$0xff]  ;;  %v1244_v5 = vld [vmem:[%s1227_s25 + $0x18] sm:$0xff]  ;;  %s1392_s6 = smul.f32 3.3333333, %s1063_s30  ;;  %s1629_s10 = scalar_lea.vmem %s1746_s4, %s1221_s23 }
  0x10   : > { %v295_v1 = vld [vmem:[%s1233_s28 + $0x8] sm:$0xff]  ;;  %v294_v4 = vld [vmem:[%s1233_s28] sm:$0xff]  ;;  %v1249_v6 = vadd.f32 1e-10, %v1236_v0  ;;  %v297_v8 = vld [vmem:[%s1233_s28 + $0x18] sm:$0xff]  ;;  %s1667_s13 = scalar_lea.vmem %s1745_s3, %s1221_s23  ;;  %s1703_s16 = scalar_lea.vmem %s1747_s5, %s1221_s23 }
  0x11   : > { %v328_v3 = vadd.f32 1e-10, %v295_v1  ;;  %v327_v7 = vadd.f32 1e-10, %v294_v4  ;;  %v1253_v9 = vld [vmem:[%s1227_s25 + $0x10] sm:$0xff]  ;;  %v1260_v13 = vld [vmem:[%s1227_s25 + $0x28] sm:$0xff] }
  0x12   : > { %v1256_v10 = vadd.f32 1e-10, %v1240_v2  ;;  %v330_v11 = vadd.f32 1e-10, %v297_v8  ;;  %v296_v12 = vld [vmem:[%s1233_s28 + $0x10] sm:$0xff]  ;;  %v299_v16 = vld [vmem:[%s1233_s28 + $0x28] sm:$0xff] }
  0x13   : > { %1075 = vrcp.f32 %v328_v3  ;;  %v1263_v14 = vadd.f32 1e-10, %v1244_v5  ;;  %v329_v15 = vadd.f32 1e-10, %v296_v12  ;;  %v1267_v17 = vld [vmem:[%s1227_s25 + $0x20] sm:$0xff]  ;;  %v1274_v21 = vld [vmem:[%s1227_s25 + $0x38] sm:$0xff] }
  0x14   : > { %1077 = vrcp.f32 %v327_v7  ;;  %v1270_v18 = vadd.f32 1e-10, %v1253_v9  ;;  %v332_v19 = vadd.f32 1e-10, %v299_v16  ;;  %v298_v20 = vld [vmem:[%s1233_s28 + $0x20] sm:$0xff]  ;;  %v301_v24 = vld [vmem:[%s1233_s28 + $0x38] sm:$0xff] }
  0x15   : > { %1079 = vrcp.f32 %v330_v11  ;;  %v1277_v22 = vadd.f32 1e-10, %v1260_v13  ;;  %v331_v23 = vadd.f32 1e-10, %v298_v20  ;;  %v1281_v25 = vld [vmem:[%s1227_s25 + $0x30] sm:$0xff]  ;;  %v1288_v29 = vld [vmem:[%s1227_s25 + $0x48] sm:$0xff] }
  0x16   : > { %1081 = vrcp.f32 %v329_v15  ;;  %v1284_v26 = vadd.f32 1e-10, %v1267_v17  ;;  %v334_v27 = vadd.f32 1e-10, %v301_v24  ;;  %v300_v28 = vld [vmem:[%s1233_s28 + $0x30] sm:$0xff]  ;;  %v303_v32 = vld [vmem:[%s1233_s28 + $0x48] sm:$0xff] }
  0x17   : > { %1083 = vrcp.f32 %v332_v19  ;;  %v1291_v30 = vadd.f32 1e-10, %v1274_v21  ;;  %v333_v31 = vadd.f32 1e-10, %v300_v28  ;;  %v1295_v33 = vld [vmem:[%s1227_s25 + $0x40] sm:$0xff]  ;;  %v1302_v37 = vld [vmem:[%s1227_s25 + $0x58] sm:$0xff] }
  0x18   : > { %1085 = vrcp.f32 %v331_v23  ;;  %v1298_v34 = vadd.f32 1e-10, %v1281_v25  ;;  %v336_v35 = vadd.f32 1e-10, %v303_v32  ;;  %v302_v36 = vld [vmem:[%s1233_s28 + $0x40] sm:$0xff]  ;;  %v305_v40 = vld [vmem:[%s1233_s28 + $0x58] sm:$0xff] }
  0x19   : > { %1087 = vrcp.f32 %v334_v27  ;;  %v1305_v38 = vadd.f32 1e-10, %v1288_v29  ;;  %v335_v39 = vadd.f32 1e-10, %v302_v36  ;;  %v1309_v41 = vadd.f32 1e-10, %v1295_v33 }
  0x1a   : > { %1089 = vrcp.f32 %v333_v31  ;;  %v338_v42 = vadd.f32 1e-10, %v305_v40  ;;  %v304_v43 = vld [vmem:[%s1233_s28 + $0x50] sm:$0xff]  ;;  %v1313_v44 = vadd.f32 1e-10, %v1302_v37  ;;  %v307_v47 = vld [vmem:[%s1233_s28 + $0x68] sm:$0xff] }
  0x1b   : > { %1091 = vrcp.f32 %v336_v35  ;;  %v1316_v45 = vld [vmem:[%s1227_s25 + $0x50] sm:$0xff]  ;;  %v337_v46 = vadd.f32 1e-10, %v304_v43  ;;  %v1320_v48 = vld [vmem:[%s1227_s25 + $0x68] sm:$0xff]  ;;  %v340_v49 = vadd.f32 1e-10, %v307_v47 }
  0x1c   : > { %1093 = vrcp.f32 %v335_v39  ;;  %v1323_v50 = vld [vmem:[%s1227_s25 + $0x60] sm:$0xff]  ;;  %v1327_v53 = vld [vmem:[%s1227_s25 + $0x78] sm:$0xff]  ;;  %v1331_v55 = vld [vmem:[%s1227_s25 + $0x70] sm:$0xff]  ;;  %v1334_v56 = vadd.f32 1e-10, %v1316_v45  ;;  %s653_s7 = ssub.f32 1.0, %s1392_s6 }
  0x1d   : > { %1095 = vrcp.f32 %v338_v42  ;;  %v306_v51 = vld [vmem:[%s1233_s28 + $0x60] sm:$0xff]  ;;  %v309_v54 = vld [vmem:[%s1233_s28 + $0x78] sm:$0xff]  ;;  %v308_v58 = vld [vmem:[%s1233_s28 + $0x70] sm:$0xff]  ;;  %v1338_v60 = vadd.f32 1e-10, %v1320_v48 }
  0x1e   : > { %1097 = vrcp.f32 %v337_v46  ;;  %v339_v52 = vadd.f32 1e-10, %v306_v51  ;;  %v342_v57 = vadd.f32 1e-10, %v309_v54  ;;  %v1341_v61 = vadd.f32 1e-10, %v1323_v50 }
  0x1f   : > { %1099 = vrcp.f32 %v340_v49  ;;  %v341_v62 = vadd.f32 1e-10, %v308_v58  ;;  %v1345_v3 = vadd.f32 1e-10, %v1327_v53  ;;  %v1348_v4 = vadd.f32 1e-10, %v1331_v55 }
  0x20   : > { %v1076_v59 = vpop.eup %1075  ;;  %1101 = vrcp.f32 %v339_v52  ;;  %v801_v11 = vand.u32 2147483647, %v1236_v0  ;;  %v800_v12 = vand.u32 2147483647, %v1240_v2  ;;  %v803_v19 = vand.u32 2147483647, %v1244_v5 }
  0x21   : > { %v1078_v63 = vpop.eup %1077  ;;  %v346_v1 = vmul.f32 %v1076_v59, %v1249_v6  ;;  %1103 = vrcp.f32 %v342_v57  ;;  %v802_v20 = vand.u32 2147483647, %v1253_v9  ;;  %v1179_v57 = vmov 0.0  }
  0x22   : > { %v1080_v7 = vpop.eup %1079  ;;  %v344_v8 = vmul.f32 %v1078_v63, %v1256_v10  ;;  %1105 = vrcp.f32 %v341_v62  ;;  %v805_v10 = vand.u32 2147483647, %v1260_v13  ;;  %v1749_v9 = vand.u32 2147483647, %v1274_v21 }
  0x23   : > { %v1082_v15 = vpop.eup %1081  ;;  %v376_v16 = vmax.f32 %v346_v1, 0.7  ;;  %v350_v6 = vmul.f32 %v1080_v7, %v1263_v14  ;;  %v811_v21 = vand.u32 2147483647, %v1302_v37 }
  0x24   : > { %v1084_v23 = vpop.eup %1083  ;;  %v375_v24 = vmax.f32 %v344_v8, 0.7  ;;  %v348_v27 = vmul.f32 %v1082_v15, %v1270_v18 }
  0x25   : > { %v1086_v31 = vpop.eup %1085  ;;  %v392_v32 = vmin.f32 %v376_v16, 1.0  ;;  %v378_v35 = vmax.f32 %v350_v6, 0.7  ;;  %v354_v36 = vmul.f32 %v1084_v23, %v1277_v22 }
  0x26   : > { %v1088_v14 = vpop.eup %1087  ;;  %v391_v40 = vmin.f32 %v375_v24, 1.0  ;;  %v377_v42 = vmax.f32 %v348_v27, 0.7  ;;  %v352_v43 = vmul.f32 %v1086_v31, %v1284_v26 }
  0x27   : > { %v1090_v47 = vpop.eup %1089  ;;  %vm408_vm0 = vcmp.lt.f32.partialorder %v392_v32, 1.0  ;;  %vm424_vm1 = vcmp.gt.f32.partialorder %v392_v32, 0.7  ;;  %v1364_v18 = vadd.f32 -0.7, %v392_v32  ;;  %v394_v49 = vmin.f32 %v378_v35, 1.0 }
  0x28   : > { %v1092_v51 = vpop.eup %1091  ;;  %vm440_vm2 = vmand %vm408_vm0, %vm424_vm1  ;;  %vm407_vm3 = vcmp.lt.f32.partialorder %v391_v40, 1.0  ;;  %vm423_vm4 = vcmp.gt.f32.partialorder %v391_v40, 0.7  ;;  %v1366_v22 = vadd.f32 -0.7, %v391_v40  ;;  %v393_v52 = vmin.f32 %v377_v42, 1.0 }
  0x29   : > { %v1094_v54 = vpop.eup %1093  ;;  %v1369_v58 = vsel %vm440_vm2, 1.0, %v1179_v57  ;;  %vm439_vm5 = vmand %vm407_vm3, %vm423_vm4  ;;  %vm410_vm6 = vcmp.lt.f32.partialorder %v394_v49, 1.0  ;;  %vm426_vm7 = vcmp.gt.f32.partialorder %v394_v49, 0.7  ;;  %v1371_v26 = vadd.f32 -0.7, %v394_v49 }
  0x2a   : > { %v1096_v59 = vpop.eup %1095  ;;  %754 = vadd.xlane.f32.xlu1 %v1369_v58  ;;  %v1375_v62 = vsel %vm439_vm5, 1.0, %v1179_v57  ;;  %vm442_vm8 = vmand %vm410_vm6, %vm426_vm7  ;;  %vm409_vm9 = vcmp.lt.f32.partialorder %v393_v52, 1.0  ;;  %vm425_vm10 = vcmp.gt.f32.partialorder %v393_v52, 0.7  ;;  %v1377_v63 = vadd.f32 -0.7, %v393_v52 }
  0x2b   : > { %v1098_v1 = vpop.eup %1097  ;;  %752 = vadd.xlane.f32.xlu0 %v1375_v62  ;;  %v1381_v7 = vsel %vm442_vm8, 1.0, %v1179_v57  ;;  %vm441_vm11 = vmand %vm409_vm9, %vm425_vm10  ;;  %v380_v8 = vmax.f32 %v354_v36, 0.7  ;;  %v379_v15 = vmax.f32 %v352_v43, 0.7  ;;  %v358_v16 = vmul.f32 %v1088_v14, %v1291_v30 }
  0x2c   : > { %v1100_v6 = vpop.eup %1099  ;;  %v1385_v23 = vsel %vm441_vm11, 1.0, %v1179_v57  ;;  %v356_v24 = vmul.f32 %v1090_v47, %v1298_v34  ;;  %v362_v27 = vmul.f32 %v1092_v51, %v1305_v38  ;;  %v360_v31 = vmul.f32 %v1094_v54, %v1309_v41 }
  0x2d   : > { %v1102_v32 = vpop.eup %1101  ;;  %v396_v35 = vmin.f32 %v380_v8, 1.0  ;;  %v395_v36 = vmin.f32 %v379_v15, 1.0  ;;  %v382_v40 = vmax.f32 %v358_v16, 0.7  ;;  %v366_v30 = vmul.f32 %v1096_v59, %v1313_v44 }
  0x2e   : > { %v1104_v14 = vpop.eup %1103  ;;  %758 = vadd.xlane.f32.xlu1 %v1381_v7  ;;  %v381_v42 = vmax.f32 %v356_v24, 0.7  ;;  %v384_v43 = vmax.f32 %v362_v27, 0.7  ;;  %v383_v34 = vmax.f32 %v360_v31, 0.7  ;;  %v1397_v47 = vstv %s1392_s6 }
  0x2f   : > { %v1106_v38 = vpop.eup %1105  ;;  %756 = vadd.xlane.f32.xlu0 %v1385_v23  ;;  %vm412_vm12 = vcmp.lt.f32.partialorder %v396_v35, 1.0  ;;  %vm428_vm13 = vcmp.gt.f32.partialorder %v396_v35, 0.7  ;;  %vm411_vm14 = vcmp.lt.f32.partialorder %v395_v36, 1.0  ;;  %v364_v41 = vmul.f32 %v1098_v1, %v1334_v56 }
  0x30   : > { %vm444_vm15 = vmand %vm412_vm12, %vm428_vm13  ;;  %v1401_v49 = vadd.f32 -0.7, %v396_v35  ;;  %vm427_vm0 = vcmp.gt.f32.partialorder %v395_v36, 0.7  ;;  %v398_v44 = vmin.f32 %v382_v40, 1.0  ;;  %v397_v51 = vmin.f32 %v381_v42, 1.0 }
  0x31   : > { %v1404_v52 = vsel %vm444_vm15, 1.0, %v1179_v57  ;;  %vm443_vm1 = vmand %vm411_vm14, %vm427_vm0  ;;  %v400_v54 = vmin.f32 %v384_v43, 1.0  ;;  %v399_v59 = vmin.f32 %v383_v34, 1.0  ;;  %v386_v8 = vmax.f32 %v366_v30, 0.7 }
  0x32   : > { %762 = vadd.xlane.f32.xlu1 %v1404_v52  ;;  %v1408_v15 = vsel %vm443_vm1, 1.0, %v1179_v57  ;;  %v1410_v16 = vadd.f32 -0.7, %v395_v36  ;;  %vm414_vm2 = vcmp.lt.f32.partialorder %v398_v44, 1.0  ;;  %vm430_vm3 = vcmp.gt.f32.partialorder %v398_v44, 0.7 }
  0x33   : > { %760 = vadd.xlane.f32.xlu0 %v1408_v15  ;;  %vm446_vm4 = vmand %vm414_vm2, %vm430_vm3  ;;  %v1413_v56 = vadd.f32 -0.7, %v398_v44  ;;  %vm413_vm5 = vcmp.lt.f32.partialorder %v397_v51, 1.0  ;;  %vm429_vm6 = vcmp.gt.f32.partialorder %v397_v51, 0.7  ;;  %vm416_vm7 = vcmp.lt.f32.partialorder %v400_v54, 1.0 }
  0x34   : > { %v1416_v1 = vsel %vm446_vm4, 1.0, %v1179_v57  ;;  %vm445_vm8 = vmand %vm413_vm5, %vm429_vm6  ;;  %v1418_v24 = vadd.f32 -0.7, %v397_v51  ;;  %vm432_vm9 = vcmp.gt.f32.partialorder %v400_v54, 0.7  ;;  %vm415_vm10 = vcmp.lt.f32.partialorder %v399_v59, 1.0 }
  0x35   : > { %v1421_v27 = vsel %vm445_vm8, 1.0, %v1179_v57  ;;  %vm448_vm11 = vmand %vm416_vm7, %vm432_vm9  ;;  %v1423_v31 = vadd.f32 -0.7, %v400_v54  ;;  %vm431_vm12 = vcmp.gt.f32.partialorder %v399_v59, 0.7  ;;  %v402_v35 = vmin.f32 %v386_v8, 1.0 }
  0x36   : > { %766 = vadd.xlane.f32.xlu1 %v1416_v1  ;;  %vm447_vm13 = vmand %vm415_vm10, %vm431_vm12  ;;  %v1426_v36 = vadd.f32 -0.7, %v399_v59  ;;  %v385_v40 = vmax.f32 %v364_v41, 0.7  ;;  %v370_v30 = vmul.f32 %v1100_v6, %v1338_v60  ;;  %v368_v42 = vmul.f32 %v1102_v32, %v1341_v61 }
  0x37   : > { %764 = vadd.xlane.f32.xlu0 %v1421_v27  ;;  %v1432_v43 = vsel %vm448_vm11, 1.0, %v1179_v57  ;;  %v1435_v34 = vsel %vm447_vm13, 1.0, %v1179_v57  ;;  %vm418_vm14 = vcmp.lt.f32.partialorder %v402_v35, 1.0  ;;  %vm434_vm15 = vcmp.gt.f32.partialorder %v402_v35, 0.7 }
  0x38   : > { %vm450_vm0 = vmand %vm418_vm14, %vm434_vm15  ;;  %v401_v44 = vmin.f32 %v385_v40, 1.0  ;;  %v388_v51 = vmax.f32 %v370_v30, 0.7  ;;  %v387_v54 = vmax.f32 %v368_v42, 0.7  ;;  %v374_v41 = vmul.f32 %v1104_v14, %v1345_v3 }
  0x39   : > { %v1439_v60 = vsel %vm450_vm0, 1.0, %v1179_v57  ;;  %v1441_v61 = vadd.f32 -0.7, %v402_v35  ;;  %v372_v6 = vmul.f32 %v1106_v38, %v1348_v4  ;;  %v506_v32 = vmul.f32 3.3333333, %v1377_v63 }
  0x3a   : > { %770 = vadd.xlane.f32.xlu1 %v1432_v43  ;;  %vm417_vm1 = vcmp.lt.f32.partialorder %v401_v44, 1.0  ;;  %vm433_vm2 = vcmp.gt.f32.partialorder %v401_v44, 0.7  ;;  %v404_v59 = vmin.f32 %v388_v51, 1.0  ;;  %v504_v8 = vmul.f32 3.3333333, %v1366_v22 }
  0x3b   : > { %768 = vadd.xlane.f32.xlu0 %v1435_v34  ;;  %vm449_vm3 = vmand %vm417_vm1, %vm433_vm2  ;;  %v403_v3 = vmin.f32 %v387_v54, 1.0  ;;  %v390_v14 = vmax.f32 %v374_v41, 0.7  ;;  %v389_v40 = vmax.f32 %v372_v6, 0.7  ;;  %1107 = vlog2.f32 %v506_v32 }
  0x3c   : > { %v1450_v35 = vsel %vm449_vm3, 1.0, %v1179_v57  ;;  %v1057_v4 = vadd.f32 -0.7, %v401_v44  ;;  %vm420_vm4 = vcmp.lt.f32.partialorder %v404_v59, 1.0  ;;  %vm436_vm5 = vcmp.gt.f32.partialorder %v404_v59, 0.7 }
  0x3d   : > { %vm452_vm6 = vmand %vm420_vm4, %vm436_vm5  ;;  %v1060_v63 = vadd.f32 -0.7, %v404_v59  ;;  %vm419_vm7 = vcmp.lt.f32.partialorder %v403_v3, 1.0  ;;  %vm435_vm8 = vcmp.gt.f32.partialorder %v403_v3, 0.7  ;;  %v406_v38 = vmin.f32 %v390_v14, 1.0 }
  0x3e   : > { %774 = vadd.xlane.f32.xlu1 %v1439_v60  ;;  %vm451_vm9 = vmand %vm419_vm7, %vm435_vm8  ;;  %v1059_v22 = vadd.f32 -0.7, %v403_v3  ;;  %v405_v30 = vmin.f32 %v389_v40, 1.0  ;;  %v574_v42 = vsub.f32 1.0, %v506_v32  ;;  %1109 = vlog2.f32 %v504_v8 }
  0x3f   : > { %772 = vadd.xlane.f32.xlu0 %v1450_v35  ;;  %v1455_v51 = vsel %vm452_vm6, 1.0, %v1179_v57  ;;  %v1458_v44 = vsel %vm451_vm9, 1.0, %v1179_v57  ;;  %vm422_vm10 = vcmp.lt.f32.partialorder %v406_v38, 1.0  ;;  %vm438_vm11 = vcmp.gt.f32.partialorder %v406_v38, 0.7 }
  0x40   : > { %vm454_vm12 = vmand %vm422_vm10, %vm438_vm11  ;;  %v1062_v54 = vadd.f32 -0.7, %v406_v38  ;;  %vm421_vm13 = vcmp.lt.f32.partialorder %v405_v30, 1.0  ;;  %vm437_vm14 = vcmp.gt.f32.partialorder %v405_v30, 0.7  ;;  %1111 = vlog2.f32 %v574_v42 }
  0x41   : > { %vm453_vm15 = vmand %vm421_vm13, %vm437_vm14  ;;  %v1460_v41 = vstv %s653_s7  ;;  %v572_v6 = vsub.f32 1.0, %v504_v8  ;;  %v507_v32 = vmul.f32 3.3333333, %v1371_v26  ;;  %v505_v59 = vmul.f32 3.3333333, %v1364_v18 }
  0x42   : > { %778 = vadd.xlane.f32.xlu1 %v1455_v51  ;;  %v1466_v3 = vsel %vm454_vm12, 1.0, %v1179_v57  ;;  %v509_v14 = vmul.f32 3.3333333, %v1401_v49  ;;  %v508_v40 = vmul.f32 3.3333333, %v1410_v16  ;;  %v1473_v38 = vmul.f32 %v1369_v58, %v801_v11 }
  0x43   : > { %776 = vadd.xlane.f32.xlu0 %v1458_v44  ;;  %1113 = vlog2.f32 %v572_v6  ;;  %v575_v26 = vsub.f32 1.0, %v507_v32  ;;  %v573_v8 = vsub.f32 1.0, %v505_v59  ;;  %v511_v18 = vmul.f32 3.3333333, %v1413_v56 }
  0x44   : > { %v1478_v42 = vsel %vm453_vm15, 1.0, %v1179_v57  ;;  %v1061_v46 = vadd.f32 -0.7, %v405_v30  ;;  %1115 = vlog2.f32 %v507_v32  ;;  %v510_v49 = vmul.f32 3.3333333, %v1418_v24 }
  0x45   : > { %1117 = vlog2.f32 %v575_v26  ;;  %v577_v16 = vsub.f32 1.0, %v509_v14  ;;  %v513_v0 = vmul.f32 3.3333333, %v1423_v31  ;;  %v1483_v11 = vmul.f32 3.3333333, %v1426_v36 }
  0x46   : > { %782 = vadd.xlane.f32.xlu1 %v1466_v3  ;;  %1119 = vlog2.f32 %v505_v59  ;;  %v576_v58 = vsub.f32 1.0, %v508_v40  ;;  %v1487_v56 = vmul.f32 3.3333333, %v1441_v61  ;;  %v1489_v57 = vmul.f32 3.3333333, %v1057_v4 }
  0x47   : > { %780 = vadd.xlane.f32.xlu0 %v1478_v42  ;;  %1121 = vlog2.f32 %v573_v8  ;;  %v579_v24 = vsub.f32 1.0, %v511_v18  ;;  %v578_v30 = vsub.f32 1.0, %v510_v49  ;;  %v1492_v6 = vmul.f32 3.3333333, %v1060_v63 }
  0x48   : > { %v1108_v31 = vpop.eup %1107  ;;  %1123 = vlog2.f32 %v509_v14  ;;  %v581_v36 = vsub.f32 1.0, %v513_v0  ;;  %v580_v32 = vsub.f32 1.0, %v1483_v11  ;;  %v1495_v26 = vmul.f32 3.3333333, %v1059_v22 }
  0x49   : > { %v529_v59 = vmul.f32 0.6931472, %v1108_v31  ;;  %1125 = vlog2.f32 %v577_v16  ;;  %v583_v61 = vsub.f32 1.0, %v1487_v56  ;;  %v582_v4 = vsub.f32 1.0, %v1489_v57 }
  0x4a   : > { %1127 = vlog2.f32 %v508_v40  ;;  %v585_v8 = vsub.f32 1.0, %v1492_v6  ;;  %v1500_v39 = vmul.f32 3.3333333, %v1062_v54  ;;  %v1505_v63 = vmul.f32 %v1375_v62, %v800_v12 }
  0x4b   : > { %v1110_v14 = vpop.eup %1109  ;;  %v558_v28 = vmax.f32 %v529_v59, -100.0  ;;  %1129 = vlog2.f32 %v576_v58  ;;  %v584_v22 = vsub.f32 1.0, %v1495_v26  ;;  %v1511_v16 = vmul.f32 %v1381_v7, %v803_v19 }
  0x4c   : > { %v525_v40 = vmul.f32 0.6931472, %v1110_v14  ;;  %1131 = vlog2.f32 %v511_v18  ;;  %v1513_v31 = vmul.f32 3.3333333, %v1061_v46  ;;  %v1518_v2 = vmul.f32 %v1385_v23, %v802_v20 }
  0x4d   : > { %v1112_v12 = vpop.eup %1111  ;;  %v639_v62 = vmul.f32 %v1397_v47, %v558_v28  ;;  %1133 = vlog2.f32 %v579_v24  ;;  %v1524_v5 = vmul.f32 %v1404_v52, %v805_v10  ;;  %v1748_v19 = vand.u32 2147483647, %v1267_v17 }
  0x4e   : > { %v593_v46 = vmul.f32 0.6931472, %v1112_v12  ;;  %v556_v54 = vmax.f32 %v525_v40, -100.0  ;;  %1135 = vlog2.f32 %v510_v49  ;;  %v1534_v20 = vmul.f32 %v1416_v1, %v1749_v9 }
  0x4f   : > { %v1529_v7 = vmul.f32 %v1408_v15, %v1748_v19  ;;  %1137 = vlog2.f32 %v578_v30  ;;  %v1750_v28 = vand.u32 2147483647, %v1281_v25  ;;  %v809_v10 = vand.u32 2147483647, %v1288_v29 }
  0x50   : > { %v808_v17 = vand.u32 2147483647, %v1295_v33  ;;  %v1114_v23 = vpop.eup %1113  ;;  %v622_v52 = vmax.f32 %v593_v46, -100.0  ;;  %v637_v15 = vmul.f32 %v1397_v47, %v556_v54  ;;  %1139 = vlog2.f32 %v513_v0 }
  0x51   : > { %v1539_v13 = vmul.f32 %v1421_v27, %v1750_v28  ;;  %v1116_v18 = vpop.eup %1115  ;;  %v589_v1 = vmul.f32 0.6931472, %v1114_v23  ;;  %1141 = vlog2.f32 %v581_v36  ;;  %v1546_v49 = vmul.f32 %v1432_v43, %v809_v10 }
  0x52   : > { %v1549_v25 = vmul.f32 %v1435_v34, %v808_v17  ;;  %v1118_v27 = vpop.eup %1117  ;;  %v657_v29 = vmul.f32 %v1460_v41, %v622_v52  ;;  %v531_v33 = vmul.f32 0.6931472, %v1116_v18  ;;  %1143 = vlog2.f32 %v1483_v11 }
  0x53   : > { %v1554_v58 = vmul.f32 %v1439_v60, %v811_v21  ;;  %v1120_v0 = vpop.eup %1119  ;;  %v620_v37 = vmax.f32 %v589_v1, -100.0  ;;  %v595_v24 = vmul.f32 0.6931472, %v1118_v27  ;;  %1145 = vlog2.f32 %v580_v32 }
  0x54   : > { %v810_v30 = vand.u32 2147483647, %v1316_v45  ;;  %v1122_v43 = vpop.eup %1121  ;;  %v673_v36 = vadd.f32 %v657_v29, %v639_v62  ;;  %v559_v59 = vmax.f32 %v531_v33, -100.0  ;;  %v527_v34 = vmul.f32 0.6931472, %v1120_v0 }
  0x55   : > { %1147 = vlog2.f32 %v1487_v56  ;;  %v1124_v14 = vpop.eup %1123  ;;  %v655_v40 = vmul.f32 %v1460_v41, %v620_v37  ;;  %v623_v12 = vmax.f32 %v595_v24, -100.0  ;;  %v591_v11 = vmul.f32 0.6931472, %v1122_v43 }
  0x56   : > { %1149 = vlog2.f32 %v583_v61  ;;  %v1126_v60 = vpop.eup %1125  ;;  %v689_v19 = vsub.f32 0.0, %v673_v36  ;;  %v640_v46 = vmul.f32 %v1397_v47, %v559_v59  ;;  %v557_v54 = vmax.f32 %v527_v34, -100.0 }
  0x57   : > { %v535_v32 = vmul.f32 0.6931472, %v1124_v14  ;;  %v1128_v9 = vpop.eup %1127  ;;  %v671_v28 = vadd.f32 %v655_v40, %v637_v15  ;;  %v658_v62 = vmul.f32 %v1460_v41, %v623_v12  ;;  %v621_v10 = vmax.f32 %v591_v11, -100.0 }
  0x58   : > { %v599_v17 = vmul.f32 0.6931472, %v1126_v60  ;;  %v1130_v23 = vpop.eup %1129  ;;  %707 = vadd.xlane.f32.xlu1 %v689_v19  ;;  %v638_v56 = vmul.f32 %v1397_v47, %v557_v54  ;;  %v533_v21 = vmul.f32 0.6931472, %v1128_v9  ;;  %1151 = vlog2.f32 %v1489_v57 }
  0x59   : > { %v561_v52 = vmax.f32 %v535_v32, -100.0  ;;  %v1132_v61 = vpop.eup %1131  ;;  %v687_v18 = vsub.f32 0.0, %v671_v28  ;;  %v674_v1 = vadd.f32 %v658_v62, %v640_v46  ;;  %v656_v27 = vmul.f32 %v1460_v41, %v621_v10 }
  0x5a   : > { %v625_v29 = vmax.f32 %v599_v17, -100.0  ;;  %v1134_v33 = vpop.eup %1133  ;;  %v560_v0 = vmax.f32 %v533_v21, -100.0  ;;  %v597_v37 = vmul.f32 0.6931472, %v1130_v23  ;;  %v539_v24 = vmul.f32 0.6931472, %v1132_v61 }
  0x5b   : > { %v642_v15 = vmul.f32 %v1397_v47, %v561_v52  ;;  %v1136_v43 = vpop.eup %1135  ;;  %703 = vadd.xlane.f32.xlu0 %v687_v18  ;;  %v690_v36 = vsub.f32 0.0, %v674_v1  ;;  %v672_v59 = vadd.f32 %v656_v27, %v638_v56  ;;  %v603_v14 = vmul.f32 0.6931472, %v1134_v33 }
  0x5c   : > { %v660_v34 = vmul.f32 %v1460_v41, %v625_v29  ;;  %v1138_v40 = vpop.eup %1137  ;;  %v624_v12 = vmax.f32 %v597_v37, -100.0  ;;  %v641_v11 = vmul.f32 %v1397_v47, %v560_v0  ;;  %v563_v60 = vmax.f32 %v539_v24, -100.0 }
  0x5d   : > { %v537_v19 = vmul.f32 0.6931472, %v1136_v43  ;;  %v1140_v46 = vpop.eup %1139  ;;  %709 = vadd.xlane.f32.xlu1 %v690_v36  ;;  %v688_v54 = vsub.f32 0.0, %v672_v59  ;;  %v627_v9 = vmax.f32 %v603_v14, -100.0  ;;  %v601_v28 = vmul.f32 0.6931472, %v1138_v40 }
  0x5e   : > { %v676_v32 = vadd.f32 %v660_v34, %v642_v15  ;;  %v1142_v62 = vpop.eup %1141  ;;  %v659_v10 = vmul.f32 %v1460_v41, %v624_v12  ;;  %v644_v17 = vmul.f32 %v1397_v47, %v563_v60  ;;  %v543_v56 = vmul.f32 0.6931472, %v1140_v46 }
  0x5f   : > { %v562_v23 = vmax.f32 %v537_v19, -100.0  ;;  %v1144_v52 = vpop.eup %1143  ;;  %705 = vadd.xlane.f32.xlu0 %v688_v54  ;;  %v662_v61 = vmul.f32 %v1460_v41, %v627_v9  ;;  %v626_v18 = vmax.f32 %v601_v28, -100.0  ;;  %v607_v1 = vmul.f32 0.6931472, %v1142_v62 }
  0x60   : > { %v692_v21 = vsub.f32 0.0, %v676_v32  ;;  %v1146_v27 = vpop.eup %1145  ;;  %v675_v29 = vadd.f32 %v659_v10, %v641_v11  ;;  %v565_v15 = vmax.f32 %v543_v56, -100.0  ;;  %v541_v0 = vmul.f32 0.6931472, %v1144_v52 }
  0x61   : > { %v643_v33 = vmul.f32 %v1397_v47, %v562_v23  ;;  %v678_v24 = vadd.f32 %v662_v61, %v644_v17  ;;  %v661_v43 = vmul.f32 %v1460_v41, %v626_v18  ;;  %v629_v36 = vmax.f32 %v607_v1, -100.0 }
  0x62   : > { %v1148_v37 = vpop.eup %1147  ;;  %713 = vadd.xlane.f32.xlu1 %v692_v21  ;;  %v605_v59 = vmul.f32 0.6931472, %v1146_v27  ;;  %v691_v14 = vsub.f32 0.0, %v675_v29  ;;  %v646_v40 = vmul.f32 %v1397_v47, %v565_v15  ;;  %v564_v12 = vmax.f32 %v541_v0, -100.0 }
  0x63   : > { %v1150_v34 = vpop.eup %1149  ;;  %v547_v60 = vmul.f32 0.6931472, %v1148_v37  ;;  %v694_v19 = vsub.f32 0.0, %v678_v24  ;;  %v677_v46 = vadd.f32 %v661_v43, %v643_v33  ;;  %v664_v11 = vmul.f32 %v1460_v41, %v629_v36 }
  0x64   : > { %v628_v54 = vmax.f32 %v605_v59, -100.0  ;;  %711 = vadd.xlane.f32.xlu0 %v691_v14  ;;  %v645_v32 = vmul.f32 %v1397_v47, %v564_v12  ;;  %v611_v28 = vmul.f32 0.6931472, %v1150_v34  ;;  %1153 = vlog2.f32 %v582_v4 }
  0x65   : > { %v567_v9 = vmax.f32 %v547_v60, -100.0  ;;  %v1152_v62 = vpop.eup %1151  ;;  %v693_v10 = vsub.f32 0.0, %v677_v46  ;;  %v680_v17 = vadd.f32 %v664_v11, %v646_v40  ;;  %1155 = vlog2.f32 %v1492_v6 }
  0x66   : > { %717 = vadd.xlane.f32.xlu1 %v694_v19  ;;  %v663_v23 = vmul.f32 %v1460_v41, %v628_v54  ;;  %v631_v56 = vmax.f32 %v611_v28, -100.0  ;;  %1157 = vlog2.f32 %v585_v8  ;;  %v587_v21 = vsub.f32 1.0, %v1500_v39 }
  0x67   : > { %v648_v52 = vmul.f32 %v1397_v47, %v567_v9  ;;  %v696_v61 = vsub.f32 0.0, %v680_v17  ;;  %1159 = vlog2.f32 %v1495_v26  ;;  %v1587_v57 = vmul.f32 %v1450_v35, %v810_v30 }
  0x68   : > { %v679_v18 = vadd.f32 %v663_v23, %v645_v32  ;;  %715 = vadd.xlane.f32.xlu0 %v693_v10  ;;  %v666_v4 = vmul.f32 %v1460_v41, %v631_v56  ;;  %1161 = vlog2.f32 %v584_v22  ;;  %v586_v6 = vsub.f32 1.0, %v1513_v31 }
  0x69   : > { %1163 = vlog2.f32 %v1500_v39  ;;  %v545_v35 = vmul.f32 0.6931472, %v1152_v62  ;;  %vm735_vm0 = vcmask 7168  }
  0x6a   : > { %721 = vadd.xlane.f32.xlu1 %v696_v61  ;;  %v695_v8 = vsub.f32 0.0, %v679_v18  ;;  %v682_v1 = vadd.f32 %v666_v4, %v648_v52  ;;  %1165 = vlog2.f32 %v587_v21 }
  0x6b   : > { %1167 = vlog2.f32 %v1513_v31  ;;  %v566_v30 = vmax.f32 %v545_v35, -100.0 }
  0x6c   : > { %719 = vadd.xlane.f32.xlu0 %v695_v8  ;;  %v698_v45 = vsub.f32 0.0, %v682_v1  ;;  %1169 = vlog2.f32 %v586_v6 }
  0x6d   : > { %v647_v37 = vmul.f32 %v1397_v47, %v566_v30 }
  0x6e   : > { %725 = vadd.xlane.f32.xlu1 %v698_v45 }
  0x71   : > { %v1154_v27 = vpop.eup %1153 }
  0x72   : > { %v1156_v29 = vpop.eup %1155  ;;  %v609_v26 = vmul.f32 0.6931472, %v1154_v27 }
  0x73   : > { %v1158_v22 = vpop.eup %1157  ;;  %v551_v33 = vmul.f32 0.6931472, %v1156_v29 }
  0x74   : > { %v1160_v15 = vpop.eup %1159  ;;  %v630_v0 = vmax.f32 %v609_v26, -100.0  ;;  %v615_v39 = vmul.f32 0.6931472, %v1158_v22 }
  0x75   : > { %v1162_v24 = vpop.eup %1161  ;;  %v569_v43 = vmax.f32 %v551_v33, -100.0  ;;  %v549_v36 = vmul.f32 0.6931472, %v1160_v15 }
  0x76   : > { %v1164_v31 = vpop.eup %1163  ;;  %v665_v59 = vmul.f32 %v1460_v41, %v630_v0  ;;  %v633_v34 = vmax.f32 %v615_v39, -100.0  ;;  %v613_v14 = vmul.f32 0.6931472, %v1162_v24 }
  0x77   : > { %v1166_v40 = vpop.eup %1165  ;;  %v650_v12 = vmul.f32 %v1397_v47, %v569_v43  ;;  %v568_v60 = vmax.f32 %v549_v36, -100.0  ;;  %v555_v19 = vmul.f32 0.6931472, %v1164_v31 }
  0x78   : > { %v1168_v46 = vpop.eup %1167  ;;  %v681_v11 = vadd.f32 %v665_v59, %v647_v37  ;;  %v668_v54 = vmul.f32 %v1460_v41, %v633_v34  ;;  %v632_v32 = vmax.f32 %v613_v14, -100.0  ;;  %v619_v9 = vmul.f32 0.6931472, %v1166_v40 }
  0x79   : > { %v1170_v28 = vpop.eup %1169  ;;  %v649_v62 = vmul.f32 %v1397_v47, %v568_v60  ;;  %v571_v10 = vmax.f32 %v555_v19, -100.0  ;;  %v553_v17 = vmul.f32 0.6931472, %v1168_v46 }
  0x7a   : > { %v697_v23 = vsub.f32 0.0, %v681_v11  ;;  %v684_v56 = vadd.f32 %v668_v54, %v650_v12  ;;  %v667_v52 = vmul.f32 %v1460_v41, %v632_v32  ;;  %v635_v21 = vmax.f32 %v619_v9, -100.0 }
  0x7b   : > { %v652_v61 = vmul.f32 %v1397_v47, %v571_v10  ;;  %v570_v18 = vmax.f32 %v553_v17, -100.0  ;;  %v617_v4 = vmul.f32 0.6931472, %v1170_v28 }
  0x7c   : > { %723 = vadd.xlane.f32.xlu0 %v697_v23  ;;  %v700_v6 = vsub.f32 0.0, %v684_v56  ;;  %v683_v8 = vadd.f32 %v667_v52, %v649_v62  ;;  %v670_v1 = vmul.f32 %v1460_v41, %v635_v21 }
  0x7d   : > { %v634_v45 = vmax.f32 %v617_v4, -100.0  ;;  %v651_v35 = vmul.f32 %v1397_v47, %v570_v18  ;;  %v813_v47 = vand.u32 2147483647, %v1320_v48 }
  0x7e   : > { %729 = vadd.xlane.f32.xlu1 %v700_v6  ;;  %v699_v30 = vsub.f32 0.0, %v683_v8  ;;  %v686_v27 = vadd.f32 %v670_v1, %v652_v61 }
  0x7f   : > { %v669_v29 = vmul.f32 %v1460_v41, %v634_v45  ;;  %v812_v41 = vand.u32 2147483647, %v1323_v50 }
  0x80   : > { %727 = vadd.xlane.f32.xlu0 %v699_v30  ;;  %v702_v26 = vsub.f32 0.0, %v686_v27 }
  0x81   : > { %v685_v22 = vadd.f32 %v669_v29, %v651_v35 }
  0x82   : > { %733 = vadd.xlane.f32.xlu1 %v702_v26 }
  0x83   : > { %v701_v33 = vsub.f32 0.0, %v685_v22 }
  0x85   : > { %731 = vadd.xlane.f32.xlu0 %v701_v33 }
  0x86   : > { %834 = vadd.xlane.f32.xlu1 %v1473_v38  ;;  %v829_v38 = vmul.f32 %v1455_v51, %v813_v47 }
  0x89   : > { %832 = vadd.xlane.f32.xlu0 %v1505_v63  ;;  %v815_v63 = vand.u32 2147483647, %v1327_v53 }
  0x8a   : > { %838 = vadd.xlane.f32.xlu1 %v1511_v16  ;;  %v828_v16 = vmul.f32 %v1458_v44, %v812_v41 }
  0x8d   : > { %836 = vadd.xlane.f32.xlu0 %v1518_v2  ;;  %v814_v2 = vand.u32 2147483647, %v1331_v55 }
  0x8e   : > { %842 = vadd.xlane.f32.xlu1 %v1524_v5  ;;  %v831_v5 = vmul.f32 %v1466_v3, %v815_v63 }
  0x8f   : > { %v830_v48 = vmul.f32 %v1478_v42, %v814_v2 }
  0x91   : > { %840 = vadd.xlane.f32.xlu0 %v1529_v7 }
  0x92   : > { %846 = vadd.xlane.f32.xlu1 %v1534_v20 }
  0x95   : > { %844 = vadd.xlane.f32.xlu0 %v1539_v13 }
  0x96   : > { %850 = vadd.xlane.f32.xlu1 %v1546_v49 }
  0x99   : > { %848 = vadd.xlane.f32.xlu0 %v1549_v25 }
  0x9a   : > { %854 = vadd.xlane.f32.xlu1 %v1554_v58 }
  0x9d   : > { %852 = vadd.xlane.f32.xlu0 %v1587_v57 }
  0x9e   : > { %858 = vadd.xlane.f32.xlu1 %v829_v38 }
  0xa1   : > { %856 = vadd.xlane.f32.xlu0 %v828_v16 }
  0xa2   : > { %862 = vadd.xlane.f32.xlu1 %v831_v5 }
  0xa5   : > { %860 = vadd.xlane.f32.xlu0 %v830_v48 }
  0xb3   : > { %v755_v50 = vpop.xlane.xlu1 %754 }
  0xb4   : > { %785 = vst.msk [vmem:[%s1629_s10 + $0x8] sm:$0xff] %vm735_vm0, %v755_v50  ;;  %v753_v53 = vpop.xlane.xlu0 %752 }
  0xb5   : > { %784 = vst.msk [vmem:[%s1629_s10] sm:$0xff] %vm735_vm0, %v753_v53 }
  0xb7   : > { %v759_v55 = vpop.xlane.xlu1 %758 }
  0xb8   : > { %787 = vst.msk [vmem:[%s1629_s10 + $0x18] sm:$0xff] %vm735_vm0, %v759_v55  ;;  %v757_v51 = vpop.xlane.xlu0 %756 }
  0xb9   : > { %786 = vst.msk [vmem:[%s1629_s10 + $0x10] sm:$0xff] %vm735_vm0, %v757_v51 }
  0xbb   : > { %v763_v44 = vpop.xlane.xlu1 %762 }
  0xbc   : > { %789 = vst.msk [vmem:[%s1629_s10 + $0x28] sm:$0xff] %vm735_vm0, %v763_v44  ;;  %v761_v3 = vpop.xlane.xlu0 %760 }
  0xbd   : > { %788 = vst.msk [vmem:[%s1629_s10 + $0x20] sm:$0xff] %vm735_vm0, %v761_v3 }
  0xbf   : > { %v767_v42 = vpop.xlane.xlu1 %766 }
  0xc0   : > { %791 = vst.msk [vmem:[%s1629_s10 + $0x38] sm:$0xff] %vm735_vm0, %v767_v42  ;;  %v765_v7 = vpop.xlane.xlu0 %764 }
  0xc1   : > { %790 = vst.msk [vmem:[%s1629_s10 + $0x30] sm:$0xff] %vm735_vm0, %v765_v7 }
  0xc3   : > { %v771_v20 = vpop.xlane.xlu1 %770 }
  0xc4   : > { %793 = vst.msk [vmem:[%s1629_s10 + $0x48] sm:$0xff] %vm735_vm0, %v771_v20  ;;  %v769_v13 = vpop.xlane.xlu0 %768 }
  0xc5   : > { %792 = vst.msk [vmem:[%s1629_s10 + $0x40] sm:$0xff] %vm735_vm0, %v769_v13 }
  0xc7   : > { %v775_v49 = vpop.xlane.xlu1 %774 }
  0xc8   : > { %795 = vst.msk [vmem:[%s1629_s10 + $0x58] sm:$0xff] %vm735_vm0, %v775_v49  ;;  %v773_v25 = vpop.xlane.xlu0 %772 }
  0xc9   : > { %794 = vst.msk [vmem:[%s1629_s10 + $0x50] sm:$0xff] %vm735_vm0, %v773_v25 }
  0xcb   : > { %v779_v58 = vpop.xlane.xlu1 %778 }
  0xcc   : > { %797 = vst.msk [vmem:[%s1629_s10 + $0x68] sm:$0xff] %vm735_vm0, %v779_v58  ;;  %v777_v57 = vpop.xlane.xlu0 %776 }
  0xcd   : > { %796 = vst.msk [vmem:[%s1629_s10 + $0x60] sm:$0xff] %vm735_vm0, %v777_v57 }
  0xcf   : > { %v783_v15 = vpop.xlane.xlu1 %782 }
  0xd0   : > { %799 = vst.msk [vmem:[%s1629_s10 + $0x78] sm:$0xff] %vm735_vm0, %v783_v15  ;;  %v781_v0 = vpop.xlane.xlu0 %780 }
  0xd1   : > { %798 = vst.msk [vmem:[%s1629_s10 + $0x70] sm:$0xff] %vm735_vm0, %v781_v0 }
  0xe1   : > { %v708_v37 = vpop.xlane.xlu1 %707 }
  0xe2   : > { %738 = vst.msk [vmem:[%s1667_s13 + $0x10] sm:$0xff] %vm735_vm0, %v708_v37 }
  0xe4   : > { %v704_v39 = vpop.xlane.xlu0 %703 }
  0xe5   : > { %736 = vst.msk [vmem:[%s1667_s13] sm:$0xff] %vm735_vm0, %v704_v39 }
  0xe6   : > { %v710_v24 = vpop.xlane.xlu1 %709 }
  0xe7   : > { %739 = vst.msk [vmem:[%s1667_s13 + $0x18] sm:$0xff] %vm735_vm0, %v710_v24 }
  0xe8   : > { %v706_v43 = vpop.xlane.xlu0 %705 }
  0xe9   : > { %737 = vst.msk [vmem:[%s1667_s13 + $0x8] sm:$0xff] %vm735_vm0, %v706_v43 }
  0xeb   : > { %v714_v36 = vpop.xlane.xlu1 %713 }
  0xec   : > { %741 = vst.msk [vmem:[%s1667_s13 + $0x28] sm:$0xff] %vm735_vm0, %v714_v36 }
  0xed   : > { %v712_v31 = vpop.xlane.xlu0 %711 }
  0xee   : > { %740 = vst.msk [vmem:[%s1667_s13 + $0x20] sm:$0xff] %vm735_vm0, %v712_v31 }
  0xef   : > { %v718_v59 = vpop.xlane.xlu1 %717 }
  0xf0   : > { %743 = vst.msk [vmem:[%s1667_s13 + $0x38] sm:$0xff] %vm735_vm0, %v718_v59 }
  0xf1   : > { %v716_v34 = vpop.xlane.xlu0 %715 }
  0xf2   : > { %742 = vst.msk [vmem:[%s1667_s13 + $0x30] sm:$0xff] %vm735_vm0, %v716_v34 }
  0xf3   : > { %v722_v14 = vpop.xlane.xlu1 %721 }
  0xf4   : > { %745 = vst.msk [vmem:[%s1667_s13 + $0x48] sm:$0xff] %vm735_vm0, %v722_v14 }
  0xf5   : > { %v720_v40 = vpop.xlane.xlu0 %719 }
  0xf6   : > { %744 = vst.msk [vmem:[%s1667_s13 + $0x40] sm:$0xff] %vm735_vm0, %v720_v40 }
  0xf7   : > { %v726_v12 = vpop.xlane.xlu1 %725 }
  0xf8   : > { %747 = vst.msk [vmem:[%s1667_s13 + $0x58] sm:$0xff] %vm735_vm0, %v726_v12 }
 0x105   : > { %v724_v60 = vpop.xlane.xlu0 %723 }
 0x106   : > { %746 = vst.msk [vmem:[%s1667_s13 + $0x50] sm:$0xff] %vm735_vm0, %v724_v60 }
 0x107   : > { %v730_v19 = vpop.xlane.xlu1 %729 }
 0x108   : > { %749 = vst.msk [vmem:[%s1667_s13 + $0x68] sm:$0xff] %vm735_vm0, %v730_v19 }
 0x109   : > { %v728_v46 = vpop.xlane.xlu0 %727 }
 0x10a   : > { %748 = vst.msk [vmem:[%s1667_s13 + $0x60] sm:$0xff] %vm735_vm0, %v728_v46 }
 0x10b   : > { %v734_v11 = vpop.xlane.xlu1 %733 }
 0x10c   : > { %751 = vst.msk [vmem:[%s1667_s13 + $0x78] sm:$0xff] %vm735_vm0, %v734_v11 }
 0x10e   : > { %v732_v54 = vpop.xlane.xlu0 %731 }
 0x10f   : > { %750 = vst.msk [vmem:[%s1667_s13 + $0x70] sm:$0xff] %vm735_vm0, %v732_v54  ;;  %v835_v32 = vpop.xlane.xlu1 %834 }
 0x110   : > { %865 = vst.msk [vmem:[%s1703_s16 + $0x8] sm:$0xff] %vm735_vm0, %v835_v32 }
 0x112   : > { %v833_v9 = vpop.xlane.xlu0 %832 }
 0x113   : > { %864 = vst.msk [vmem:[%s1703_s16] sm:$0xff] %vm735_vm0, %v833_v9  ;;  %v839_v28 = vpop.xlane.xlu1 %838 }
 0x114   : > { %867 = vst.msk [vmem:[%s1703_s16 + $0x18] sm:$0xff] %vm735_vm0, %v839_v28 }
 0x116   : > { %v837_v62 = vpop.xlane.xlu0 %836 }
 0x117   : > { %866 = vst.msk [vmem:[%s1703_s16 + $0x10] sm:$0xff] %vm735_vm0, %v837_v62  ;;  %v843_v10 = vpop.xlane.xlu1 %842 }
 0x118   : > { %869 = vst.msk [vmem:[%s1703_s16 + $0x28] sm:$0xff] %vm735_vm0, %v843_v10 }
 0x11a   : > { %v841_v17 = vpop.xlane.xlu0 %840 }
 0x11b   : > { %868 = vst.msk [vmem:[%s1703_s16 + $0x20] sm:$0xff] %vm735_vm0, %v841_v17  ;;  %v847_v23 = vpop.xlane.xlu1 %846 }
 0x11c   : > { %871 = vst.msk [vmem:[%s1703_s16 + $0x38] sm:$0xff] %vm735_vm0, %v847_v23 }
 0x11e   : > { %v845_v56 = vpop.xlane.xlu0 %844 }
 0x11f   : > { %870 = vst.msk [vmem:[%s1703_s16 + $0x30] sm:$0xff] %vm735_vm0, %v845_v56  ;;  %v851_v52 = vpop.xlane.xlu1 %850 }
 0x120   : > { %873 = vst.msk [vmem:[%s1703_s16 + $0x48] sm:$0xff] %vm735_vm0, %v851_v52 }
 0x122   : > { %v849_v21 = vpop.xlane.xlu0 %848 }
 0x123   : > { %872 = vst.msk [vmem:[%s1703_s16 + $0x40] sm:$0xff] %vm735_vm0, %v849_v21  ;;  %v855_v61 = vpop.xlane.xlu1 %854 }
 0x124   : > { %875 = vst.msk [vmem:[%s1703_s16 + $0x58] sm:$0xff] %vm735_vm0, %v855_v61 }
 0x126   : > { %v853_v18 = vpop.xlane.xlu0 %852 }
 0x127   : > { %874 = vst.msk [vmem:[%s1703_s16 + $0x50] sm:$0xff] %vm735_vm0, %v853_v18  ;;  %v859_v4 = vpop.xlane.xlu1 %858 }
 0x128   : > { %877 = vst.msk [vmem:[%s1703_s16 + $0x68] sm:$0xff] %vm735_vm0, %v859_v4 }
 0x12a   : > { %v857_v6 = vpop.xlane.xlu0 %856 }
 0x12b   : > { %876 = vst.msk [vmem:[%s1703_s16 + $0x60] sm:$0xff] %vm735_vm0, %v857_v6  ;;  %v863_v8 = vpop.xlane.xlu1 %862 }
 0x12c   : > { %879 = vst.msk [vmem:[%s1703_s16 + $0x78] sm:$0xff] %vm735_vm0, %v863_v8 }
 0x12e   : > { %v861_v1 = vpop.xlane.xlu0 %860 }
 0x12f   : > { %878 = vst.msk [vmem:[%s1703_s16 + $0x70] sm:$0xff] %vm735_vm0, %v861_v1 }
 0x130 PF: > { %s17_s20 = sadd.s32 1, %s1177_s20  }
 0x131   : > { %p14_p4 = scmp.ge.s32.totalorder %s17_s20, 4  }
 0x133   :  { %16 = sbr.rel (!%p14_p4) target bundleno = 2 (0x2), region = 89 }

</bundles_post_ra>
